<compile_context>
chip_gen: v7x
topology: tpu7x:2x2x1
jax: 0.10.0
libtpu: 0.0.40
codegen_flags: <defaults>
</compile_context>

<pallas_src>
import math

import numpy as np
import jax
import jax.numpy as jnp
from jax.experimental import pallas as pl
from jax.experimental.pallas import tpu as pltpu

ALIGN_CORNERS = True  # matches the PyTorch module


def _interp_matrix(out_size: int, in_size: int) -> np.ndarray:
    """Dense 1-D bilinear interpolation matrix (align_corners=True)."""
    i = np.arange(out_size, dtype=np.float64)
    if out_size > 1 and in_size > 1:
        src = i * (in_size - 1) / (out_size - 1)
    else:
        src = np.zeros_like(i)
    lo = np.clip(np.floor(src).astype(np.int64), 0, in_size - 1)
    hi = np.minimum(lo + 1, in_size - 1)
    frac = src - lo
    m = np.zeros((out_size, in_size), dtype=np.float64)
    m[np.arange(out_size), lo] += 1.0 - frac
    m[np.arange(out_size), hi] += frac
    return m.astype(np.float32)


def _padded_vmem_bytes(shape, itemsize):
    """Rough VMEM footprint of one buffer with (8,128) tile padding."""
    s = [int(d) for d in shape]
    s[-1] = -(-s[-1] // 128) * 128
    if len(s) >= 2:
        s[-2] = -(-s[-2] // 8) * 8
    n = 1
    for d in s:
        n *= d
    return n * itemsize


def hrnet_fpn_seg_ocr_decoder(x):
    """x: list/tuple of 4 NCHW arrays -> channel concat at x[0]'s resolution."""
    assert len(x) == 4
    n = int(x[0].shape[0])
    h0, w0 = int(x[0].shape[2]), int(x[0].shape[3])
    cs = [int(xi.shape[1]) for xi in x]
    hs = [int(xi.shape[2]) for xi in x]
    ws = [int(xi.shape[3]) for xi in x]
    dtype = x[0].dtype
    itemsize = jnp.dtype(dtype).itemsize
    c_total = sum(cs)

    copy_scale = [hs[s] == h0 and ws[s] == w0 for s in range(4)]

    # ---- block sizing: channel block must divide every scale's channel
    # ---- count (gcd divisor), batch block divides N; both chosen as large
    # ---- as fits a conservative VMEM budget (double-buffered blocks).
    g = 0
    for c in cs:
        g = math.gcd(g, c)

    def block_bytes(nb, cb):
        tot = 2 * _padded_vmem_bytes((nb, cb, h0, w0), itemsize)       # output
        for s in range(4):                                             # inputs
            tot += 2 * _padded_vmem_bytes((nb, cb, hs[s], ws[s]), itemsize)
        for s in range(1, 4):                                          # weights
            tot += _padded_vmem_bytes((h0, hs[s]), 4)
            tot += _padded_vmem_bytes((ws[s], w0), 4)
        return tot

    budget = 12 * 1024 * 1024
    c_blk = 1
    for d in range(1, g + 1):
        if g % d == 0 and d <= 128 and block_bytes(1, d) <= budget:
            c_blk = d
    n_blk = 1
    for d in range(1, n + 1):
        if n % d == 0 and block_bytes(d, c_blk) <= budget:
            n_blk = d

    nblk = [c // c_blk for c in cs]              # channel blocks per scale
    start_blk = [0, 0, 0, 0, 0]
    for s in range(4):
        start_blk[s + 1] = start_blk[s] + nblk[s]
    nblk_total = start_blk[4]

    # Per-scale compile-time interpolation matrices (resident in VMEM).
    wy = [None] + [jnp.asarray(_interp_matrix(h0, hs[s])) for s in range(1, 4)]
    wxt = [None] + [jnp.asarray(_interp_matrix(w0, ws[s]).T)
                    for s in range(1, 4)]

    def kernel(x0_ref, x1_ref, x2_ref, x3_ref,
               wy1_ref, wy2_ref, wy3_ref,
               wx1_ref, wx2_ref, wx3_ref, o_ref):
        j = pl.program_id(1)  # output channel-block index
        x_refs = [x0_ref, x1_ref, x2_ref, x3_ref]
        wy_refs = [None, wy1_ref, wy2_ref, wy3_ref]
        wx_refs = [None, wx1_ref, wx2_ref, wx3_ref]

        for s in range(4):
            in_scale = jnp.logical_and(j >= start_blk[s], j < start_blk[s + 1])

            @pl.when(in_scale)
            def _(s=s):
                if copy_scale[s]:
                    # Same spatial size (always true for x[0]): block copy.
                    o_ref[...] = x_refs[s][...]
                else:
                    xin = x_refs[s][...]          # (n_blk, c_blk, H_in, W_in)
                    wx_t = wx_refs[s][...]        # (W_in, W0)
                    wy_m = wy_refs[s][...]        # (H0, H_in)

                    # Width interpolation: one big lane-dense GEMM when the
                    # (C,H)->rows merge is tile-aligned, else per channel.
                    if hs[s] % 8 == 0:
                        t = jnp.dot(
                            xin.reshape(n_blk * c_blk * hs[s], ws[s]), wx_t,
                            preferred_element_type=jnp.float32,
                        ).reshape(n_blk, c_blk, hs[s], w0)
                    else:
                        t = None

                    # Height interpolation: per-(b, c) GEMM producing a full
                    # (H0, W0) plane -> single dense full-tile store each.
                    for b in range(n_blk):
                        for c in range(c_blk):
                            if t is None:
                                tc = jnp.dot(xin[b, c], wx_t,
                                             preferred_element_type=jnp.float32)
                            else:
                                tc = t[b, c]
                            oc = jnp.dot(wy_m, tc,
                                         preferred_element_type=jnp.float32)
                            o_ref[b, c] = oc.astype(o_ref.dtype)

    # ---- BlockSpecs --------------------------------------------------------
    def _in_map(s):
        def idx(nn, jj):
            # Clamp to this scale's own block range so the same block index is
            # revisited outside the range (Pallas then skips the DMA).
            local = jnp.minimum(jnp.maximum(jj - start_blk[s], 0), nblk[s] - 1)
            return (nn, local, 0, 0)
        return idx

    in_specs = [
        pl.BlockSpec((n_blk, c_blk, hs[s], ws[s]), _in_map(s)) for s in range(4)
    ] + [
        pl.BlockSpec((h0, hs[s]), lambda nn, jj: (0, 0)) for s in range(1, 4)
    ] + [
        pl.BlockSpec((ws[s], w0), lambda nn, jj: (0, 0)) for s in range(1, 4)
    ]
    out_spec = pl.BlockSpec((n_blk, c_blk, h0, w0),
                            lambda nn, jj: (nn, jj, 0, 0))

    vmem_est = block_bytes(n_blk, c_blk)
    vmem_limit = int(min(64 * 1024 * 1024,
                         max(32 * 1024 * 1024, 2 * vmem_est)))

    out = pl.pallas_call(
        kernel,
        out_shape=jax.ShapeDtypeStruct((n, c_total, h0, w0), dtype),
        grid_spec=pltpu.PrefetchScalarGridSpec(
            num_scalar_prefetch=0,
            grid=(n // n_blk, nblk_total),
            in_specs=in_specs,
            out_specs=out_spec,
        ),
        compiler_params=pltpu.CompilerParams(
            dimension_semantics=("parallel", "parallel"),
            vmem_limit_bytes=vmem_limit),
    )(x[0], x[1], x[2], x[3], wy[1], wy[2], wy[3], wxt[1], wxt[2], wxt[3])
    return out


def _reference_resize(x: np.ndarray, out_h: int, out_w: int) -> np.ndarray:
    """NumPy reference: bilinear, align_corners=True (matches F.interpolate)."""
    wy = _interp_matrix(out_h, x.shape[2]).astype(np.float64)
    wx = _interp_matrix(out_w, x.shape[3]).astype(np.float64)
    return np.einsum('oh,nchw,pw->ncop', wy, x.astype(np.float64), wx
                     ).astype(np.float32)


if __name__ == "__main__":
    key = jax.random.PRNGKey(0)
    k0, k1, k2, k3 = jax.random.split(key, 4)
    N = 2
    H0, W0 = 64, 128                      # HRNet-style pyramid: /1, /2, /4, /8
    x0 = jax.random.normal(k0, (N, 8, H0, W0), dtype=jnp.float32)
    x1 = jax.random.normal(k1, (N, 16, H0 // 2, W0 // 2), dtype=jnp.float32)
    x2 = jax.random.normal(k2, (N, 32, H0 // 4, W0 // 4), dtype=jnp.float32)
    x3 = jax.random.normal(k3, (N, 64, H0 // 8, W0 // 8), dtype=jnp.float32)

    feats = hrnet_fpn_seg_ocr_decoder([x0, x1, x2, x3])
    feats = jax.block_until_ready(feats)

    ref = np.concatenate(
        [np.asarray(x0),
         _reference_resize(np.asarray(x1), H0, W0),
         _reference_resize(np.asarray(x2), H0, W0),
         _reference_resize(np.asarray(x3), H0, W0)], axis=1)
    assert feats.shape == (N, 8 + 16 + 32 + 64, H0, W0), feats.shape
    np.testing.assert_allclose(np.asarray(feats), ref, rtol=1e-5, atol=1e-5)

    print("KERNEL_OK")
</pallas_src>

<mosaic_0001>
module attributes {stable_mosaic.version = 11 : i64} {
  func.func @kernel(%arg0: i32, %arg1: i32, %arg2: memref<2x8x64x128xf32, #tpu.memory_space<vmem>>, %arg3: memref<2x8x32x64xf32, #tpu.memory_space<vmem>>, %arg4: memref<2x8x16x32xf32, #tpu.memory_space<vmem>>, %arg5: memref<2x8x8x16xf32, #tpu.memory_space<vmem>>, %arg6: memref<64x32xf32, #tpu.memory_space<vmem>>, %arg7: memref<64x16xf32, #tpu.memory_space<vmem>>, %arg8: memref<64x8xf32, #tpu.memory_space<vmem>>, %arg9: memref<64x128xf32, #tpu.memory_space<vmem>>, %arg10: memref<32x128xf32, #tpu.memory_space<vmem>>, %arg11: memref<16x128xf32, #tpu.memory_space<vmem>>, %arg12: memref<2x8x64x128xf32, #tpu.memory_space<vmem>>) attributes {dimension_semantics = [#tpu.dimension_semantics<parallel>, #tpu.dimension_semantics<parallel>], iteration_bounds = array<i64: 1, 15>, scalar_prefetch = 0 : i64, scratch_operands = 0 : i64, tpu.core_type = #tpu.core_type<tc>, window_params = [{transform_indices = @transform_0, window_bounds = array<i64: 2, 8, 64, 128>}, {transform_indices = @transform_1, window_bounds = array<i64: 2, 8, 32, 64>}, {transform_indices = @transform_2, window_bounds = array<i64: 2, 8, 16, 32>}, {transform_indices = @transform_3, window_bounds = array<i64: 2, 8, 8, 16>}, {pipeline_mode = #tpu.pipeline_mode<synchronous>, transform_indices = @transform_4, window_bounds = array<i64: 64, 32>}, {pipeline_mode = #tpu.pipeline_mode<synchronous>, transform_indices = @transform_5, window_bounds = array<i64: 64, 16>}, {pipeline_mode = #tpu.pipeline_mode<synchronous>, transform_indices = @transform_6, window_bounds = array<i64: 64, 8>}, {pipeline_mode = #tpu.pipeline_mode<synchronous>, transform_indices = @transform_7, window_bounds = array<i64: 64, 128>}, {pipeline_mode = #tpu.pipeline_mode<synchronous>, transform_indices = @transform_8, window_bounds = array<i64: 32, 128>}, {pipeline_mode = #tpu.pipeline_mode<synchronous>, transform_indices = @transform_9, window_bounds = array<i64: 16, 128>}, {transform_indices = @transform_10, window_bounds = array<i64: 2, 8, 64, 128>}]} {
    %c0_i32 = arith.constant 0 : i32
    %0 = arith.cmpi sge, %arg1, %c0_i32 : i32
    %c1_i32 = arith.constant 1 : i32
    %1 = arith.cmpi slt, %arg1, %c1_i32 : i32
    %2 = arith.andi %0, %1 : i1
    %3 = arith.extui %2 : i1 to i32
    %c0_i32_0 = arith.constant 0 : i32
    %4 = arith.cmpi ne, %3, %c0_i32_0 : i32
    scf.if %4 {
      %c0 = arith.constant 0 : index
      %c0_7 = arith.constant 0 : index
      %c0_8 = arith.constant 0 : index
      %c0_9 = arith.constant 0 : index
      %20 = vector.load %arg2[%c0, %c0_7, %c0_8, %c0_9] : memref<2x8x64x128xf32, #tpu.memory_space<vmem>>, vector<2x8x64x128xf32>
      %c0_10 = arith.constant 0 : index
      %c0_11 = arith.constant 0 : index
      %c0_12 = arith.constant 0 : index
      %c0_13 = arith.constant 0 : index
      %21 = vector.load %arg12[%c0_10, %c0_11, %c0_12, %c0_13] : memref<2x8x64x128xf32, #tpu.memory_space<vmem>>, vector<2x8x64x128xf32>
      tpu.vector_store %arg12[%c0_10, %c0_11, %c0_12, %c0_13], %20 {strides = array<i32>} : memref<2x8x64x128xf32, #tpu.memory_space<vmem>>, vector<2x8x64x128xf32>,
    } else {
    }
    %c1_i32_1 = arith.constant 1 : i32
    %5 = arith.cmpi sge, %arg1, %c1_i32_1 : i32
    %c3_i32 = arith.constant 3 : i32
    %6 = arith.cmpi slt, %arg1, %c3_i32 : i32
    %7 = arith.andi %5, %6 : i1
    %8 = arith.extui %7 : i1 to i32
    %c0_i32_2 = arith.constant 0 : i32
    %9 = arith.cmpi ne, %8, %c0_i32_2 : i32
    scf.if %9 {
      %c0 = arith.constant 0 : index
      %c0_7 = arith.constant 0 : index
      %c0_8 = arith.constant 0 : index
      %c0_9 = arith.constant 0 : index
      %20 = vector.load %arg3[%c0, %c0_7, %c0_8, %c0_9] : memref<2x8x32x64xf32, #tpu.memory_space<vmem>>, vector<2x8x32x64xf32>
      %c0_10 = arith.constant 0 : index
      %c0_11 = arith.constant 0 : index
      %21 = vector.load %arg9[%c0_10, %c0_11] : memref<64x128xf32, #tpu.memory_space<vmem>>, vector<64x128xf32>
      %c0_12 = arith.constant 0 : index
      %c0_13 = arith.constant 0 : index
      %22 = vector.load %arg6[%c0_12, %c0_13] : memref<64x32xf32, #tpu.memory_space<vmem>>, vector<64x32xf32>
      %23 = vector.shape_cast %20 : vector<2x8x32x64xf32> to vector<512x64xf32>
      %cst = arith.constant dense<0.000000e+00> : vector<512x128xf32>
      %24 = tpu.matmul %23, %21, %cst {dimension_numbers = #tpu.dot_dimension_numbers<[1], [0], [0], [1], [0, 0, 1, 1], [], []>} : vector<512x64xf32>, vector<64x128xf32>, vector<512x128xf32> -> vector<512x128xf32>
      %25 = vector.shape_cast %24 : vector<512x128xf32> to vector<2x8x32x128xf32>
      %26 = vector.extract_strided_slice %25 {offsets = [0, 0, 0, 0], sizes = [1, 1, 32, 128], strides = [1, 1, 1, 1]} : vector<2x8x32x128xf32> to vector<1x1x32x128xf32>
      %27 = vector.shape_cast %26 : vector<1x1x32x128xf32> to vector<32x128xf32>
      %cst_14 = arith.constant dense<0.000000e+00> : vector<64x128xf32>
      %28 = tpu.matmul %22, %27, %cst_14 {dimension_numbers = #tpu.dot_dimension_numbers<[1], [0], [0], [1], [0, 0, 1, 1], [], []>} : vector<64x32xf32>, vector<32x128xf32>, vector<64x128xf32> -> vector<64x128xf32>
      %c0_15 = arith.constant 0 : index
      %c0_16 = arith.constant 0 : index
      %c0_17 = arith.constant 0 : index
      %c0_18 = arith.constant 0 : index
      %29 = vector.load %arg12[%c0_15, %c0_16, %c0_17, %c0_18] : memref<2x8x64x128xf32, #tpu.memory_space<vmem>>, vector<1x1x64x128xf32>
      %30 = vector.shape_cast %29 : vector<1x1x64x128xf32> to vector<64x128xf32>
      %31 = vector.shape_cast %28 : vector<64x128xf32> to vector<1x1x64x128xf32>
      tpu.vector_store %arg12[%c0_15, %c0_16, %c0_17, %c0_18], %31 {strides = array<i32>} : memref<2x8x64x128xf32, #tpu.memory_space<vmem>>, vector<1x1x64x128xf32>,
      %32 = vector.extract_strided_slice %25 {offsets = [0, 1, 0, 0], sizes = [1, 1, 32, 128], strides = [1, 1, 1, 1]} : vector<2x8x32x128xf32> to vector<1x1x32x128xf32>
      %33 = vector.shape_cast %32 : vector<1x1x32x128xf32> to vector<32x128xf32>
      %cst_19 = arith.constant dense<0.000000e+00> : vector<64x128xf32>
      %34 = tpu.matmul %22, %33, %cst_19 {dimension_numbers = #tpu.dot_dimension_numbers<[1], [0], [0], [1], [0, 0, 1, 1], [], []>} : vector<64x32xf32>, vector<32x128xf32>, vector<64x128xf32> -> vector<64x128xf32>
      %c0_20 = arith.constant 0 : index
      %c1 = arith.constant 1 : index
      %c0_21 = arith.constant 0 : index
      %c0_22 = arith.constant 0 : index
      %35 = vector.load %arg12[%c0_20, %c1, %c0_21, %c0_22] : memref<2x8x64x128xf32, #tpu.memory_space<vmem>>, vector<1x1x64x128xf32>
      %36 = vector.shape_cast %35 : vector<1x1x64x128xf32> to vector<64x128xf32>
      %37 = vector.shape_cast %34 : vector<64x128xf32> to vector<1x1x64x128xf32>
      tpu.vector_store %arg12[%c0_20, %c1, %c0_21, %c0_22], %37 {strides = array<i32>} : memref<2x8x64x128xf32, #tpu.memory_space<vmem>>, vector<1x1x64x128xf32>,
      %38 = vector.extract_strided_slice %25 {offsets = [0, 2, 0, 0], sizes = [1, 1, 32, 128], strides = [1, 1, 1, 1]} : vector<2x8x32x128xf32> to vector<1x1x32x128xf32>
      %39 = vector.shape_cast %38 : vector<1x1x32x128xf32> to vector<32x128xf32>
      %cst_23 = arith.constant dense<0.000000e+00> : vector<64x128xf32>
      %40 = tpu.matmul %22, %39, %cst_23 {dimension_numbers = #tpu.dot_dimension_numbers<[1], [0], [0], [1], [0, 0, 1, 1], [], []>} : vector<64x32xf32>, vector<32x128xf32>, vector<64x128xf32> -> vector<64x128xf32>
      %c0_24 = arith.constant 0 : index
      %c2 = arith.constant 2 : index
      %c0_25 = arith.constant 0 : index
      %c0_26 = arith.constant 0 : index
      %41 = vector.load %arg12[%c0_24, %c2, %c0_25, %c0_26] : memref<2x8x64x128xf32, #tpu.memory_space<vmem>>, vector<1x1x64x128xf32>
      %42 = vector.shape_cast %41 : vector<1x1x64x128xf32> to vector<64x128xf32>
      %43 = vector.shape_cast %40 : vector<64x128xf32> to vector<1x1x64x128xf32>
      tpu.vector_store %arg12[%c0_24, %c2, %c0_25, %c0_26], %43 {strides = array<i32>} : memref<2x8x64x128xf32, #tpu.memory_space<vmem>>, vector<1x1x64x128xf32>,
      %44 = vector.extract_strided_slice %25 {offsets = [0, 3, 0, 0], sizes = [1, 1, 32, 128], strides = [1, 1, 1, 1]} : vector<2x8x32x128xf32> to vector<1x1x32x128xf32>
      %45 = vector.shape_cast %44 : vector<1x1x32x128xf32> to vector<32x128xf32>
      %cst_27 = arith.constant dense<0.000000e+00> : vector<64x128xf32>
      %46 = tpu.matmul %22, %45, %cst_27 {dimension_numbers = #tpu.dot_dimension_numbers<[1], [0], [0], [1], [0, 0, 1, 1], [], []>} : vector<64x32xf32>, vector<32x128xf32>, vector<64x128xf32> -> vector<64x128xf32>
      %c0_28 = arith.constant 0 : index
      %c3 = arith.constant 3 : index
      %c0_29 = arith.constant 0 : index
      %c0_30 = arith.constant 0 : index
      %47 = vector.load %arg12[%c0_28, %c3, %c0_29, %c0_30] : memref<2x8x64x128xf32, #tpu.memory_space<vmem>>, vector<1x1x64x128xf32>
      %48 = vector.shape_cast %47 : vector<1x1x64x128xf32> to vector<64x128xf32>
      %49 = vector.shape_cast %46 : vector<64x128xf32> to vector<1x1x64x128xf32>
      tpu.vector_store %arg12[%c0_28, %c3, %c0_29, %c0_30], %49 {strides = array<i32>} : memref<2x8x64x128xf32, #tpu.memory_space<vmem>>, vector<1x1x64x128xf32>,
      %50 = vector.extract_strided_slice %25 {offsets = [0, 4, 0, 0], sizes = [1, 1, 32, 128], strides = [1, 1, 1, 1]} : vector<2x8x32x128xf32> to vector<1x1x32x128xf32>
      %51 = vector.shape_cast %50 : vector<1x1x32x128xf32> to vector<32x128xf32>
      %cst_31 = arith.constant dense<0.000000e+00> : vector<64x128xf32>
      %52 = tpu.matmul %22, %51, %cst_31 {dimension_numbers = #tpu.dot_dimension_numbers<[1], [0], [0], [1], [0, 0, 1, 1], [], []>} : vector<64x32xf32>, vector<32x128xf32>, vector<64x128xf32> -> vector<64x128xf32>
      %c0_32 = arith.constant 0 : index
      %c4 = arith.constant 4 : index
      %c0_33 = arith.constant 0 : index
      %c0_34 = arith.constant 0 : index
      %53 = vector.load %arg12[%c0_32, %c4, %c0_33, %c0_34] : memref<2x8x64x128xf32, #tpu.memory_space<vmem>>, vector<1x1x64x128xf32>
      %54 = vector.shape_cast %53 : vector<1x1x64x128xf32> to vector<64x128xf32>
      %55 = vector.shape_cast %52 : vector<64x128xf32> to vector<1x1x64x128xf32>
      tpu.vector_store %arg12[%c0_32, %c4, %c0_33, %c0_34], %55 {strides = array<i32>} : memref<2x8x64x128xf32, #tpu.memory_space<vmem>>, vector<1x1x64x128xf32>,
      %56 = vector.extract_strided_slice %25 {offsets = [0, 5, 0, 0], sizes = [1, 1, 32, 128], strides = [1, 1, 1, 1]} : vector<2x8x32x128xf32> to vector<1x1x32x128xf32>
      %57 = vector.shape_cast %56 : vector<1x1x32x128xf32> to vector<32x128xf32>
      %cst_35 = arith.constant dense<0.000000e+00> : vector<64x128xf32>
      %58 = tpu.matmul %22, %57, %cst_35 {dimension_numbers = #tpu.dot_dimension_numbers<[1], [0], [0], [1], [0, 0, 1, 1], [], []>} : vector<64x32xf32>, vector<32x128xf32>, vector<64x128xf32> -> vector<64x128xf32>
      %c0_36 = arith.constant 0 : index
      %c5 = arith.constant 5 : index
      %c0_37 = arith.constant 0 : index
      %c0_38 = arith.constant 0 : index
      %59 = vector.load %arg12[%c0_36, %c5, %c0_37, %c0_38] : memref<2x8x64x128xf32, #tpu.memory_space<vmem>>, vector<1x1x64x128xf32>
      %60 = vector.shape_cast %59 : vector<1x1x64x128xf32> to vector<64x128xf32>
      %61 = vector.shape_cast %58 : vector<64x128xf32> to vector<1x1x64x128xf32>
      tpu.vector_store %arg12[%c0_36, %c5, %c0_37, %c0_38], %61 {strides = array<i32>} : memref<2x8x64x128xf32, #tpu.memory_space<vmem>>, vector<1x1x64x128xf32>,
      %62 = vector.extract_strided_slice %25 {offsets = [0, 6, 0, 0], sizes = [1, 1, 32, 128], strides = [1, 1, 1, 1]} : vector<2x8x32x128xf32> to vector<1x1x32x128xf32>
      %63 = vector.shape_cast %62 : vector<1x1x32x128xf32> to vector<32x128xf32>
      %cst_39 = arith.constant dense<0.000000e+00> : vector<64x128xf32>
      %64 = tpu.matmul %22, %63, %cst_39 {dimension_numbers = #tpu.dot_dimension_numbers<[1], [0], [0], [1], [0, 0, 1, 1], [], []>} : vector<64x32xf32>, vector<32x128xf32>, vector<64x128xf32> -> vector<64x128xf32>
      %c0_40 = arith.constant 0 : index
      %c6 = arith.constant 6 : index
      %c0_41 = arith.constant 0 : index
      %c0_42 = arith.constant 0 : index
      %65 = vector.load %arg12[%c0_40, %c6, %c0_41, %c0_42] : memref<2x8x64x128xf32, #tpu.memory_space<vmem>>, vector<1x1x64x128xf32>
      %66 = vector.shape_cast %65 : vector<1x1x64x128xf32> to vector<64x128xf32>
      %67 = vector.shape_cast %64 : vector<64x128xf32> to vector<1x1x64x128xf32>
      tpu.vector_store %arg12[%c0_40, %c6, %c0_41, %c0_42], %67 {strides = array<i32>} : memref<2x8x64x128xf32, #tpu.memory_space<vmem>>, vector<1x1x64x128xf32>,
      %68 = vector.extract_strided_slice %25 {offsets = [0, 7, 0, 0], sizes = [1, 1, 32, 128], strides = [1, 1, 1, 1]} : vector<2x8x32x128xf32> to vector<1x1x32x128xf32>
      %69 = vector.shape_cast %68 : vector<1x1x32x128xf32> to vector<32x128xf32>
      %cst_43 = arith.constant dense<0.000000e+00> : vector<64x128xf32>
      %70 = tpu.matmul %22, %69, %cst_43 {dimension_numbers = #tpu.dot_dimension_numbers<[1], [0], [0], [1], [0, 0, 1, 1], [], []>} : vector<64x32xf32>, vector<32x128xf32>, vector<64x128xf32> -> vector<64x128xf32>
      %c0_44 = arith.constant 0 : index
      %c7 = arith.constant 7 : index
      %c0_45 = arith.constant 0 : index
      %c0_46 = arith.constant 0 : index
      %71 = vector.load %arg12[%c0_44, %c7, %c0_45, %c0_46] : memref<2x8x64x128xf32, #tpu.memory_space<vmem>>, vector<1x1x64x128xf32>
      %72 = vector.shape_cast %71 : vector<1x1x64x128xf32> to vector<64x128xf32>
      %73 = vector.shape_cast %70 : vector<64x128xf32> to vector<1x1x64x128xf32>
      tpu.vector_store %arg12[%c0_44, %c7, %c0_45, %c0_46], %73 {strides = array<i32>} : memref<2x8x64x128xf32, #tpu.memory_space<vmem>>, vector<1x1x64x128xf32>,
      %74 = vector.extract_strided_slice %25 {offsets = [1, 0, 0, 0], sizes = [1, 1, 32, 128], strides = [1, 1, 1, 1]} : vector<2x8x32x128xf32> to vector<1x1x32x128xf32>
      %75 = vector.shape_cast %74 : vector<1x1x32x128xf32> to vector<32x128xf32>
      %cst_47 = arith.constant dense<0.000000e+00> : vector<64x128xf32>
      %76 = tpu.matmul %22, %75, %cst_47 {dimension_numbers = #tpu.dot_dimension_numbers<[1], [0], [0], [1], [0, 0, 1, 1], [], []>} : vector<64x32xf32>, vector<32x128xf32>, vector<64x128xf32> -> vector<64x128xf32>
      %c1_48 = arith.constant 1 : index
      %c0_49 = arith.constant 0 : index
      %c0_50 = arith.constant 0 : index
      %c0_51 = arith.constant 0 : index
      %77 = vector.load %arg12[%c1_48, %c0_49, %c0_50, %c0_51] : memref<2x8x64x128xf32, #tpu.memory_space<vmem>>, vector<1x1x64x128xf32>
      %78 = vector.shape_cast %77 : vector<1x1x64x128xf32> to vector<64x128xf32>
      %79 = vector.shape_cast %76 : vector<64x128xf32> to vector<1x1x64x128xf32>
      tpu.vector_store %arg12[%c1_48, %c0_49, %c0_50, %c0_51], %79 {strides = array<i32>} : memref<2x8x64x128xf32, #tpu.memory_space<vmem>>, vector<1x1x64x128xf32>,
      %80 = vector.extract_strided_slice %25 {offsets = [1, 1, 0, 0], sizes = [1, 1, 32, 128], strides = [1, 1, 1, 1]} : vector<2x8x32x128xf32> to vector<1x1x32x128xf32>
      %81 = vector.shape_cast %80 : vector<1x1x32x128xf32> to vector<32x128xf32>
      %cst_52 = arith.constant dense<0.000000e+00> : vector<64x128xf32>
      %82 = tpu.matmul %22, %81, %cst_52 {dimension_numbers = #tpu.dot_dimension_numbers<[1], [0], [0], [1], [0, 0, 1, 1], [], []>} : vector<64x32xf32>, vector<32x128xf32>, vector<64x128xf32> -> vector<64x128xf32>
      %c1_53 = arith.constant 1 : index
      %c1_54 = arith.constant 1 : index
      %c0_55 = arith.constant 0 : index
      %c0_56 = arith.constant 0 : index
      %83 = vector.load %arg12[%c1_53, %c1_54, %c0_55, %c0_56] : memref<2x8x64x128xf32, #tpu.memory_space<vmem>>, vector<1x1x64x128xf32>
      %84 = vector.shape_cast %83 : vector<1x1x64x128xf32> to vector<64x128xf32>
      %85 = vector.shape_cast %82 : vector<64x128xf32> to vector<1x1x64x128xf32>
      tpu.vector_store %arg12[%c1_53, %c1_54, %c0_55, %c0_56], %85 {strides = array<i32>} : memref<2x8x64x128xf32, #tpu.memory_space<vmem>>, vector<1x1x64x128xf32>,
      %86 = vector.extract_strided_slice %25 {offsets = [1, 2, 0, 0], sizes = [1, 1, 32, 128], strides = [1, 1, 1, 1]} : vector<2x8x32x128xf32> to vector<1x1x32x128xf32>
      %87 = vector.shape_cast %86 : vector<1x1x32x128xf32> to vector<32x128xf32>
      %cst_57 = arith.constant dense<0.000000e+00> : vector<64x128xf32>
      %88 = tpu.matmul %22, %87, %cst_57 {dimension_numbers = #tpu.dot_dimension_numbers<[1], [0], [0], [1], [0, 0, 1, 1], [], []>} : vector<64x32xf32>, vector<32x128xf32>, vector<64x128xf32> -> vector<64x128xf32>
      %c1_58 = arith.constant 1 : index
      %c2_59 = arith.constant 2 : index
      %c0_60 = arith.constant 0 : index
      %c0_61 = arith.constant 0 : index
      %89 = vector.load %arg12[%c1_58, %c2_59, %c0_60, %c0_61] : memref<2x8x64x128xf32, #tpu.memory_space<vmem>>, vector<1x1x64x128xf32>
      %90 = vector.shape_cast %89 : vector<1x1x64x128xf32> to vector<64x128xf32>
      %91 = vector.shape_cast %88 : vector<64x128xf32> to vector<1x1x64x128xf32>
      tpu.vector_store %arg12[%c1_58, %c2_59, %c0_60, %c0_61], %91 {strides = array<i32>} : memref<2x8x64x128xf32, #tpu.memory_space<vmem>>, vector<1x1x64x128xf32>,
      %92 = vector.extract_strided_slice %25 {offsets = [1, 3, 0, 0], sizes = [1, 1, 32, 128], strides = [1, 1, 1, 1]} : vector<2x8x32x128xf32> to vector<1x1x32x128xf32>
      %93 = vector.shape_cast %92 : vector<1x1x32x128xf32> to vector<32x128xf32>
      %cst_62 = arith.constant dense<0.000000e+00> : vector<64x128xf32>
      %94 = tpu.matmul %22, %93, %cst_62 {dimension_numbers = #tpu.dot_dimension_numbers<[1], [0], [0], [1], [0, 0, 1, 1], [], []>} : vector<64x32xf32>, vector<32x128xf32>, vector<64x128xf32> -> vector<64x128xf32>
      %c1_63 = arith.constant 1 : index
      %c3_64 = arith.constant 3 : index
      %c0_65 = arith.constant 0 : index
      %c0_66 = arith.constant 0 : index
      %95 = vector.load %arg12[%c1_63, %c3_64, %c0_65, %c0_66] : memref<2x8x64x128xf32, #tpu.memory_space<vmem>>, vector<1x1x64x128xf32>
      %96 = vector.shape_cast %95 : vector<1x1x64x128xf32> to vector<64x128xf32>
      %97 = vector.shape_cast %94 : vector<64x128xf32> to vector<1x1x64x128xf32>
      tpu.vector_store %arg12[%c1_63, %c3_64, %c0_65, %c0_66], %97 {strides = array<i32>} : memref<2x8x64x128xf32, #tpu.memory_space<vmem>>, vector<1x1x64x128xf32>,
      %98 = vector.extract_strided_slice %25 {offsets = [1, 4, 0, 0], sizes = [1, 1, 32, 128], strides = [1, 1, 1, 1]} : vector<2x8x32x128xf32> to vector<1x1x32x128xf32>
      %99 = vector.shape_cast %98 : vector<1x1x32x128xf32> to vector<32x128xf32>
      %cst_67 = arith.constant dense<0.000000e+00> : vector<64x128xf32>
      %100 = tpu.matmul %22, %99, %cst_67 {dimension_numbers = #tpu.dot_dimension_numbers<[1], [0], [0], [1], [0, 0, 1, 1], [], []>} : vector<64x32xf32>, vector<32x128xf32>, vector<64x128xf32> -> vector<64x128xf32>
      %c1_68 = arith.constant 1 : index
      %c4_69 = arith.constant 4 : index
      %c0_70 = arith.constant 0 : index
      %c0_71 = arith.constant 0 : index
      %101 = vector.load %arg12[%c1_68, %c4_69, %c0_70, %c0_71] : memref<2x8x64x128xf32, #tpu.memory_space<vmem>>, vector<1x1x64x128xf32>
      %102 = vector.shape_cast %101 : vector<1x1x64x128xf32> to vector<64x128xf32>
      %103 = vector.shape_cast %100 : vector<64x128xf32> to vector<1x1x64x128xf32>
      tpu.vector_store %arg12[%c1_68, %c4_69, %c0_70, %c0_71], %103 {strides = array<i32>} : memref<2x8x64x128xf32, #tpu.memory_space<vmem>>, vector<1x1x64x128xf32>,
      %104 = vector.extract_strided_slice %25 {offsets = [1, 5, 0, 0], sizes = [1, 1, 32, 128], strides = [1, 1, 1, 1]} : vector<2x8x32x128xf32> to vector<1x1x32x128xf32>
      %105 = vector.shape_cast %104 : vector<1x1x32x128xf32> to vector<32x128xf32>
      %cst_72 = arith.constant dense<0.000000e+00> : vector<64x128xf32>
      %106 = tpu.matmul %22, %105, %cst_72 {dimension_numbers = #tpu.dot_dimension_numbers<[1], [0], [0], [1], [0, 0, 1, 1], [], []>} : vector<64x32xf32>, vector<32x128xf32>, vector<64x128xf32> -> vector<64x128xf32>
      %c1_73 = arith.constant 1 : index
      %c5_74 = arith.constant 5 : index
      %c0_75 = arith.constant 0 : index
      %c0_76 = arith.constant 0 : index
      %107 = vector.load %arg12[%c1_73, %c5_74, %c0_75, %c0_76] : memref<2x8x64x128xf32, #tpu.memory_space<vmem>>, vector<1x1x64x128xf32>
      %108 = vector.shape_cast %107 : vector<1x1x64x128xf32> to vector<64x128xf32>
      %109 = vector.shape_cast %106 : vector<64x128xf32> to vector<1x1x64x128xf32>
      tpu.vector_store %arg12[%c1_73, %c5_74, %c0_75, %c0_76], %109 {strides = array<i32>} : memref<2x8x64x128xf32, #tpu.memory_space<vmem>>, vector<1x1x64x128xf32>,
      %110 = vector.extract_strided_slice %25 {offsets = [1, 6, 0, 0], sizes = [1, 1, 32, 128], strides = [1, 1, 1, 1]} : vector<2x8x32x128xf32> to vector<1x1x32x128xf32>
      %111 = vector.shape_cast %110 : vector<1x1x32x128xf32> to vector<32x128xf32>
      %cst_77 = arith.constant dense<0.000000e+00> : vector<64x128xf32>
      %112 = tpu.matmul %22, %111, %cst_77 {dimension_numbers = #tpu.dot_dimension_numbers<[1], [0], [0], [1], [0, 0, 1, 1], [], []>} : vector<64x32xf32>, vector<32x128xf32>, vector<64x128xf32> -> vector<64x128xf32>
      %c1_78 = arith.constant 1 : index
      %c6_79 = arith.constant 6 : index
      %c0_80 = arith.constant 0 : index
      %c0_81 = arith.constant 0 : index
      %113 = vector.load %arg12[%c1_78, %c6_79, %c0_80, %c0_81] : memref<2x8x64x128xf32, #tpu.memory_space<vmem>>, vector<1x1x64x128xf32>
      %114 = vector.shape_cast %113 : vector<1x1x64x128xf32> to vector<64x128xf32>
      %115 = vector.shape_cast %112 : vector<64x128xf32> to vector<1x1x64x128xf32>
      tpu.vector_store %arg12[%c1_78, %c6_79, %c0_80, %c0_81], %115 {strides = array<i32>} : memref<2x8x64x128xf32, #tpu.memory_space<vmem>>, vector<1x1x64x128xf32>,
      %116 = vector.extract_strided_slice %25 {offsets = [1, 7, 0, 0], sizes = [1, 1, 32, 128], strides = [1, 1, 1, 1]} : vector<2x8x32x128xf32> to vector<1x1x32x128xf32>
      %117 = vector.shape_cast %116 : vector<1x1x32x128xf32> to vector<32x128xf32>
      %cst_82 = arith.constant dense<0.000000e+00> : vector<64x128xf32>
      %118 = tpu.matmul %22, %117, %cst_82 {dimension_numbers = #tpu.dot_dimension_numbers<[1], [0], [0], [1], [0, 0, 1, 1], [], []>} : vector<64x32xf32>, vector<32x128xf32>, vector<64x128xf32> -> vector<64x128xf32>
      %c1_83 = arith.constant 1 : index
      %c7_84 = arith.constant 7 : index
      %c0_85 = arith.constant 0 : index
      %c0_86 = arith.constant 0 : index
      %119 = vector.load %arg12[%c1_83, %c7_84, %c0_85, %c0_86] : memref<2x8x64x128xf32, #tpu.memory_space<vmem>>, vector<1x1x64x128xf32>
      %120 = vector.shape_cast %119 : vector<1x1x64x128xf32> to vector<64x128xf32>
      %121 = vector.shape_cast %118 : vector<64x128xf32> to vector<1x1x64x128xf32>
      tpu.vector_store %arg12[%c1_83, %c7_84, %c0_85, %c0_86], %121 {strides = array<i32>} : memref<2x8x64x128xf32, #tpu.memory_space<vmem>>, vector<1x1x64x128xf32>,
    } else {
    }
    %c3_i32_3 = arith.constant 3 : i32
    %10 = arith.cmpi sge, %arg1, %c3_i32_3 : i32
    %c7_i32 = arith.constant 7 : i32
    %11 = arith.cmpi slt, %arg1, %c7_i32 : i32
    %12 = arith.andi %10, %11 : i1
    %13 = arith.extui %12 : i1 to i32
    %c0_i32_4 = arith.constant 0 : i32
    %14 = arith.cmpi ne, %13, %c0_i32_4 : i32
    scf.if %14 {
      %c0 = arith.constant 0 : index
      %c0_7 = arith.constant 0 : index
      %c0_8 = arith.constant 0 : index
      %c0_9 = arith.constant 0 : index
      %20 = vector.load %arg4[%c0, %c0_7, %c0_8, %c0_9] : memref<2x8x16x32xf32, #tpu.memory_space<vmem>>, vector<2x8x16x32xf32>
      %c0_10 = arith.constant 0 : index
      %c0_11 = arith.constant 0 : index
      %21 = vector.load %arg10[%c0_10, %c0_11] : memref<32x128xf32, #tpu.memory_space<vmem>>, vector<32x128xf32>
      %c0_12 = arith.constant 0 : index
      %c0_13 = arith.constant 0 : index
      %22 = vector.load %arg7[%c0_12, %c0_13] : memref<64x16xf32, #tpu.memory_space<vmem>>, vector<64x16xf32>
      %23 = vector.shape_cast %20 : vector<2x8x16x32xf32> to vector<256x32xf32>
      %cst = arith.constant dense<0.000000e+00> : vector<256x128xf32>
      %24 = tpu.matmul %23, %21, %cst {dimension_numbers = #tpu.dot_dimension_numbers<[1], [0], [0], [1], [0, 0, 1, 1], [], []>} : vector<256x32xf32>, vector<32x128xf32>, vector<256x128xf32> -> vector<256x128xf32>
      %25 = vector.shape_cast %24 : vector<256x128xf32> to vector<2x8x16x128xf32>
      %26 = vector.extract_strided_slice %25 {offsets = [0, 0, 0, 0], sizes = [1, 1, 16, 128], strides = [1, 1, 1, 1]} : vector<2x8x16x128xf32> to vector<1x1x16x128xf32>
      %27 = vector.shape_cast %26 : vector<1x1x16x128xf32> to vector<16x128xf32>
      %cst_14 = arith.constant dense<0.000000e+00> : vector<64x128xf32>
      %28 = tpu.matmul %22, %27, %cst_14 {dimension_numbers = #tpu.dot_dimension_numbers<[1], [0], [0], [1], [0, 0, 1, 1], [], []>} : vector<64x16xf32>, vector<16x128xf32>, vector<64x128xf32> -> vector<64x128xf32>
      %c0_15 = arith.constant 0 : index
      %c0_16 = arith.constant 0 : index
      %c0_17 = arith.constant 0 : index
      %c0_18 = arith.constant 0 : index
      %29 = vector.load %arg12[%c0_15, %c0_16, %c0_17, %c0_18] : memref<2x8x64x128xf32, #tpu.memory_space<vmem>>, vector<1x1x64x128xf32>
      %30 = vector.shape_cast %29 : vector<1x1x64x128xf32> to vector<64x128xf32>
      %31 = vector.shape_cast %28 : vector<64x128xf32> to vector<1x1x64x128xf32>
      tpu.vector_store %arg12[%c0_15, %c0_16, %c0_17, %c0_18], %31 {strides = array<i32>} : memref<2x8x64x128xf32, #tpu.memory_space<vmem>>, vector<1x1x64x128xf32>,
      %32 = vector.extract_strided_slice %25 {offsets = [0, 1, 0, 0], sizes = [1, 1, 16, 128], strides = [1, 1, 1, 1]} : vector<2x8x16x128xf32> to vector<1x1x16x128xf32>
      %33 = vector.shape_cast %32 : vector<1x1x16x128xf32> to vector<16x128xf32>
      %cst_19 = arith.constant dense<0.000000e+00> : vector<64x128xf32>
      %34 = tpu.matmul %22, %33, %cst_19 {dimension_numbers = #tpu.dot_dimension_numbers<[1], [0], [0], [1], [0, 0, 1, 1], [], []>} : vector<64x16xf32>, vector<16x128xf32>, vector<64x128xf32> -> vector<64x128xf32>
      %c0_20 = arith.constant 0 : index
      %c1 = arith.constant 1 : index
      %c0_21 = arith.constant 0 : index
      %c0_22 = arith.constant 0 : index
      %35 = vector.load %arg12[%c0_20, %c1, %c0_21, %c0_22] : memref<2x8x64x128xf32, #tpu.memory_space<vmem>>, vector<1x1x64x128xf32>
      %36 = vector.shape_cast %35 : vector<1x1x64x128xf32> to vector<64x128xf32>
      %37 = vector.shape_cast %34 : vector<64x128xf32> to vector<1x1x64x128xf32>
      tpu.vector_store %arg12[%c0_20, %c1, %c0_21, %c0_22], %37 {strides = array<i32>} : memref<2x8x64x128xf32, #tpu.memory_space<vmem>>, vector<1x1x64x128xf32>,
      %38 = vector.extract_strided_slice %25 {offsets = [0, 2, 0, 0], sizes = [1, 1, 16, 128], strides = [1, 1, 1, 1]} : vector<2x8x16x128xf32> to vector<1x1x16x128xf32>
      %39 = vector.shape_cast %38 : vector<1x1x16x128xf32> to vector<16x128xf32>
      %cst_23 = arith.constant dense<0.000000e+00> : vector<64x128xf32>
      %40 = tpu.matmul %22, %39, %cst_23 {dimension_numbers = #tpu.dot_dimension_numbers<[1], [0], [0], [1], [0, 0, 1, 1], [], []>} : vector<64x16xf32>, vector<16x128xf32>, vector<64x128xf32> -> vector<64x128xf32>
      %c0_24 = arith.constant 0 : index
      %c2 = arith.constant 2 : index
      %c0_25 = arith.constant 0 : index
      %c0_26 = arith.constant 0 : index
      %41 = vector.load %arg12[%c0_24, %c2, %c0_25, %c0_26] : memref<2x8x64x128xf32, #tpu.memory_space<vmem>>, vector<1x1x64x128xf32>
      %42 = vector.shape_cast %41 : vector<1x1x64x128xf32> to vector<64x128xf32>
      %43 = vector.shape_cast %40 : vector<64x128xf32> to vector<1x1x64x128xf32>
      tpu.vector_store %arg12[%c0_24, %c2, %c0_25, %c0_26], %43 {strides = array<i32>} : memref<2x8x64x128xf32, #tpu.memory_space<vmem>>, vector<1x1x64x128xf32>,
      %44 = vector.extract_strided_slice %25 {offsets = [0, 3, 0, 0], sizes = [1, 1, 16, 128], strides = [1, 1, 1, 1]} : vector<2x8x16x128xf32> to vector<1x1x16x128xf32>
      %45 = vector.shape_cast %44 : vector<1x1x16x128xf32> to vector<16x128xf32>
      %cst_27 = arith.constant dense<0.000000e+00> : vector<64x128xf32>
      %46 = tpu.matmul %22, %45, %cst_27 {dimension_numbers = #tpu.dot_dimension_numbers<[1], [0], [0], [1], [0, 0, 1, 1], [], []>} : vector<64x16xf32>, vector<16x128xf32>, vector<64x128xf32> -> vector<64x128xf32>
      %c0_28 = arith.constant 0 : index
      %c3 = arith.constant 3 : index
      %c0_29 = arith.constant 0 : index
      %c0_30 = arith.constant 0 : index
      %47 = vector.load %arg12[%c0_28, %c3, %c0_29, %c0_30] : memref<2x8x64x128xf32, #tpu.memory_space<vmem>>, vector<1x1x64x128xf32>
      %48 = vector.shape_cast %47 : vector<1x1x64x128xf32> to vector<64x128xf32>
      %49 = vector.shape_cast %46 : vector<64x128xf32> to vector<1x1x64x128xf32>
      tpu.vector_store %arg12[%c0_28, %c3, %c0_29, %c0_30], %49 {strides = array<i32>} : memref<2x8x64x128xf32, #tpu.memory_space<vmem>>, vector<1x1x64x128xf32>,
      %50 = vector.extract_strided_slice %25 {offsets = [0, 4, 0, 0], sizes = [1, 1, 16, 128], strides = [1, 1, 1, 1]} : vector<2x8x16x128xf32> to vector<1x1x16x128xf32>
      %51 = vector.shape_cast %50 : vector<1x1x16x128xf32> to vector<16x128xf32>
      %cst_31 = arith.constant dense<0.000000e+00> : vector<64x128xf32>
      %52 = tpu.matmul %22, %51, %cst_31 {dimension_numbers = #tpu.dot_dimension_numbers<[1], [0], [0], [1], [0, 0, 1, 1], [], []>} : vector<64x16xf32>, vector<16x128xf32>, vector<64x128xf32> -> vector<64x128xf32>
      %c0_32 = arith.constant 0 : index
      %c4 = arith.constant 4 : index
      %c0_33 = arith.constant 0 : index
      %c0_34 = arith.constant 0 : index
      %53 = vector.load %arg12[%c0_32, %c4, %c0_33, %c0_34] : memref<2x8x64x128xf32, #tpu.memory_space<vmem>>, vector<1x1x64x128xf32>
      %54 = vector.shape_cast %53 : vector<1x1x64x128xf32> to vector<64x128xf32>
      %55 = vector.shape_cast %52 : vector<64x128xf32> to vector<1x1x64x128xf32>
      tpu.vector_store %arg12[%c0_32, %c4, %c0_33, %c0_34], %55 {strides = array<i32>} : memref<2x8x64x128xf32, #tpu.memory_space<vmem>>, vector<1x1x64x128xf32>,
      %56 = vector.extract_strided_slice %25 {offsets = [0, 5, 0, 0], sizes = [1, 1, 16, 128], strides = [1, 1, 1, 1]} : vector<2x8x16x128xf32> to vector<1x1x16x128xf32>
      %57 = vector.shape_cast %56 : vector<1x1x16x128xf32> to vector<16x128xf32>
      %cst_35 = arith.constant dense<0.000000e+00> : vector<64x128xf32>
      %58 = tpu.matmul %22, %57, %cst_35 {dimension_numbers = #tpu.dot_dimension_numbers<[1], [0], [0], [1], [0, 0, 1, 1], [], []>} : vector<64x16xf32>, vector<16x128xf32>, vector<64x128xf32> -> vector<64x128xf32>
      %c0_36 = arith.constant 0 : index
      %c5 = arith.constant 5 : index
      %c0_37 = arith.constant 0 : index
      %c0_38 = arith.constant 0 : index
      %59 = vector.load %arg12[%c0_36, %c5, %c0_37, %c0_38] : memref<2x8x64x128xf32, #tpu.memory_space<vmem>>, vector<1x1x64x128xf32>
      %60 = vector.shape_cast %59 : vector<1x1x64x128xf32> to vector<64x128xf32>
      %61 = vector.shape_cast %58 : vector<64x128xf32> to vector<1x1x64x128xf32>
      tpu.vector_store %arg12[%c0_36, %c5, %c0_37, %c0_38], %61 {strides = array<i32>} : memref<2x8x64x128xf32, #tpu.memory_space<vmem>>, vector<1x1x64x128xf32>,
      %62 = vector.extract_strided_slice %25 {offsets = [0, 6, 0, 0], sizes = [1, 1, 16, 128], strides = [1, 1, 1, 1]} : vector<2x8x16x128xf32> to vector<1x1x16x128xf32>
      %63 = vector.shape_cast %62 : vector<1x1x16x128xf32> to vector<16x128xf32>
      %cst_39 = arith.constant dense<0.000000e+00> : vector<64x128xf32>
      %64 = tpu.matmul %22, %63, %cst_39 {dimension_numbers = #tpu.dot_dimension_numbers<[1], [0], [0], [1], [0, 0, 1, 1], [], []>} : vector<64x16xf32>, vector<16x128xf32>, vector<64x128xf32> -> vector<64x128xf32>
      %c0_40 = arith.constant 0 : index
      %c6 = arith.constant 6 : index
      %c0_41 = arith.constant 0 : index
      %c0_42 = arith.constant 0 : index
      %65 = vector.load %arg12[%c0_40, %c6, %c0_41, %c0_42] : memref<2x8x64x128xf32, #tpu.memory_space<vmem>>, vector<1x1x64x128xf32>
      %66 = vector.shape_cast %65 : vector<1x1x64x128xf32> to vector<64x128xf32>
      %67 = vector.shape_cast %64 : vector<64x128xf32> to vector<1x1x64x128xf32>
      tpu.vector_store %arg12[%c0_40, %c6, %c0_41, %c0_42], %67 {strides = array<i32>} : memref<2x8x64x128xf32, #tpu.memory_space<vmem>>, vector<1x1x64x128xf32>,
      %68 = vector.extract_strided_slice %25 {offsets = [0, 7, 0, 0], sizes = [1, 1, 16, 128], strides = [1, 1, 1, 1]} : vector<2x8x16x128xf32> to vector<1x1x16x128xf32>
      %69 = vector.shape_cast %68 : vector<1x1x16x128xf32> to vector<16x128xf32>
      %cst_43 = arith.constant dense<0.000000e+00> : vector<64x128xf32>
      %70 = tpu.matmul %22, %69, %cst_43 {dimension_numbers = #tpu.dot_dimension_numbers<[1], [0], [0], [1], [0, 0, 1, 1], [], []>} : vector<64x16xf32>, vector<16x128xf32>, vector<64x128xf32> -> vector<64x128xf32>
      %c0_44 = arith.constant 0 : index
      %c7 = arith.constant 7 : index
      %c0_45 = arith.constant 0 : index
      %c0_46 = arith.constant 0 : index
      %71 = vector.load %arg12[%c0_44, %c7, %c0_45, %c0_46] : memref<2x8x64x128xf32, #tpu.memory_space<vmem>>, vector<1x1x64x128xf32>
      %72 = vector.shape_cast %71 : vector<1x1x64x128xf32> to vector<64x128xf32>
      %73 = vector.shape_cast %70 : vector<64x128xf32> to vector<1x1x64x128xf32>
      tpu.vector_store %arg12[%c0_44, %c7, %c0_45, %c0_46], %73 {strides = array<i32>} : memref<2x8x64x128xf32, #tpu.memory_space<vmem>>, vector<1x1x64x128xf32>,
      %74 = vector.extract_strided_slice %25 {offsets = [1, 0, 0, 0], sizes = [1, 1, 16, 128], strides = [1, 1, 1, 1]} : vector<2x8x16x128xf32> to vector<1x1x16x128xf32>
      %75 = vector.shape_cast %74 : vector<1x1x16x128xf32> to vector<16x128xf32>
      %cst_47 = arith.constant dense<0.000000e+00> : vector<64x128xf32>
      %76 = tpu.matmul %22, %75, %cst_47 {dimension_numbers = #tpu.dot_dimension_numbers<[1], [0], [0], [1], [0, 0, 1, 1], [], []>} : vector<64x16xf32>, vector<16x128xf32>, vector<64x128xf32> -> vector<64x128xf32>
      %c1_48 = arith.constant 1 : index
      %c0_49 = arith.constant 0 : index
      %c0_50 = arith.constant 0 : index
      %c0_51 = arith.constant 0 : index
      %77 = vector.load %arg12[%c1_48, %c0_49, %c0_50, %c0_51] : memref<2x8x64x128xf32, #tpu.memory_space<vmem>>, vector<1x1x64x128xf32>
      %78 = vector.shape_cast %77 : vector<1x1x64x128xf32> to vector<64x128xf32>
      %79 = vector.shape_cast %76 : vector<64x128xf32> to vector<1x1x64x128xf32>
      tpu.vector_store %arg12[%c1_48, %c0_49, %c0_50, %c0_51], %79 {strides = array<i32>} : memref<2x8x64x128xf32, #tpu.memory_space<vmem>>, vector<1x1x64x128xf32>,
      %80 = vector.extract_strided_slice %25 {offsets = [1, 1, 0, 0], sizes = [1, 1, 16, 128], strides = [1, 1, 1, 1]} : vector<2x8x16x128xf32> to vector<1x1x16x128xf32>
      %81 = vector.shape_cast %80 : vector<1x1x16x128xf32> to vector<16x128xf32>
      %cst_52 = arith.constant dense<0.000000e+00> : vector<64x128xf32>
      %82 = tpu.matmul %22, %81, %cst_52 {dimension_numbers = #tpu.dot_dimension_numbers<[1], [0], [0], [1], [0, 0, 1, 1], [], []>} : vector<64x16xf32>, vector<16x128xf32>, vector<64x128xf32> -> vector<64x128xf32>
      %c1_53 = arith.constant 1 : index
      %c1_54 = arith.constant 1 : index
      %c0_55 = arith.constant 0 : index
      %c0_56 = arith.constant 0 : index
      %83 = vector.load %arg12[%c1_53, %c1_54, %c0_55, %c0_56] : memref<2x8x64x128xf32, #tpu.memory_space<vmem>>, vector<1x1x64x128xf32>
      %84 = vector.shape_cast %83 : vector<1x1x64x128xf32> to vector<64x128xf32>
      %85 = vector.shape_cast %82 : vector<64x128xf32> to vector<1x1x64x128xf32>
      tpu.vector_store %arg12[%c1_53, %c1_54, %c0_55, %c0_56], %85 {strides = array<i32>} : memref<2x8x64x128xf32, #tpu.memory_space<vmem>>, vector<1x1x64x128xf32>,
      %86 = vector.extract_strided_slice %25 {offsets = [1, 2, 0, 0], sizes = [1, 1, 16, 128], strides = [1, 1, 1, 1]} : vector<2x8x16x128xf32> to vector<1x1x16x128xf32>
      %87 = vector.shape_cast %86 : vector<1x1x16x128xf32> to vector<16x128xf32>
      %cst_57 = arith.constant dense<0.000000e+00> : vector<64x128xf32>
      %88 = tpu.matmul %22, %87, %cst_57 {dimension_numbers = #tpu.dot_dimension_numbers<[1], [0], [0], [1], [0, 0, 1, 1], [], []>} : vector<64x16xf32>, vector<16x128xf32>, vector<64x128xf32> -> vector<64x128xf32>
      %c1_58 = arith.constant 1 : index
      %c2_59 = arith.constant 2 : index
      %c0_60 = arith.constant 0 : index
      %c0_61 = arith.constant 0 : index
      %89 = vector.load %arg12[%c1_58, %c2_59, %c0_60, %c0_61] : memref<2x8x64x128xf32, #tpu.memory_space<vmem>>, vector<1x1x64x128xf32>
      %90 = vector.shape_cast %89 : vector<1x1x64x128xf32> to vector<64x128xf32>
      %91 = vector.shape_cast %88 : vector<64x128xf32> to vector<1x1x64x128xf32>
      tpu.vector_store %arg12[%c1_58, %c2_59, %c0_60, %c0_61], %91 {strides = array<i32>} : memref<2x8x64x128xf32, #tpu.memory_space<vmem>>, vector<1x1x64x128xf32>,
      %92 = vector.extract_strided_slice %25 {offsets = [1, 3, 0, 0], sizes = [1, 1, 16, 128], strides = [1, 1, 1, 1]} : vector<2x8x16x128xf32> to vector<1x1x16x128xf32>
      %93 = vector.shape_cast %92 : vector<1x1x16x128xf32> to vector<16x128xf32>
      %cst_62 = arith.constant dense<0.000000e+00> : vector<64x128xf32>
      %94 = tpu.matmul %22, %93, %cst_62 {dimension_numbers = #tpu.dot_dimension_numbers<[1], [0], [0], [1], [0, 0, 1, 1], [], []>} : vector<64x16xf32>, vector<16x128xf32>, vector<64x128xf32> -> vector<64x128xf32>
      %c1_63 = arith.constant 1 : index
      %c3_64 = arith.constant 3 : index
      %c0_65 = arith.constant 0 : index
      %c0_66 = arith.constant 0 : index
      %95 = vector.load %arg12[%c1_63, %c3_64, %c0_65, %c0_66] : memref<2x8x64x128xf32, #tpu.memory_space<vmem>>, vector<1x1x64x128xf32>
      %96 = vector.shape_cast %95 : vector<1x1x64x128xf32> to vector<64x128xf32>
      %97 = vector.shape_cast %94 : vector<64x128xf32> to vector<1x1x64x128xf32>
      tpu.vector_store %arg12[%c1_63, %c3_64, %c0_65, %c0_66], %97 {strides = array<i32>} : memref<2x8x64x128xf32, #tpu.memory_space<vmem>>, vector<1x1x64x128xf32>,
      %98 = vector.extract_strided_slice %25 {offsets = [1, 4, 0, 0], sizes = [1, 1, 16, 128], strides = [1, 1, 1, 1]} : vector<2x8x16x128xf32> to vector<1x1x16x128xf32>
      %99 = vector.shape_cast %98 : vector<1x1x16x128xf32> to vector<16x128xf32>
      %cst_67 = arith.constant dense<0.000000e+00> : vector<64x128xf32>
      %100 = tpu.matmul %22, %99, %cst_67 {dimension_numbers = #tpu.dot_dimension_numbers<[1], [0], [0], [1], [0, 0, 1, 1], [], []>} : vector<64x16xf32>, vector<16x128xf32>, vector<64x128xf32> -> vector<64x128xf32>
      %c1_68 = arith.constant 1 : index
      %c4_69 = arith.constant 4 : index
      %c0_70 = arith.constant 0 : index
      %c0_71 = arith.constant 0 : index
      %101 = vector.load %arg12[%c1_68, %c4_69, %c0_70, %c0_71] : memref<2x8x64x128xf32, #tpu.memory_space<vmem>>, vector<1x1x64x128xf32>
      %102 = vector.shape_cast %101 : vector<1x1x64x128xf32> to vector<64x128xf32>
      %103 = vector.shape_cast %100 : vector<64x128xf32> to vector<1x1x64x128xf32>
      tpu.vector_store %arg12[%c1_68, %c4_69, %c0_70, %c0_71], %103 {strides = array<i32>} : memref<2x8x64x128xf32, #tpu.memory_space<vmem>>, vector<1x1x64x128xf32>,
      %104 = vector.extract_strided_slice %25 {offsets = [1, 5, 0, 0], sizes = [1, 1, 16, 128], strides = [1, 1, 1, 1]} : vector<2x8x16x128xf32> to vector<1x1x16x128xf32>
      %105 = vector.shape_cast %104 : vector<1x1x16x128xf32> to vector<16x128xf32>
      %cst_72 = arith.constant dense<0.000000e+00> : vector<64x128xf32>
      %106 = tpu.matmul %22, %105, %cst_72 {dimension_numbers = #tpu.dot_dimension_numbers<[1], [0], [0], [1], [0, 0, 1, 1], [], []>} : vector<64x16xf32>, vector<16x128xf32>, vector<64x128xf32> -> vector<64x128xf32>
      %c1_73 = arith.constant 1 : index
      %c5_74 = arith.constant 5 : index
      %c0_75 = arith.constant 0 : index
      %c0_76 = arith.constant 0 : index
      %107 = vector.load %arg12[%c1_73, %c5_74, %c0_75, %c0_76] : memref<2x8x64x128xf32, #tpu.memory_space<vmem>>, vector<1x1x64x128xf32>
      %108 = vector.shape_cast %107 : vector<1x1x64x128xf32> to vector<64x128xf32>
      %109 = vector.shape_cast %106 : vector<64x128xf32> to vector<1x1x64x128xf32>
      tpu.vector_store %arg12[%c1_73, %c5_74, %c0_75, %c0_76], %109 {strides = array<i32>} : memref<2x8x64x128xf32, #tpu.memory_space<vmem>>, vector<1x1x64x128xf32>,
      %110 = vector.extract_strided_slice %25 {offsets = [1, 6, 0, 0], sizes = [1, 1, 16, 128], strides = [1, 1, 1, 1]} : vector<2x8x16x128xf32> to vector<1x1x16x128xf32>
      %111 = vector.shape_cast %110 : vector<1x1x16x128xf32> to vector<16x128xf32>
      %cst_77 = arith.constant dense<0.000000e+00> : vector<64x128xf32>
      %112 = tpu.matmul %22, %111, %cst_77 {dimension_numbers = #tpu.dot_dimension_numbers<[1], [0], [0], [1], [0, 0, 1, 1], [], []>} : vector<64x16xf32>, vector<16x128xf32>, vector<64x128xf32> -> vector<64x128xf32>
      %c1_78 = arith.constant 1 : index
      %c6_79 = arith.constant 6 : index
      %c0_80 = arith.constant 0 : index
      %c0_81 = arith.constant 0 : index
      %113 = vector.load %arg12[%c1_78, %c6_79, %c0_80, %c0_81] : memref<2x8x64x128xf32, #tpu.memory_space<vmem>>, vector<1x1x64x128xf32>
      %114 = vector.shape_cast %113 : vector<1x1x64x128xf32> to vector<64x128xf32>
      %115 = vector.shape_cast %112 : vector<64x128xf32> to vector<1x1x64x128xf32>
      tpu.vector_store %arg12[%c1_78, %c6_79, %c0_80, %c0_81], %115 {strides = array<i32>} : memref<2x8x64x128xf32, #tpu.memory_space<vmem>>, vector<1x1x64x128xf32>,
      %116 = vector.extract_strided_slice %25 {offsets = [1, 7, 0, 0], sizes = [1, 1, 16, 128], strides = [1, 1, 1, 1]} : vector<2x8x16x128xf32> to vector<1x1x16x128xf32>
      %117 = vector.shape_cast %116 : vector<1x1x16x128xf32> to vector<16x128xf32>
      %cst_82 = arith.constant dense<0.000000e+00> : vector<64x128xf32>
      %118 = tpu.matmul %22, %117, %cst_82 {dimension_numbers = #tpu.dot_dimension_numbers<[1], [0], [0], [1], [0, 0, 1, 1], [], []>} : vector<64x16xf32>, vector<16x128xf32>, vector<64x128xf32> -> vector<64x128xf32>
      %c1_83 = arith.constant 1 : index
      %c7_84 = arith.constant 7 : index
      %c0_85 = arith.constant 0 : index
      %c0_86 = arith.constant 0 : index
      %119 = vector.load %arg12[%c1_83, %c7_84, %c0_85, %c0_86] : memref<2x8x64x128xf32, #tpu.memory_space<vmem>>, vector<1x1x64x128xf32>
      %120 = vector.shape_cast %119 : vector<1x1x64x128xf32> to vector<64x128xf32>
      %121 = vector.shape_cast %118 : vector<64x128xf32> to vector<1x1x64x128xf32>
      tpu.vector_store %arg12[%c1_83, %c7_84, %c0_85, %c0_86], %121 {strides = array<i32>} : memref<2x8x64x128xf32, #tpu.memory_space<vmem>>, vector<1x1x64x128xf32>,
    } else {
    }
    %c7_i32_5 = arith.constant 7 : i32
    %15 = arith.cmpi sge, %arg1, %c7_i32_5 : i32
    %c15_i32 = arith.constant 15 : i32
    %16 = arith.cmpi slt, %arg1, %c15_i32 : i32
    %17 = arith.andi %15, %16 : i1
    %18 = arith.extui %17 : i1 to i32
    %c0_i32_6 = arith.constant 0 : i32
    %19 = arith.cmpi ne, %18, %c0_i32_6 : i32
    scf.if %19 {
      %c0 = arith.constant 0 : index
      %c0_7 = arith.constant 0 : index
      %c0_8 = arith.constant 0 : index
      %c0_9 = arith.constant 0 : index
      %20 = vector.load %arg5[%c0, %c0_7, %c0_8, %c0_9] : memref<2x8x8x16xf32, #tpu.memory_space<vmem>>, vector<2x8x8x16xf32>
      %c0_10 = arith.constant 0 : index
      %c0_11 = arith.constant 0 : index
      %21 = vector.load %arg11[%c0_10, %c0_11] : memref<16x128xf32, #tpu.memory_space<vmem>>, vector<16x128xf32>
      %c0_12 = arith.constant 0 : index
      %c0_13 = arith.constant 0 : index
      %22 = vector.load %arg8[%c0_12, %c0_13] : memref<64x8xf32, #tpu.memory_space<vmem>>, vector<64x8xf32>
      %23 = vector.shape_cast %20 : vector<2x8x8x16xf32> to vector<128x16xf32>
      %cst = arith.constant dense<0.000000e+00> : vector<128x128xf32>
      %24 = tpu.matmul %23, %21, %cst {dimension_numbers = #tpu.dot_dimension_numbers<[1], [0], [0], [1], [0, 0, 1, 1], [], []>} : vector<128x16xf32>, vector<16x128xf32>, vector<128x128xf32> -> vector<128x128xf32>
      %25 = vector.shape_cast %24 : vector<128x128xf32> to vector<2x8x8x128xf32>
      %26 = vector.extract_strided_slice %25 {offsets = [0, 0, 0, 0], sizes = [1, 1, 8, 128], strides = [1, 1, 1, 1]} : vector<2x8x8x128xf32> to vector<1x1x8x128xf32>
      %27 = vector.shape_cast %26 : vector<1x1x8x128xf32> to vector<8x128xf32>
      %cst_14 = arith.constant dense<0.000000e+00> : vector<64x128xf32>
      %28 = tpu.matmul %22, %27, %cst_14 {dimension_numbers = #tpu.dot_dimension_numbers<[1], [0], [0], [1], [0, 0, 1, 1], [], []>} : vector<64x8xf32>, vector<8x128xf32>, vector<64x128xf32> -> vector<64x128xf32>
      %c0_15 = arith.constant 0 : index
      %c0_16 = arith.constant 0 : index
      %c0_17 = arith.constant 0 : index
      %c0_18 = arith.constant 0 : index
      %29 = vector.load %arg12[%c0_15, %c0_16, %c0_17, %c0_18] : memref<2x8x64x128xf32, #tpu.memory_space<vmem>>, vector<1x1x64x128xf32>
      %30 = vector.shape_cast %29 : vector<1x1x64x128xf32> to vector<64x128xf32>
      %31 = vector.shape_cast %28 : vector<64x128xf32> to vector<1x1x64x128xf32>
      tpu.vector_store %arg12[%c0_15, %c0_16, %c0_17, %c0_18], %31 {strides = array<i32>} : memref<2x8x64x128xf32, #tpu.memory_space<vmem>>, vector<1x1x64x128xf32>,
      %32 = vector.extract_strided_slice %25 {offsets = [0, 1, 0, 0], sizes = [1, 1, 8, 128], strides = [1, 1, 1, 1]} : vector<2x8x8x128xf32> to vector<1x1x8x128xf32>
      %33 = vector.shape_cast %32 : vector<1x1x8x128xf32> to vector<8x128xf32>
      %cst_19 = arith.constant dense<0.000000e+00> : vector<64x128xf32>
      %34 = tpu.matmul %22, %33, %cst_19 {dimension_numbers = #tpu.dot_dimension_numbers<[1], [0], [0], [1], [0, 0, 1, 1], [], []>} : vector<64x8xf32>, vector<8x128xf32>, vector<64x128xf32> -> vector<64x128xf32>
      %c0_20 = arith.constant 0 : index
      %c1 = arith.constant 1 : index
      %c0_21 = arith.constant 0 : index
      %c0_22 = arith.constant 0 : index
      %35 = vector.load %arg12[%c0_20, %c1, %c0_21, %c0_22] : memref<2x8x64x128xf32, #tpu.memory_space<vmem>>, vector<1x1x64x128xf32>
      %36 = vector.shape_cast %35 : vector<1x1x64x128xf32> to vector<64x128xf32>
      %37 = vector.shape_cast %34 : vector<64x128xf32> to vector<1x1x64x128xf32>
      tpu.vector_store %arg12[%c0_20, %c1, %c0_21, %c0_22], %37 {strides = array<i32>} : memref<2x8x64x128xf32, #tpu.memory_space<vmem>>, vector<1x1x64x128xf32>,
      %38 = vector.extract_strided_slice %25 {offsets = [0, 2, 0, 0], sizes = [1, 1, 8, 128], strides = [1, 1, 1, 1]} : vector<2x8x8x128xf32> to vector<1x1x8x128xf32>
      %39 = vector.shape_cast %38 : vector<1x1x8x128xf32> to vector<8x128xf32>
      %cst_23 = arith.constant dense<0.000000e+00> : vector<64x128xf32>
      %40 = tpu.matmul %22, %39, %cst_23 {dimension_numbers = #tpu.dot_dimension_numbers<[1], [0], [0], [1], [0, 0, 1, 1], [], []>} : vector<64x8xf32>, vector<8x128xf32>, vector<64x128xf32> -> vector<64x128xf32>
      %c0_24 = arith.constant 0 : index
      %c2 = arith.constant 2 : index
      %c0_25 = arith.constant 0 : index
      %c0_26 = arith.constant 0 : index
      %41 = vector.load %arg12[%c0_24, %c2, %c0_25, %c0_26] : memref<2x8x64x128xf32, #tpu.memory_space<vmem>>, vector<1x1x64x128xf32>
      %42 = vector.shape_cast %41 : vector<1x1x64x128xf32> to vector<64x128xf32>
      %43 = vector.shape_cast %40 : vector<64x128xf32> to vector<1x1x64x128xf32>
      tpu.vector_store %arg12[%c0_24, %c2, %c0_25, %c0_26], %43 {strides = array<i32>} : memref<2x8x64x128xf32, #tpu.memory_space<vmem>>, vector<1x1x64x128xf32>,
      %44 = vector.extract_strided_slice %25 {offsets = [0, 3, 0, 0], sizes = [1, 1, 8, 128], strides = [1, 1, 1, 1]} : vector<2x8x8x128xf32> to vector<1x1x8x128xf32>
      %45 = vector.shape_cast %44 : vector<1x1x8x128xf32> to vector<8x128xf32>
      %cst_27 = arith.constant dense<0.000000e+00> : vector<64x128xf32>
      %46 = tpu.matmul %22, %45, %cst_27 {dimension_numbers = #tpu.dot_dimension_numbers<[1], [0], [0], [1], [0, 0, 1, 1], [], []>} : vector<64x8xf32>, vector<8x128xf32>, vector<64x128xf32> -> vector<64x128xf32>
      %c0_28 = arith.constant 0 : index
      %c3 = arith.constant 3 : index
      %c0_29 = arith.constant 0 : index
      %c0_30 = arith.constant 0 : index
      %47 = vector.load %arg12[%c0_28, %c3, %c0_29, %c0_30] : memref<2x8x64x128xf32, #tpu.memory_space<vmem>>, vector<1x1x64x128xf32>
      %48 = vector.shape_cast %47 : vector<1x1x64x128xf32> to vector<64x128xf32>
      %49 = vector.shape_cast %46 : vector<64x128xf32> to vector<1x1x64x128xf32>
      tpu.vector_store %arg12[%c0_28, %c3, %c0_29, %c0_30], %49 {strides = array<i32>} : memref<2x8x64x128xf32, #tpu.memory_space<vmem>>, vector<1x1x64x128xf32>,
      %50 = vector.extract_strided_slice %25 {offsets = [0, 4, 0, 0], sizes = [1, 1, 8, 128], strides = [1, 1, 1, 1]} : vector<2x8x8x128xf32> to vector<1x1x8x128xf32>
      %51 = vector.shape_cast %50 : vector<1x1x8x128xf32> to vector<8x128xf32>
      %cst_31 = arith.constant dense<0.000000e+00> : vector<64x128xf32>
      %52 = tpu.matmul %22, %51, %cst_31 {dimension_numbers = #tpu.dot_dimension_numbers<[1], [0], [0], [1], [0, 0, 1, 1], [], []>} : vector<64x8xf32>, vector<8x128xf32>, vector<64x128xf32> -> vector<64x128xf32>
      %c0_32 = arith.constant 0 : index
      %c4 = arith.constant 4 : index
      %c0_33 = arith.constant 0 : index
      %c0_34 = arith.constant 0 : index
      %53 = vector.load %arg12[%c0_32, %c4, %c0_33, %c0_34] : memref<2x8x64x128xf32, #tpu.memory_space<vmem>>, vector<1x1x64x128xf32>
      %54 = vector.shape_cast %53 : vector<1x1x64x128xf32> to vector<64x128xf32>
      %55 = vector.shape_cast %52 : vector<64x128xf32> to vector<1x1x64x128xf32>
      tpu.vector_store %arg12[%c0_32, %c4, %c0_33, %c0_34], %55 {strides = array<i32>} : memref<2x8x64x128xf32, #tpu.memory_space<vmem>>, vector<1x1x64x128xf32>,
      %56 = vector.extract_strided_slice %25 {offsets = [0, 5, 0, 0], sizes = [1, 1, 8, 128], strides = [1, 1, 1, 1]} : vector<2x8x8x128xf32> to vector<1x1x8x128xf32>
      %57 = vector.shape_cast %56 : vector<1x1x8x128xf32> to vector<8x128xf32>
      %cst_35 = arith.constant dense<0.000000e+00> : vector<64x128xf32>
      %58 = tpu.matmul %22, %57, %cst_35 {dimension_numbers = #tpu.dot_dimension_numbers<[1], [0], [0], [1], [0, 0, 1, 1], [], []>} : vector<64x8xf32>, vector<8x128xf32>, vector<64x128xf32> -> vector<64x128xf32>
      %c0_36 = arith.constant 0 : index
      %c5 = arith.constant 5 : index
      %c0_37 = arith.constant 0 : index
      %c0_38 = arith.constant 0 : index
      %59 = vector.load %arg12[%c0_36, %c5, %c0_37, %c0_38] : memref<2x8x64x128xf32, #tpu.memory_space<vmem>>, vector<1x1x64x128xf32>
      %60 = vector.shape_cast %59 : vector<1x1x64x128xf32> to vector<64x128xf32>
      %61 = vector.shape_cast %58 : vector<64x128xf32> to vector<1x1x64x128xf32>
      tpu.vector_store %arg12[%c0_36, %c5, %c0_37, %c0_38], %61 {strides = array<i32>} : memref<2x8x64x128xf32, #tpu.memory_space<vmem>>, vector<1x1x64x128xf32>,
      %62 = vector.extract_strided_slice %25 {offsets = [0, 6, 0, 0], sizes = [1, 1, 8, 128], strides = [1, 1, 1, 1]} : vector<2x8x8x128xf32> to vector<1x1x8x128xf32>
      %63 = vector.shape_cast %62 : vector<1x1x8x128xf32> to vector<8x128xf32>
      %cst_39 = arith.constant dense<0.000000e+00> : vector<64x128xf32>
      %64 = tpu.matmul %22, %63, %cst_39 {dimension_numbers = #tpu.dot_dimension_numbers<[1], [0], [0], [1], [0, 0, 1, 1], [], []>} : vector<64x8xf32>, vector<8x128xf32>, vector<64x128xf32> -> vector<64x128xf32>
      %c0_40 = arith.constant 0 : index
      %c6 = arith.constant 6 : index
      %c0_41 = arith.constant 0 : index
      %c0_42 = arith.constant 0 : index
      %65 = vector.load %arg12[%c0_40, %c6, %c0_41, %c0_42] : memref<2x8x64x128xf32, #tpu.memory_space<vmem>>, vector<1x1x64x128xf32>
      %66 = vector.shape_cast %65 : vector<1x1x64x128xf32> to vector<64x128xf32>
      %67 = vector.shape_cast %64 : vector<64x128xf32> to vector<1x1x64x128xf32>
      tpu.vector_store %arg12[%c0_40, %c6, %c0_41, %c0_42], %67 {strides = array<i32>} : memref<2x8x64x128xf32, #tpu.memory_space<vmem>>, vector<1x1x64x128xf32>,
      %68 = vector.extract_strided_slice %25 {offsets = [0, 7, 0, 0], sizes = [1, 1, 8, 128], strides = [1, 1, 1, 1]} : vector<2x8x8x128xf32> to vector<1x1x8x128xf32>
      %69 = vector.shape_cast %68 : vector<1x1x8x128xf32> to vector<8x128xf32>
      %cst_43 = arith.constant dense<0.000000e+00> : vector<64x128xf32>
      %70 = tpu.matmul %22, %69, %cst_43 {dimension_numbers = #tpu.dot_dimension_numbers<[1], [0], [0], [1], [0, 0, 1, 1], [], []>} : vector<64x8xf32>, vector<8x128xf32>, vector<64x128xf32> -> vector<64x128xf32>
      %c0_44 = arith.constant 0 : index
      %c7 = arith.constant 7 : index
      %c0_45 = arith.constant 0 : index
      %c0_46 = arith.constant 0 : index
      %71 = vector.load %arg12[%c0_44, %c7, %c0_45, %c0_46] : memref<2x8x64x128xf32, #tpu.memory_space<vmem>>, vector<1x1x64x128xf32>
      %72 = vector.shape_cast %71 : vector<1x1x64x128xf32> to vector<64x128xf32>
      %73 = vector.shape_cast %70 : vector<64x128xf32> to vector<1x1x64x128xf32>
      tpu.vector_store %arg12[%c0_44, %c7, %c0_45, %c0_46], %73 {strides = array<i32>} : memref<2x8x64x128xf32, #tpu.memory_space<vmem>>, vector<1x1x64x128xf32>,
      %74 = vector.extract_strided_slice %25 {offsets = [1, 0, 0, 0], sizes = [1, 1, 8, 128], strides = [1, 1, 1, 1]} : vector<2x8x8x128xf32> to vector<1x1x8x128xf32>
      %75 = vector.shape_cast %74 : vector<1x1x8x128xf32> to vector<8x128xf32>
      %cst_47 = arith.constant dense<0.000000e+00> : vector<64x128xf32>
      %76 = tpu.matmul %22, %75, %cst_47 {dimension_numbers = #tpu.dot_dimension_numbers<[1], [0], [0], [1], [0, 0, 1, 1], [], []>} : vector<64x8xf32>, vector<8x128xf32>, vector<64x128xf32> -> vector<64x128xf32>
      %c1_48 = arith.constant 1 : index
      %c0_49 = arith.constant 0 : index
      %c0_50 = arith.constant 0 : index
      %c0_51 = arith.constant 0 : index
      %77 = vector.load %arg12[%c1_48, %c0_49, %c0_50, %c0_51] : memref<2x8x64x128xf32, #tpu.memory_space<vmem>>, vector<1x1x64x128xf32>
      %78 = vector.shape_cast %77 : vector<1x1x64x128xf32> to vector<64x128xf32>
      %79 = vector.shape_cast %76 : vector<64x128xf32> to vector<1x1x64x128xf32>
      tpu.vector_store %arg12[%c1_48, %c0_49, %c0_50, %c0_51], %79 {strides = array<i32>} : memref<2x8x64x128xf32, #tpu.memory_space<vmem>>, vector<1x1x64x128xf32>,
      %80 = vector.extract_strided_slice %25 {offsets = [1, 1, 0, 0], sizes = [1, 1, 8, 128], strides = [1, 1, 1, 1]} : vector<2x8x8x128xf32> to vector<1x1x8x128xf32>
      %81 = vector.shape_cast %80 : vector<1x1x8x128xf32> to vector<8x128xf32>
      %cst_52 = arith.constant dense<0.000000e+00> : vector<64x128xf32>
      %82 = tpu.matmul %22, %81, %cst_52 {dimension_numbers = #tpu.dot_dimension_numbers<[1], [0], [0], [1], [0, 0, 1, 1], [], []>} : vector<64x8xf32>, vector<8x128xf32>, vector<64x128xf32> -> vector<64x128xf32>
      %c1_53 = arith.constant 1 : index
      %c1_54 = arith.constant 1 : index
      %c0_55 = arith.constant 0 : index
      %c0_56 = arith.constant 0 : index
      %83 = vector.load %arg12[%c1_53, %c1_54, %c0_55, %c0_56] : memref<2x8x64x128xf32, #tpu.memory_space<vmem>>, vector<1x1x64x128xf32>
      %84 = vector.shape_cast %83 : vector<1x1x64x128xf32> to vector<64x128xf32>
      %85 = vector.shape_cast %82 : vector<64x128xf32> to vector<1x1x64x128xf32>
      tpu.vector_store %arg12[%c1_53, %c1_54, %c0_55, %c0_56], %85 {strides = array<i32>} : memref<2x8x64x128xf32, #tpu.memory_space<vmem>>, vector<1x1x64x128xf32>,
      %86 = vector.extract_strided_slice %25 {offsets = [1, 2, 0, 0], sizes = [1, 1, 8, 128], strides = [1, 1, 1, 1]} : vector<2x8x8x128xf32> to vector<1x1x8x128xf32>
      %87 = vector.shape_cast %86 : vector<1x1x8x128xf32> to vector<8x128xf32>
      %cst_57 = arith.constant dense<0.000000e+00> : vector<64x128xf32>
      %88 = tpu.matmul %22, %87, %cst_57 {dimension_numbers = #tpu.dot_dimension_numbers<[1], [0], [0], [1], [0, 0, 1, 1], [], []>} : vector<64x8xf32>, vector<8x128xf32>, vector<64x128xf32> -> vector<64x128xf32>
      %c1_58 = arith.constant 1 : index
      %c2_59 = arith.constant 2 : index
      %c0_60 = arith.constant 0 : index
      %c0_61 = arith.constant 0 : index
      %89 = vector.load %arg12[%c1_58, %c2_59, %c0_60, %c0_61] : memref<2x8x64x128xf32, #tpu.memory_space<vmem>>, vector<1x1x64x128xf32>
      %90 = vector.shape_cast %89 : vector<1x1x64x128xf32> to vector<64x128xf32>
      %91 = vector.shape_cast %88 : vector<64x128xf32> to vector<1x1x64x128xf32>
      tpu.vector_store %arg12[%c1_58, %c2_59, %c0_60, %c0_61], %91 {strides = array<i32>} : memref<2x8x64x128xf32, #tpu.memory_space<vmem>>, vector<1x1x64x128xf32>,
      %92 = vector.extract_strided_slice %25 {offsets = [1, 3, 0, 0], sizes = [1, 1, 8, 128], strides = [1, 1, 1, 1]} : vector<2x8x8x128xf32> to vector<1x1x8x128xf32>
      %93 = vector.shape_cast %92 : vector<1x1x8x128xf32> to vector<8x128xf32>
      %cst_62 = arith.constant dense<0.000000e+00> : vector<64x128xf32>
      %94 = tpu.matmul %22, %93, %cst_62 {dimension_numbers = #tpu.dot_dimension_numbers<[1], [0], [0], [1], [0, 0, 1, 1], [], []>} : vector<64x8xf32>, vector<8x128xf32>, vector<64x128xf32> -> vector<64x128xf32>
      %c1_63 = arith.constant 1 : index
      %c3_64 = arith.constant 3 : index
      %c0_65 = arith.constant 0 : index
      %c0_66 = arith.constant 0 : index
      %95 = vector.load %arg12[%c1_63, %c3_64, %c0_65, %c0_66] : memref<2x8x64x128xf32, #tpu.memory_space<vmem>>, vector<1x1x64x128xf32>
      %96 = vector.shape_cast %95 : vector<1x1x64x128xf32> to vector<64x128xf32>
      %97 = vector.shape_cast %94 : vector<64x128xf32> to vector<1x1x64x128xf32>
      tpu.vector_store %arg12[%c1_63, %c3_64, %c0_65, %c0_66], %97 {strides = array<i32>} : memref<2x8x64x128xf32, #tpu.memory_space<vmem>>, vector<1x1x64x128xf32>,
      %98 = vector.extract_strided_slice %25 {offsets = [1, 4, 0, 0], sizes = [1, 1, 8, 128], strides = [1, 1, 1, 1]} : vector<2x8x8x128xf32> to vector<1x1x8x128xf32>
      %99 = vector.shape_cast %98 : vector<1x1x8x128xf32> to vector<8x128xf32>
      %cst_67 = arith.constant dense<0.000000e+00> : vector<64x128xf32>
      %100 = tpu.matmul %22, %99, %cst_67 {dimension_numbers = #tpu.dot_dimension_numbers<[1], [0], [0], [1], [0, 0, 1, 1], [], []>} : vector<64x8xf32>, vector<8x128xf32>, vector<64x128xf32> -> vector<64x128xf32>
      %c1_68 = arith.constant 1 : index
      %c4_69 = arith.constant 4 : index
      %c0_70 = arith.constant 0 : index
      %c0_71 = arith.constant 0 : index
      %101 = vector.load %arg12[%c1_68, %c4_69, %c0_70, %c0_71] : memref<2x8x64x128xf32, #tpu.memory_space<vmem>>, vector<1x1x64x128xf32>
      %102 = vector.shape_cast %101 : vector<1x1x64x128xf32> to vector<64x128xf32>
      %103 = vector.shape_cast %100 : vector<64x128xf32> to vector<1x1x64x128xf32>
      tpu.vector_store %arg12[%c1_68, %c4_69, %c0_70, %c0_71], %103 {strides = array<i32>} : memref<2x8x64x128xf32, #tpu.memory_space<vmem>>, vector<1x1x64x128xf32>,
      %104 = vector.extract_strided_slice %25 {offsets = [1, 5, 0, 0], sizes = [1, 1, 8, 128], strides = [1, 1, 1, 1]} : vector<2x8x8x128xf32> to vector<1x1x8x128xf32>
      %105 = vector.shape_cast %104 : vector<1x1x8x128xf32> to vector<8x128xf32>
      %cst_72 = arith.constant dense<0.000000e+00> : vector<64x128xf32>
      %106 = tpu.matmul %22, %105, %cst_72 {dimension_numbers = #tpu.dot_dimension_numbers<[1], [0], [0], [1], [0, 0, 1, 1], [], []>} : vector<64x8xf32>, vector<8x128xf32>, vector<64x128xf32> -> vector<64x128xf32>
      %c1_73 = arith.constant 1 : index
      %c5_74 = arith.constant 5 : index
      %c0_75 = arith.constant 0 : index
      %c0_76 = arith.constant 0 : index
      %107 = vector.load %arg12[%c1_73, %c5_74, %c0_75, %c0_76] : memref<2x8x64x128xf32, #tpu.memory_space<vmem>>, vector<1x1x64x128xf32>
      %108 = vector.shape_cast %107 : vector<1x1x64x128xf32> to vector<64x128xf32>
      %109 = vector.shape_cast %106 : vector<64x128xf32> to vector<1x1x64x128xf32>
      tpu.vector_store %arg12[%c1_73, %c5_74, %c0_75, %c0_76], %109 {strides = array<i32>} : memref<2x8x64x128xf32, #tpu.memory_space<vmem>>, vector<1x1x64x128xf32>,
      %110 = vector.extract_strided_slice %25 {offsets = [1, 6, 0, 0], sizes = [1, 1, 8, 128], strides = [1, 1, 1, 1]} : vector<2x8x8x128xf32> to vector<1x1x8x128xf32>
      %111 = vector.shape_cast %110 : vector<1x1x8x128xf32> to vector<8x128xf32>
      %cst_77 = arith.constant dense<0.000000e+00> : vector<64x128xf32>
      %112 = tpu.matmul %22, %111, %cst_77 {dimension_numbers = #tpu.dot_dimension_numbers<[1], [0], [0], [1], [0, 0, 1, 1], [], []>} : vector<64x8xf32>, vector<8x128xf32>, vector<64x128xf32> -> vector<64x128xf32>
      %c1_78 = arith.constant 1 : index
      %c6_79 = arith.constant 6 : index
      %c0_80 = arith.constant 0 : index
      %c0_81 = arith.constant 0 : index
      %113 = vector.load %arg12[%c1_78, %c6_79, %c0_80, %c0_81] : memref<2x8x64x128xf32, #tpu.memory_space<vmem>>, vector<1x1x64x128xf32>
      %114 = vector.shape_cast %113 : vector<1x1x64x128xf32> to vector<64x128xf32>
      %115 = vector.shape_cast %112 : vector<64x128xf32> to vector<1x1x64x128xf32>
      tpu.vector_store %arg12[%c1_78, %c6_79, %c0_80, %c0_81], %115 {strides = array<i32>} : memref<2x8x64x128xf32, #tpu.memory_space<vmem>>, vector<1x1x64x128xf32>,
      %116 = vector.extract_strided_slice %25 {offsets = [1, 7, 0, 0], sizes = [1, 1, 8, 128], strides = [1, 1, 1, 1]} : vector<2x8x8x128xf32> to vector<1x1x8x128xf32>
      %117 = vector.shape_cast %116 : vector<1x1x8x128xf32> to vector<8x128xf32>
      %cst_82 = arith.constant dense<0.000000e+00> : vector<64x128xf32>
      %118 = tpu.matmul %22, %117, %cst_82 {dimension_numbers = #tpu.dot_dimension_numbers<[1], [0], [0], [1], [0, 0, 1, 1], [], []>} : vector<64x8xf32>, vector<8x128xf32>, vector<64x128xf32> -> vector<64x128xf32>
      %c1_83 = arith.constant 1 : index
      %c7_84 = arith.constant 7 : index
      %c0_85 = arith.constant 0 : index
      %c0_86 = arith.constant 0 : index
      %119 = vector.load %arg12[%c1_83, %c7_84, %c0_85, %c0_86] : memref<2x8x64x128xf32, #tpu.memory_space<vmem>>, vector<1x1x64x128xf32>
      %120 = vector.shape_cast %119 : vector<1x1x64x128xf32> to vector<64x128xf32>
      %121 = vector.shape_cast %118 : vector<64x128xf32> to vector<1x1x64x128xf32>
      tpu.vector_store %arg12[%c1_83, %c7_84, %c0_85, %c0_86], %121 {strides = array<i32>} : memref<2x8x64x128xf32, #tpu.memory_space<vmem>>, vector<1x1x64x128xf32>,
    } else {
    }
    return
  }
  func.func @transform_0(%arg0: i32, %arg1: i32) -> (i32, i32, i32, i32) {
    %c0_i32 = arith.constant 0 : i32
    %0 = arith.subi %arg1, %c0_i32 : i32
    %c0_i32_0 = arith.constant 0 : i32
    %1 = arith.maxsi %0, %c0_i32_0 : i32
    %c0_i32_1 = arith.constant 0 : i32
    %2 = arith.minsi %1, %c0_i32_1 : i32
    %c0_i32_2 = arith.constant 0 : i32
    %c0_i32_3 = arith.constant 0 : i32
    %c0_i32_4 = arith.constant 0 : i32
    return %arg0, %2, %c0_i32_2, %c0_i32_3 : i32, i32, i32, i32
  }
  func.func @transform_1(%arg0: i32, %arg1: i32) -> (i32, i32, i32, i32) {
    %c1_i32 = arith.constant 1 : i32
    %0 = arith.subi %arg1, %c1_i32 : i32
    %c0_i32 = arith.constant 0 : i32
    %1 = arith.maxsi %0, %c0_i32 : i32
    %c1_i32_0 = arith.constant 1 : i32
    %2 = arith.minsi %1, %c1_i32_0 : i32
    %c0_i32_1 = arith.constant 0 : i32
    %c0_i32_2 = arith.constant 0 : i32
    %c0_i32_3 = arith.constant 0 : i32
    return %arg0, %2, %c0_i32_1, %c0_i32_2 : i32, i32, i32, i32
  }
  func.func @transform_2(%arg0: i32, %arg1: i32) -> (i32, i32, i32, i32) {
    %c3_i32 = arith.constant 3 : i32
    %0 = arith.subi %arg1, %c3_i32 : i32
    %c0_i32 = arith.constant 0 : i32
    %1 = arith.maxsi %0, %c0_i32 : i32
    %c3_i32_0 = arith.constant 3 : i32
    %2 = arith.minsi %1, %c3_i32_0 : i32
    %c0_i32_1 = arith.constant 0 : i32
    %c0_i32_2 = arith.constant 0 : i32
    %c0_i32_3 = arith.constant 0 : i32
    return %arg0, %2, %c0_i32_1, %c0_i32_2 : i32, i32, i32, i32
  }
  func.func @transform_3(%arg0: i32, %arg1: i32) -> (i32, i32, i32, i32) {
    %c7_i32 = arith.constant 7 : i32
    %0 = arith.subi %arg1, %c7_i32 : i32
    %c0_i32 = arith.constant 0 : i32
    %1 = arith.maxsi %0, %c0_i32 : i32
    %c7_i32_0 = arith.constant 7 : i32
    %2 = arith.minsi %1, %c7_i32_0 : i32
    %c0_i32_1 = arith.constant 0 : i32
    %c0_i32_2 = arith.constant 0 : i32
    %c0_i32_3 = arith.constant 0 : i32
    return %arg0, %2, %c0_i32_1, %c0_i32_2 : i32, i32, i32, i32
  }
  func.func @transform_4(%arg0: i32, %arg1: i32) -> (i32, i32) {
    %c0_i32 = arith.constant 0 : i32
    %c0_i32_0 = arith.constant 0 : i32
    %c0_i32_1 = arith.constant 0 : i32
    return %c0_i32, %c0_i32_0 : i32, i32
  }
  func.func @transform_5(%arg0: i32, %arg1: i32) -> (i32, i32) {
    %c0_i32 = arith.constant 0 : i32
    %c0_i32_0 = arith.constant 0 : i32
    %c0_i32_1 = arith.constant 0 : i32
    return %c0_i32, %c0_i32_0 : i32, i32
  }
  func.func @transform_6(%arg0: i32, %arg1: i32) -> (i32, i32) {
    %c0_i32 = arith.constant 0 : i32
    %c0_i32_0 = arith.constant 0 : i32
    %c0_i32_1 = arith.constant 0 : i32
    return %c0_i32, %c0_i32_0 : i32, i32
  }
  func.func @transform_7(%arg0: i32, %arg1: i32) -> (i32, i32) {
    %c0_i32 = arith.constant 0 : i32
    %c0_i32_0 = arith.constant 0 : i32
    %c0_i32_1 = arith.constant 0 : i32
    return %c0_i32, %c0_i32_0 : i32, i32
  }
  func.func @transform_8(%arg0: i32, %arg1: i32) -> (i32, i32) {
    %c0_i32 = arith.constant 0 : i32
    %c0_i32_0 = arith.constant 0 : i32
    %c0_i32_1 = arith.constant 0 : i32
    return %c0_i32, %c0_i32_0 : i32, i32
  }
  func.func @transform_9(%arg0: i32, %arg1: i32) -> (i32, i32) {
    %c0_i32 = arith.constant 0 : i32
    %c0_i32_0 = arith.constant 0 : i32
    %c0_i32_1 = arith.constant 0 : i32
    return %c0_i32, %c0_i32_0 : i32, i32
  }
  func.func @transform_10(%arg0: i32, %arg1: i32) -> (i32, i32, i32, i32) {
    %c0_i32 = arith.constant 0 : i32
    %c0_i32_0 = arith.constant 0 : i32
    %c0_i32_1 = arith.constant 0 : i32
    return %arg0, %arg1, %c0_i32, %c0_i32_0 : i32, i32, i32, i32
  }
}

</mosaic_0001>

<bundles_post_ra>
// kernel: tpu_custom_call.1
= control target key start
LH: loop header
LB: loop body
LE: loop exit
PB: predicated region body
PF: predicated region fallthrough
CT: control target
= control target key end

     0   :  { %s13658_s0 = inlined_call_operand.hbm [shape: f32[2,8,64,128], index: 0, kind: input, shape index: {}]   ;;  %s13659_s1 = inlined_call_operand.hbm [shape: f32[2,16,32,64], index: 1, kind: input, shape index: {}]   ;;  %s13660_s2 = inlined_call_operand.hbm [shape: f32[2,32,16,32], index: 2, kind: input, shape index: {}]   ;;  %s13661_s3 = inlined_call_operand.vmem [shape: f32[2,64,8,16], index: 3, kind: input, shape index: {}]   ;;  %s13662_s4 = inlined_call_operand.vmem [shape: f32[64,32], index: 4, kind: input, shape index: {}]   ;;  %s13663_s5 = inlined_call_operand.vmem [shape: f32[64,16], index: 5, kind: input, shape index: {}]   ;;  %s13664_s6 = inlined_call_operand.vmem [shape: f32[64,8], index: 6, kind: input, shape index: {}]   ;;  %s13665_s7 = inlined_call_operand.hbm [shape: f32[64,128], index: 7, kind: input, shape index: {}]   ;;  %s13666_s8 = inlined_call_operand.hbm [shape: f32[32,128], index: 8, kind: input, shape index: {}]   ;;  %s13667_s9 = inlined_call_operand.hbm [shape: f32[16,128], index: 9, kind: input, shape index: {}]   ;;  %s13668_s10 = inlined_call_operand.hbm [shape: f32[2,120,64,128], index: 10, kind: output, shape index: {}]  }
   0x1   :  { %13704 = sst [smem:[#allocation49_spill]] %s13661_s3 }
   0x2   :  { %13705 = sst [smem:[#allocation50_spill]] %s13662_s4 }
   0x3   :  { %13706 = sst [smem:[#allocation51_spill]] %s13663_s5 }
   0x4   :  { %13707 = sst [smem:[#allocation52_spill]] %s13664_s6 }
   0x5   :  { %13708 = sst [smem:[#allocation53_spill]] %s13668_s10 }
   0x6   :  { %15 = vsyncpa [#allocation3], 0 }
   0x7   :  { %17 = vsyncpa [#allocation3 + $0x1], 0 }
   0x8   :  { %18 = vsyncpa [#allocation6], 0 }
   0x9   :  { %20 = vsyncpa [#allocation6 + $0x1], 0 }
   0xa   :  { %21 = vsyncpa [#allocation10], 0 }
   0xb   :  { %22 = vsyncpa [#allocation13], 0 }
   0xc   :  { %23 = vsyncpa [#allocation4], 0 }
   0xd   :  { %25 = vsyncpa [#allocation4 + $0x1], 0  ;;  %s11449_s13 = smov 0   ;;  %s11451_s14 = smov 0  }
   0xe   :  { %s11453_s15 = smov 0   ;;  %s11455_s16 = smov 0  }
   0xf   :  { %s11457_s17 = smov 0   ;;  %s11459_s18 = smov 0  }
  0x10   :  { %s11461_s19 = smov 0   ;;  %s11463_s20 = smov 0  }
  0x11   :  { %s11465_s21 = smov 0   ;;  %s11467_s22 = smov 0  }
  0x12   :  { %s11469_s23 = smov 0   ;;  %s11471_s24 = smov 0  }
  0x13   :  { %s11473_s25 = smov 0   ;;  %s11475_s26 = smov 0  }
  0x14 LB: > { %13709 = sst [smem:[#allocation29_spill]] %s11313_s13  ;;  %s11518_s27 = sadd.s32 4294967295, %s11365_s26   ;;  %s11365_s26 = sphi %s11475_s26, %s31_s26   ;;  %s11361_s25 = sphi %s11473_s25, %s13800_s25   ;;  %s11357_s24 = sphi %s11471_s24, %s13799_s24   ;;  %s11353_s23 = sphi %s11469_s23, %s13798_s23   ;;  %s11349_s22 = sphi %s11467_s22, %s13797_s22   ;;  %s11345_s21 = sphi %s11465_s21, %s13788_s21   ;;  %s11341_s20 = sphi %s11463_s20, %s13796_s20   ;;  %s11337_s19 = sphi %s11461_s19, %s13795_s19   ;;  %s11333_s18 = sphi %s11459_s18, %s13786_s18   ;;  %s11329_s17 = sphi %s11457_s17, %s13794_s17   ;;  %s11325_s16 = sphi %s11455_s16, %s13793_s16   ;;  %s11321_s15 = sphi %s11453_s15, %s13784_s15   ;;  %s11317_s14 = sphi %s11451_s14, %s13783_s14   ;;  %s11313_s13 = sphi %s11449_s13, %s13782_s13  }
  0x15   : > { %13710 = sst [smem:[#allocation30_spill]] %s11317_s14  ;;  %s40_s29 = sadd.s32 1, %s11361_s25 }
  0x16   : > { %13711 = sst [smem:[#allocation31_spill]] %s11321_s15  ;;  %p13683_p0 = scmp.eq.s32.totalorder %s11365_s26, 0 }
  0x17   : > { %13712 = sst [smem:[#allocation32_spill]] %s11325_s16  ;;  %p41_p1 = scmp.ge.s32.totalorder %s40_s29, 15 }
  0x18   : > { %13713 = sst [smem:[#allocation33_spill]] %s11337_s19  ;;  %p13684_p2 = scmp.eq.s32.totalorder %s11518_s27, 0 }
  0x19   : > { %13714 = sst [smem:[#allocation34_spill]] %s11349_s22  ;;  %s8100_s30 = sadd.s32 4294967295, %s11361_s25 }
  0x1a   : > { %13715 = sst [smem:[#allocation35_spill]] %s11357_s24  ;;  %s98_s11 = sadd.s32 1, %s11353_s23 }
  0x1b   : > { %13716 = sst [smem:[#allocation36_spill]] %s11361_s25  ;;  %s13802_s29 = smov (%p41_p1, %s40_s29), 0 }
  0x1c   : > { %13717 = sst [smem:[#allocation37_spill]] %s11518_s27  ;;  %p84_p3 = scmp.gt.s32.totalorder %s8100_s30, 0 }
  0x1d   : > { %13718 = sst [smem:[#allocation38_spill]] %s13802_s29  ;;  %p8101_p4 = scmp.lt.s32.totalorder %s8100_s30, 1 }
  0x1e   : > { %s8106_s12 = sadd.s32 4294967295, %s13802_s29  ;;  %p105_p5 = scmp.ne.s32.totalorder %s11353_s23, %s11349_s22 }
  0x1f   : > { %s13804_s30 = smov (!%p84_p3, %s8100_s30), 0  ;;  %p89_p6 = scmp.gt.s32.totalorder %s8106_s12, 0 }
  0x20   : > { %p8107_p7 = scmp.lt.s32.totalorder %s8106_s12, 1  ;;  %s13806_s30 = smov (!%p8101_p4, %s13804_s30), 1 }
  0x21   : > { %s13808_s12 = smov (!%p89_p6, %s8106_s12), 0  ;;  %p11535_p8 = por %p105_p5, %p13683_p0 }
  0x22   : > { %p111_p9 = scmp.ne.s32.totalorder %s11349_s22, %s11345_s21  ;;  %s13810_s12 = smov (!%p8107_p7, %s13808_s12), 1 }
  0x23   : > { %s13719_s28 = scalar_select %p11535_p8, 1, 0 }
  0x24   : > { %p11542_p10 = por %p111_p9, %p13684_p2  ;;  %s8112_s6 = sadd.s32 4294967293, %s11361_s25 }
  0x25   : > { %s94_s5 = ssub.s32 %s13806_s30, %s13810_s12  ;;  %p122_p11 = scmp.gt.s32.totalorder %s8112_s6, 0 }
  0x26   : > { %s13720_s10 = scalar_select %p11542_p10, 1, 0 }
  0x27   : > { %p96_p12 = scmp.eq.s32.totalorder %s94_s5, 0  ;;  %p8113_p13 = scmp.lt.s32.totalorder %s8112_s6, 3 }
  0x28   : > { %13721 = sst [smem:[#allocation39_spill]] %s13720_s10  ;;  %s13812_s6 = smov (!%p122_p11, %s8112_s6), 0 }
  0x29   : > { %s11549_s4 = scalar_select %p96_p12, %s11353_s23, %s98_s11  }
  0x2a   : > { %s13814_s6 = smov (!%p8113_p13, %s13812_s6), 3  ;;  %s8118_s21 = sadd.s32 4294967293, %s13802_s29 }
  0x2b   : > { %13722 = sst [smem:[#allocation40_spill]] %s11549_s4  ;;  %s136_s24 = sadd.s32 1, %s11341_s20 }
  0x2c   : > { %p127_p1 = scmp.gt.s32.totalorder %s8118_s21, 0  ;;  %p8119_p3 = scmp.lt.s32.totalorder %s8118_s21, 3 }
  0x2d   : > { %p143_p4 = scmp.ne.s32.totalorder %s11341_s20, %s11337_s19  ;;  %p149_p5 = scmp.ne.s32.totalorder %s11337_s19, %s11333_s18 }
  0x2e   : > { %s13816_s21 = smov (!%p127_p1, %s8118_s21), 0  ;;  %s8124_s12 = sadd.s32 4294967289, %s11361_s25 }
  0x2f   : > { %p11561_p6 = por %p143_p4, %p13683_p0  ;;  %p11567_p7 = por %p149_p5, %p13684_p2 }
  0x30   : > { %s13818_s21 = smov (!%p8119_p3, %s13816_s21), 3  ;;  %s8130_s18 = sadd.s32 4294967289, %s13802_s29 }
  0x31   : > { %s13723_s5 = scalar_select %p11561_p6, 1, 0 }
  0x32   : > { %s13724_s11 = scalar_select %p11567_p7, 1, 0 }
  0x33   : > { %s132_s4 = ssub.s32 %s13814_s6, %s13818_s21  ;;  %p160_p9 = scmp.gt.s32.totalorder %s8124_s12, 0 }
  0x34   : > { %13725 = sst [smem:[#allocation41_spill]] %s13724_s11  ;;  %p134_p11 = scmp.eq.s32.totalorder %s132_s4, 0 }
  0x35   : > { %p8125_p12 = scmp.lt.s32.totalorder %s8124_s12, 7  ;;  %s13820_s12 = smov (!%p160_p9, %s8124_s12), 0 }
  0x36   : > { %s11575_s19 = scalar_select %p134_p11, %s11341_s20, %s136_s24  }
  0x37   : > { %s13822_s12 = smov (!%p8125_p12, %s13820_s12), 7  ;;  %p165_p13 = scmp.gt.s32.totalorder %s8130_s18, 0 }
  0x38   : > { %13726 = sst [smem:[#allocation42_spill]] %s11575_s19  ;;  %p8131_p1 = scmp.lt.s32.totalorder %s8130_s18, 7 }
  0x39   : > { %13727 = sst [smem:[#allocation43_spill]] %s13822_s12  ;;  %s174_s21 = sadd.s32 1, %s11329_s17 }
  0x3a   : > { %p181_p3 = scmp.ne.s32.totalorder %s11329_s17, %s11325_s16  ;;  %s13824_s18 = smov (!%p165_p13, %s8130_s18), 0 }
  0x3b   : > { %s324_s24 = ssub.s32 %s11361_s25, %s13802_s29  ;;  %s13826_s18 = smov (!%p8131_p1, %s13824_s18), 7 }
  0x3c   : > { %p11584_p4 = por %p181_p3, %p13683_p0  ;;  %p326_p5 = scmp.eq.s32.totalorder %s324_s24, 0 }
  0x3d   : > { %s328_s19 = sadd.s32 1, %s11321_s15  ;;  %s170_s11 = ssub.s32 %s13822_s12, %s13826_s18 }
  0x3e   : > { %s13728_s4 = scalar_select %p11584_p4, 1, 0 }
  0x3f   : > { %p338_p9 = scmp.ne.s32.totalorder %s11321_s15, %s11317_s14  ;;  %p172_p11 = scmp.eq.s32.totalorder %s170_s11, 0 }
  0x40   : > { %p339_p12 = scmp.eq.s32.totalorder %s11518_s27, 14  ;;  %p344_p3 = scmp.ne.s32.totalorder %s11317_s14, %s11313_s13 }
  0x41   : > { %s11596_s10 = scalar_select %p326_p5, %s11321_s15, %s328_s19  }
  0x42   : > { %s11599_s16 = scalar_select %p172_p11, %s11329_s17, %s174_s21  }
  0x43   : > { %13729 = sst [smem:[#allocation44_spill]] %s11596_s10  ;;  %p11601_p13 = por %p339_p12, %p338_p9 }
  0x44   : > { %13730 = sst [smem:[#allocation45_spill]] %s11599_s16  ;;  %s13733_s3 = sadd.s32 4294967294, %s11365_s26  }
  0x45   : > { %s13731_s22 = scalar_select %p11601_p13, 1, 0 }
  0x46   : > { %p345_p0 = scmp.eq.s32.totalorder %s13733_s3, 14  ;;  %p8136_p2 = scmp.ge.s32.totalorder %s11365_s26, 1 }
  0x47   : > { %13732 = sst [smem:[#allocation46_spill]] %s13731_s22  ;;  %p352_p1 = scmp.lt.s32.totalorder %s11365_s26, 16 }
  0x48   : > { %p11611_p7 = por %p345_p0, %p344_p3  ;;  %s11367_s19 = smov [#allocation9]  }
  0x49   : > { %p11615_p10 = pnand %p8136_p2, %p352_p1  ;;  %s373_s18 = sshll.u32 %s11367_s19, 4  ;;  %s11619_s18 = int_to_ptr.vmem [resolvable:$true] %s373_s18 }
  0x4a   : > { %s13734_s24 = scalar_select %p11611_p7, 1, 0 }
  0x4b   : > { %s13736_s11 = scalar_select %p11615_p10, 1, 0 }
  0x4c   : > { %13735 = sst [smem:[#allocation47_spill]] %s13734_s24  ;;  %p10961_p5 = pneg %p11615_p10 }
  0x4d   : > { %13737 = sst [smem:[#allocation48_spill]] %s13736_s11  ;;  %p13738_p9 = scmp.eq.s32.totalorder %s11518_s27, 0 }
  0x4e   : > { %s11368_s21 = smov [#allocation11]   ;;  %s11369_s25 = smov [#allocation12]  }
  0x4f   : > { %p11625_p11 = pnand %p10961_p5, %p13738_p9  ;;  %s386_s29 = sshll.u32 %s11368_s21, 4  ;;  %s11629_s29 = int_to_ptr.vmem [resolvable:$true] %s386_s29 }
  0x50   : > { %s399_s16 = sshll.u32 %s11369_s25, 4  ;;  %s11121_s15 = scalar_lea.hbm %s13665_s7, 1024  ;;  %s11631_s16 = int_to_ptr.vmem [resolvable:$true] %s399_s16 }
  0x51   : > { %p11122_p0 = scmp.ne.s32.totalorder %s13665_s7, %s11121_s15  ;;  %p11641_p2 = pneg %p11625_p11 }
  0x52   : > { %p11128_p1 = scmp.lt.u32.totalorder %s11121_s15, %s13665_s7 }
  0x53   : > { %p11124_p12 = pnand %p11641_p2, %p11122_p0 }
  0x55   : > { %p11125_p3 = pneg %p11124_p12 }
  0x57   : > { %p11130_p5 = pnand %p11128_p1, %p11125_p3 }
  0x59   : > { %11133 = shalt.err (!%p11130_p5)
}
  0x5a   : > { %s11134_s10 = scalar_lea.vmem %s11619_s18, 1024  ;;  %p11142_p10 = scmp.lt.s32.totalorder %s11619_s18, %s11619_s18 }
  0x5b   : > { %p11135_p9 = scmp.ne.s32.totalorder %s11619_s18, %s11134_s10  ;;  %p11143_p4 = scmp.lt.s32.totalorder %s11134_s10, %s11134_s10 }
  0x5d   : > { %p11137_p7 = pnand %p11135_p9, %p11641_p2  ;;  %p11144_p0 = por %p11143_p4, %p11142_p10 }
  0x5f   : > { %p11138_p13 = pneg %p11137_p7 }
  0x61   : > { %p11145_p12 = pnand %p11144_p0, %p11138_p13 }
  0x63   : > { %11148 = shalt.err (!%p11145_p12)
}
  0x64   : > { %s11370_s13 = smov 128   ;;  %s11371_s15 = smov 8  }
  0x65   : > { %10964 = dma.hbm_to_vmem [thread:$0]  (!%p11625_p11), %s13665_s7, 1024, %s11619_s18, [#allocation10], %s11370_s13, %s11370_s13, %s11371_s15  }
  0x66   : > { %s11149_s10 = scalar_lea.hbm %s13666_s8, 512 }
  0x67   : > { %p11150_p10 = scmp.ne.s32.totalorder %s13666_s8, %s11149_s10  ;;  %p11156_p13 = scmp.lt.u32.totalorder %s11149_s10, %s13666_s8 }
  0x69   : > { %p11152_p7 = pnand %p11150_p10, %p11641_p2 }
  0x6b   : > { %p11153_p4 = pneg %p11152_p7 }
  0x6d   : > { %p11158_p3 = pnand %p11156_p13, %p11153_p4 }
  0x6f   : > { %11161 = shalt.err (!%p11158_p3)
}
  0x70   : > { %s11162_s18 = scalar_lea.vmem %s11629_s29, 512  ;;  %p11170_p0 = scmp.lt.s32.totalorder %s11629_s29, %s11629_s29 }
  0x71   : > { %p11163_p1 = scmp.ne.s32.totalorder %s11629_s29, %s11162_s18  ;;  %p11171_p12 = scmp.lt.s32.totalorder %s11162_s18, %s11162_s18 }
  0x73   : > { %p11165_p5 = pnand %p11163_p1, %p11641_p2  ;;  %p11172_p10 = por %p11171_p12, %p11170_p0 }
  0x75   : > { %p11166_p9 = pneg %p11165_p5 }
  0x77   : > { %p11173_p7 = pnand %p11172_p10, %p11166_p9 }
  0x79   : > { %11176 = shalt.err (!%p11173_p7)
}
  0x7a   : > { %10967 = dma.hbm_to_vmem [thread:$0]  (!%p11625_p11), %s13666_s8, 512, %s11629_s29, [#allocation10], %s11370_s13, %s11370_s13, %s11371_s15  }
  0x7b   : > { %s11177_s24 = scalar_lea.hbm %s13667_s9, 256 }
  0x7c   : > { %p11178_p4 = scmp.ne.s32.totalorder %s13667_s9, %s11177_s24  ;;  %p11184_p1 = scmp.lt.u32.totalorder %s11177_s24, %s13667_s9 }
  0x7e   : > { %p11180_p13 = pnand %p11178_p4, %p11641_p2 }
  0x80   : > { %p11181_p3 = pneg %p11180_p13 }
  0x82   : > { %p11186_p5 = pnand %p11184_p1, %p11181_p3 }
  0x84   : > { %11189 = shalt.err (!%p11186_p5)
}
  0x85   : > { %s11190_s29 = scalar_lea.vmem %s11631_s16, 256  ;;  %p11198_p10 = scmp.lt.s32.totalorder %s11631_s16, %s11631_s16 }
  0x86   : > { %p11191_p9 = scmp.ne.s32.totalorder %s11631_s16, %s11190_s29  ;;  %p11199_p7 = scmp.lt.s32.totalorder %s11190_s29, %s11190_s29 }
  0x88   : > { %p11193_p0 = pnand %p11191_p9, %p11641_p2  ;;  %p11200_p4 = por %p11199_p7, %p11198_p10 }
  0x8a   : > { %p11194_p12 = pneg %p11193_p0 }
  0x8c   : > { %p11201_p13 = pnand %p11200_p4, %p11194_p12 }
  0x8e   : > { %11204 = shalt.err (!%p11201_p13)
}
  0x8f   : > { %10970 = dma.hbm_to_vmem [thread:$0]  (!%p11625_p11), %s13667_s9, 256, %s11631_s16, [#allocation13], %s11370_s13, %s11370_s13, %s11371_s15  }
  0x90   : > { %p8140_p3 = scmp.ge.s32.totalorder %s11365_s26, 15 }
  0x91   : > { %s11372_s22 = smov (!%p8140_p3), [#allocation2]   ;;  %s11205_s24 = scalar_lea.hbm (!%p8140_p3), %s13658_s0, 16384 }
  0x92   : > { %409 = sbr.rel (%p8140_p3) target bundleno = 216 (0xd8), region = 40  ;;  %s432_s27 = sshll.u32 (!%p8140_p3), %s11372_s22, 4  ;;  %s433_s27 = int_to_ptr.vmem [resolvable:$true] %s432_s27 }
  0x93   : > { %p11206_p2 = scmp.ne.s32.totalorder (!%p8140_p3), %s13658_s0, %s11205_s24  ;;  %p13741_p1 = scmp.eq.s32.totalorder (!%p8140_p3), %s11365_s26, 0 }
  0x94   : > { %p11211_p11 = scmp.lt.u32.totalorder (!%p8140_p3), %s11205_s24, %s13658_s0 }
  0x95   : > { %p11207_p5 = pnand (!%p8140_p3), %p11206_p2, %p13741_p1 }
  0x97   : > { %p11208_p9 = pneg (!%p8140_p3), %p11207_p5 }
  0x99   : > { %p11213_p0 = pnand %p11211_p11, %p11208_p9 }
  0x9b   : > { %11216 = shalt.err (!%p11213_p0)
}
  0x9c   : > { %s11217_s13 = scalar_lea.vmem %s433_s27, 16384  ;;  %p13742_p10 = pmov %p13741_p1 }
  0x9d   : > { %p11218_p12 = scmp.ne.s32.totalorder %s433_s27, %s11217_s13  ;;  %s11223_s15 = scalar_lea.vmem %s433_s27, 32768 }
  0x9e   : > { %p11224_p13 = scmp.lt.s32.totalorder %s433_s27, %s433_s27  ;;  %p11225_p3 = scmp.lt.s32.totalorder %s11223_s15, %s11217_s13 }
  0x9f   : > { %p11219_p7 = pnand %p11218_p12, %p13742_p10 }
  0xa0   : > { %p11226_p6 = por %p11225_p3, %p11224_p13 }
  0xa1   : > { %p11220_p4 = pneg %p11219_p7 }
  0xa3   : > { %p11227_p8 = pnand %p11226_p6, %p11220_p4 }
  0xa5   : > { %11230 = shalt.err (!%p11227_p8)
}
  0xa6   : > { %s11373_s21 = smov 128   ;;  %s11374_s10 = smov 8  }
  0xa7   : > { %p13743_p2 = pmov %p13741_p1 }
  0xa9   : > { %10927 = dma.hbm_to_vmem [thread:$0]  (%p13743_p2), %s13658_s0, 16384, %s433_s27, [#allocation3], %s11373_s21, %s11373_s21, %s11374_s10  }
  0xaa   : > { %s442_s14 = sand.u32 1, %s11365_s26   ;;  %s444_s22 = sand.u32 1, %s11353_s23  }
  0xab   : > { %s8150_s12 = sshll.u32 %s444_s22, 9  ;;  %s9069_s11 = sshll.u32 %s13806_s30, 12 }
  0xac   : > { %s461_s19 = scalar_lea.hbm %s13659_s1, %s9069_s11  ;;  %p13744_p8 = scmp.ne.s32.totalorder %s13719_s28, 0 }
  0xad   : > { %s446_s27 = scalar_lea.vmem [#allocation5], %s8150_s12  ;;  %s11375_s15 = smov 8192  }
  0xae   : > { %s10928_s25 = scalar_select %p13744_p8, [#allocation0], [#allocation21] }
  0xaf   : > { %s474_s16 = sshll.u32 %s446_s27, 4  ;;  %10929 = sst [smem:[#allocation16]] (%p13744_p8), %s11375_s15  ;;  %s475_s16 = int_to_ptr.vmem [resolvable:$true] %s474_s16 }
  0xb0   : > { %s466_s13 = sld [smem:[%s10928_s25]]   ;;  %s11376_s21 = smov 4096  }
  0xb1   : > { %10930 = sst [smem:[#allocation16 + $0x1]] (%p13744_p8), %s11376_s21  ;;  %s11377_s10 = smov 32  }
  0xb2   : > { %10931 = sst [smem:[#allocation16 + $0x2]] (%p13744_p8), %s11377_s10  ;;  %s11378_s30 = smov 128  }
  0xb3   : > { %10932 = sst [smem:[#allocation16 + $0x3]] (%p13744_p8), %s11378_s30  ;;  %s11379_s18 = smov 8  }
  0xb4   : > { %10933 = sst [smem:[#allocation16 + $0x4]] (%p13744_p8), %s11378_s30  ;;  %s11756_s12 = scalar_lea.sflag [#allocation6], %s442_s14 }
  0xb5   : > { %10934 = sst [smem:[#allocation16 + $0x5]] (%p13744_p8), %s11379_s18  ;;  %s11380_s11 = smov [#allocation15]  }
  0xb6   : > { %s8160_s29 = sshll.u32 %s466_s13, 26 }
  0xb7   : > { %s8161_s22 = sadd.s32 134217728, %s8160_s29 }
  0xb8   : > { %10935 = dma.general (%p13744_p8), %s461_s19, 8192, %s475_s16, %s11756_s12, %s11380_s11, [#allocation16], %s8161_s22, 0  }
  0xb9   : > { %s499_s24 = sand.u32 1, %s11341_s20   ;;  %s9073_s25 = sshll.u32 %s13814_s6, 11 }
  0xba   : > { %s8162_s3 = sshll.u32 %s499_s24, 8  ;;  %p13745_p6 = scmp.ne.s32.totalorder %s13723_s5, 0 }
  0xbb   : > { %s516_s15 = scalar_lea.hbm %s13660_s2, %s9073_s25  ;;  %s11381_s28 = smov 8192  }
  0xbc   : > { %s10936_s27 = scalar_select %p13745_p6, [#allocation0], [#allocation22] }
  0xbd   : > { %10937 = sst [smem:[#allocation18]] (%p13745_p6), %s11381_s28  ;;  %s501_s16 = scalar_lea.vmem [#allocation7], %s8162_s3 }
  0xbe   : > { %s521_s19 = sld [smem:[%s10936_s27]]   ;;  %s529_s21 = sshll.u32 %s501_s16, 4  ;;  %s530_s21 = int_to_ptr.vmem [resolvable:$true] %s529_s21 }
  0xbf   : > { %s11382_s10 = smov 2048   ;;  %s11383_s30 = smov 16  }
  0xc0   : > { %10938 = sst [smem:[#allocation18 + $0x1]] (%p13745_p6), %s11382_s10  ;;  %s11384_s6 = smov 128  }
  0xc1   : > { %10939 = sst [smem:[#allocation18 + $0x2]] (%p13745_p6), %s11383_s30  ;;  %s11385_s18 = smov 8  }
  0xc2   : > { %10940 = sst [smem:[#allocation18 + $0x3]] (%p13745_p6), %s11384_s6  ;;  %s11386_s11 = smov [#allocation17]  }
  0xc3   : > { %10941 = sst [smem:[#allocation18 + $0x4]] (%p13745_p6), %s11384_s6  ;;  %p13746_p1 = scmp.ne.s32.totalorder %s13728_s4, 0 }
  0xc4   : > { %s8172_s29 = sshll.u32 %s521_s19, 26  ;;  %10942 = sst [smem:[#allocation18 + $0x5]] (%p13745_p6), %s11385_s18 }
  0xc5   : > { %s8173_s22 = sadd.s32 134217728, %s8172_s29  ;;  %551 = sbr.rel (!%p13746_p1) target bundleno = 216 (0xd8), region = 56 }
  0xc6   : > { %10943 = dma.general (%p13745_p6), %s516_s15, 4096, %s530_s21, %s11756_s12, %s11386_s11, [#allocation18], %s8173_s22, 0  }
  0xc7   : > { %s13747_s24 = sld [smem:[#allocation43_spill]] (%p13746_p1)  ;;  %s553_s3 = sand.u32 (%p13746_p1), 1, %s11329_s17  }
  0xc8   : > { %s8174_s27 = sshll.u32 (%p13746_p1), %s553_s3, 7  ;;  %s13748_s28 = sld [smem:[#allocation49_spill]] (%p13746_p1) }
  0xc9   : > { %s555_s5 = scalar_lea.vmem (%p13746_p1), [#allocation8], %s8174_s27 }
  0xcd   : > { %s9076_s25 = sshll.u32 %s13747_s24, 6 }
  0xce   : > { %s11790_s16 = scalar_lea.vmem %s13748_s28, %s9076_s25 }
  0xcf   : > { %v624_v0 = vld [vmem:[%s11790_s16] sm:$0xff]  ;;  %v626_v1 = vld [vmem:[%s11790_s16 + $0x8] sm:$0xff]  ;;  %v628_v2 = vld [vmem:[%s11790_s16 + $0x10] sm:$0xff] }
  0xd0   : > { %625 = vst [vmem:[%s555_s5] sm:$0xff] %v624_v0  ;;  %627 = vst [vmem:[%s555_s5 + $0x8] sm:$0xff] %v626_v1  ;;  %v630_v3 = vld [vmem:[%s11790_s16 + $0x18] sm:$0xff]  ;;  %v632_v4 = vld [vmem:[%s11790_s16 + $0x20] sm:$0xff] }
  0xd1   : > { %629 = vst [vmem:[%s555_s5 + $0x10] sm:$0xff] %v628_v2  ;;  %v634_v5 = vld [vmem:[%s11790_s16 + $0x28] sm:$0xff]  ;;  %631 = vst [vmem:[%s555_s5 + $0x18] sm:$0xff] %v630_v3  ;;  %v636_v6 = vld [vmem:[%s11790_s16 + $0x30] sm:$0xff] }
  0xd2   : > { %633 = vst [vmem:[%s555_s5 + $0x20] sm:$0xff] %v632_v4  ;;  %635 = vst [vmem:[%s555_s5 + $0x28] sm:$0xff] %v634_v5  ;;  %v638_v7 = vld [vmem:[%s11790_s16 + $0x38] sm:$0xff]  ;;  %v640_v8 = vld [vmem:[%s11790_s16 + $0x200] sm:$0xff] }
  0xd3   : > { %637 = vst [vmem:[%s555_s5 + $0x30] sm:$0xff] %v636_v6  ;;  %639 = vst [vmem:[%s555_s5 + $0x38] sm:$0xff] %v638_v7  ;;  %v642_v9 = vld [vmem:[%s11790_s16 + $0x208] sm:$0xff]  ;;  %v644_v10 = vld [vmem:[%s11790_s16 + $0x210] sm:$0xff] }
  0xd4   : > { %641 = vst [vmem:[%s555_s5 + $0x40] sm:$0xff] %v640_v8  ;;  %v646_v11 = vld [vmem:[%s11790_s16 + $0x218] sm:$0xff]  ;;  %643 = vst [vmem:[%s555_s5 + $0x48] sm:$0xff] %v642_v9  ;;  %v648_v12 = vld [vmem:[%s11790_s16 + $0x220] sm:$0xff] }
  0xd5   : > { %645 = vst [vmem:[%s555_s5 + $0x50] sm:$0xff] %v644_v10  ;;  %647 = vst [vmem:[%s555_s5 + $0x58] sm:$0xff] %v646_v11  ;;  %v650_v13 = vld [vmem:[%s11790_s16 + $0x228] sm:$0xff]  ;;  %v652_v14 = vld [vmem:[%s11790_s16 + $0x230] sm:$0xff] }
  0xd6   : > { %649 = vst [vmem:[%s555_s5 + $0x60] sm:$0xff] %v648_v12  ;;  %651 = vst [vmem:[%s555_s5 + $0x68] sm:$0xff] %v650_v13  ;;  %v654_v15 = vld [vmem:[%s11790_s16 + $0x238] sm:$0xff] }
  0xd7   : > { %653 = vst [vmem:[%s555_s5 + $0x70] sm:$0xff] %v652_v14  ;;  %655 = vst [vmem:[%s555_s5 + $0x78] sm:$0xff] %v654_v15 }
  0xd8 PF: > { %s13749_s4 = sld [smem:[#allocation48_spill]] }
  0xde   : > { %p13750_p5 = scmp.ne.s32.totalorder %s13749_s4, 0 }
  0xdf   : > { %s13751_s12 = sld [smem:[#allocation37_spill]] (!%p13750_p5) }
  0xe0   : > { %664 = sbr.rel (%p13750_p5) target bundleno = 2208 (0x8a0), region = 94 }
  0xe5   : > { %p13752_p9 = scmp.eq.s32.totalorder (!%p13750_p5), %s13751_s12, 0 }
  0xe7   : > { %11288 = dma.done.wait (%p13752_p9), [#allocation3], 16384   ;;  %p13753_p11 = pmov %p13752_p9 }
  0xe8   : > { %s13754_s15 = sld [smem:[#allocation34_spill]]  ;;  %s13755_s19 = sld [smem:[#allocation39_spill]] }
  0xe9   : > { %11290 = vsyncadd (%p13753_p11), [#allocation3], 4294950912  ;;  %s675_s21 = sand.u32 1, %s13751_s12  }
  0xea   : > { %s676_s6 = scalar_lea.sflag [#allocation6], %s675_s21 }
  0xee   : > { %s677_s10 = sand.u32 1, %s13754_s15   ;;  %p13756_p0 = scmp.ne.s32.totalorder %s13755_s19, 0 }
  0xef   : > { %s8185_s30 = sshll.u32 %s677_s10, 9 }
  0xf0   : > { %s11816_s29 = scalar_lea.vmem [#allocation5], %s8185_s30 }
  0xf1   : > { %11292 = dma.done.wait (%p13756_p0), %s676_s6, 8192  }
  0xf2   : > { %11294 = vsyncadd (%p13756_p0), %s676_s6, 4294959104  ;;  %s13757_s18 = sld [smem:[#allocation33_spill]]  ;;  %s13758_s22 = sld [smem:[#allocation41_spill]] }
  0xf8   : > { %s686_s11 = sand.u32 1, %s13757_s18   ;;  %p13759_p12 = scmp.ne.s32.totalorder %s13758_s22, 0 }
  0xf9   : > { %s8186_s24 = sshll.u32 %s686_s11, 8 }
  0xfa   : > { %s11823_s3 = scalar_lea.vmem [#allocation7], %s8186_s24 }
  0xfb   : > { %11296 = dma.done.wait (%p13759_p12), %s676_s6, 4096  }
  0xfc   : > { %11298 = vsyncadd (%p13759_p12), %s676_s6, 4294963200  ;;  %s13760_s25 = sld [smem:[#allocation32_spill]]  ;;  %p13761_p10 = pmov %p13752_p9 }
 0x102   : > { %s694_s27 = sand.u32 1, %s13760_s25  }
 0x103   : > { %s8187_s13 = sshll.u32 %s694_s27, 7 }
 0x104   : > { %s11830_s14 = scalar_lea.vmem [#allocation8], %s8187_s13 }
 0x105   : > { %11300 = dma.done.wait (%p13761_p10), [#allocation10], 1536   ;;  %p13762_p7 = pmov %p13752_p9 }
 0x107   : > { %11302 = vsyncadd (%p13762_p7), [#allocation10], 4294965760  ;;  %p13763_p4 = pmov %p13762_p7 }
 0x109   : > { %11304 = dma.done.wait (%p13763_p4), [#allocation13], 256   ;;  %p13764_p13 = pmov %p13763_p4 }
 0x10a   : > { %s13765_s28 = sld [smem:[#allocation30_spill]]  ;;  %s13766_s16 = sld [smem:[#allocation35_spill]] }
 0x10b   : > { %11306 = vsyncadd (%p13764_p13), [#allocation13], 4294967040 }
 0x110   : > { %s755_s5 = sand.u32 1, %s13765_s28   ;;  %p787_p3 = scmp.ge.s32.totalorder %s13766_s16, 0 }
 0x111   : > { %s8191_s4 = sshll.u32 %s755_s5, 10  ;;  %p788_p2 = scmp.lt.s32.totalorder %s13766_s16, 1 }
 0x112   : > { %s11845_s15 = scalar_lea.vmem [#allocation14], %s8191_s4 }
 0x113   : > { %p789_p8 = pnand %p788_p2, %p787_p3 }
 0x114   : > { %v793_v16 = vld [vmem:[#allocation2] sm:$0xff] (!%p789_p8)  ;;  %v794_v17 = vld [vmem:[#allocation2 + $0x8] sm:$0xff] (!%p789_p8)  ;;  %v795_v18 = vld [vmem:[#allocation2 + $0x10] sm:$0xff] (!%p789_p8) }
 0x115   : > { %792 = sbr.rel (%p789_p8) target bundleno = 341 (0x155), region = 126  ;;  %921 = vst [vmem:[%s11845_s15] sm:$0xff] (!%p789_p8), %v793_v16  ;;  %922 = vst [vmem:[%s11845_s15 + $0x8] sm:$0xff] (!%p789_p8), %v794_v17  ;;  %v796_v19 = vld [vmem:[#allocation2 + $0x18] sm:$0xff] (!%p789_p8)  ;;  %v797_v20 = vld [vmem:[#allocation2 + $0x20] sm:$0xff] (!%p789_p8) }
 0x116   : > { %923 = vst [vmem:[%s11845_s15 + $0x10] sm:$0xff] (!%p789_p8), %v795_v18  ;;  %v798_v21 = vld [vmem:[#allocation2 + $0x28] sm:$0xff] (!%p789_p8)  ;;  %924 = vst [vmem:[%s11845_s15 + $0x18] sm:$0xff] (!%p789_p8), %v796_v19  ;;  %v799_v22 = vld [vmem:[#allocation2 + $0x30] sm:$0xff] (!%p789_p8) }
 0x117   : > { %925 = vst [vmem:[%s11845_s15 + $0x20] sm:$0xff] (!%p789_p8), %v797_v20  ;;  %926 = vst [vmem:[%s11845_s15 + $0x28] sm:$0xff] (!%p789_p8), %v798_v21  ;;  %v800_v23 = vld [vmem:[#allocation2 + $0x38] sm:$0xff] (!%p789_p8)  ;;  %v801_v24 = vld [vmem:[#allocation2 + $0x40] sm:$0xff] (!%p789_p8) }
 0x118   : > { %927 = vst [vmem:[%s11845_s15 + $0x30] sm:$0xff] (!%p789_p8), %v799_v22  ;;  %928 = vst [vmem:[%s11845_s15 + $0x38] sm:$0xff] (!%p789_p8), %v800_v23  ;;  %v802_v25 = vld [vmem:[#allocation2 + $0x48] sm:$0xff] (!%p789_p8)  ;;  %v803_v26 = vld [vmem:[#allocation2 + $0x50] sm:$0xff] (!%p789_p8) }
 0x119   : > { %929 = vst [vmem:[%s11845_s15 + $0x40] sm:$0xff] (!%p789_p8), %v801_v24  ;;  %v804_v27 = vld [vmem:[#allocation2 + $0x58] sm:$0xff] (!%p789_p8)  ;;  %930 = vst [vmem:[%s11845_s15 + $0x48] sm:$0xff] (!%p789_p8), %v802_v25  ;;  %v805_v28 = vld [vmem:[#allocation2 + $0x60] sm:$0xff] (!%p789_p8) }
 0x11a   : > { %931 = vst [vmem:[%s11845_s15 + $0x50] sm:$0xff] (!%p789_p8), %v803_v26  ;;  %932 = vst [vmem:[%s11845_s15 + $0x58] sm:$0xff] (!%p789_p8), %v804_v27  ;;  %v806_v29 = vld [vmem:[#allocation2 + $0x68] sm:$0xff] (!%p789_p8)  ;;  %v807_v30 = vld [vmem:[#allocation2 + $0x70] sm:$0xff] (!%p789_p8) }
 0x11b   : > { %933 = vst [vmem:[%s11845_s15 + $0x60] sm:$0xff] (!%p789_p8), %v805_v28  ;;  %934 = vst [vmem:[%s11845_s15 + $0x68] sm:$0xff] (!%p789_p8), %v806_v29  ;;  %v808_v31 = vld [vmem:[#allocation2 + $0x78] sm:$0xff] (!%p789_p8)  ;;  %v809_v32 = vld [vmem:[#allocation2 + $0x80] sm:$0xff] (!%p789_p8) }
 0x11c   : > { %935 = vst [vmem:[%s11845_s15 + $0x70] sm:$0xff] %v807_v30  ;;  %v810_v33 = vld [vmem:[#allocation2 + $0x88] sm:$0xff]  ;;  %936 = vst [vmem:[%s11845_s15 + $0x78] sm:$0xff] %v808_v31  ;;  %v811_v34 = vld [vmem:[#allocation2 + $0x90] sm:$0xff] }
 0x11d   : > { %937 = vst [vmem:[%s11845_s15 + $0x80] sm:$0xff] %v809_v32  ;;  %938 = vst [vmem:[%s11845_s15 + $0x88] sm:$0xff] %v810_v33  ;;  %v812_v35 = vld [vmem:[#allocation2 + $0x98] sm:$0xff]  ;;  %v813_v36 = vld [vmem:[#allocation2 + $0xa0] sm:$0xff] }
 0x11e   : > { %939 = vst [vmem:[%s11845_s15 + $0x90] sm:$0xff] %v811_v34  ;;  %940 = vst [vmem:[%s11845_s15 + $0x98] sm:$0xff] %v812_v35  ;;  %v814_v37 = vld [vmem:[#allocation2 + $0xa8] sm:$0xff]  ;;  %v815_v38 = vld [vmem:[#allocation2 + $0xb0] sm:$0xff] }
 0x11f   : > { %941 = vst [vmem:[%s11845_s15 + $0xa0] sm:$0xff] %v813_v36  ;;  %v816_v39 = vld [vmem:[#allocation2 + $0xb8] sm:$0xff]  ;;  %942 = vst [vmem:[%s11845_s15 + $0xa8] sm:$0xff] %v814_v37  ;;  %v817_v40 = vld [vmem:[#allocation2 + $0xc0] sm:$0xff] }
 0x120   : > { %943 = vst [vmem:[%s11845_s15 + $0xb0] sm:$0xff] %v815_v38  ;;  %944 = vst [vmem:[%s11845_s15 + $0xb8] sm:$0xff] %v816_v39  ;;  %v818_v41 = vld [vmem:[#allocation2 + $0xc8] sm:$0xff]  ;;  %v819_v42 = vld [vmem:[#allocation2 + $0xd0] sm:$0xff] }
 0x121   : > { %945 = vst [vmem:[%s11845_s15 + $0xc0] sm:$0xff] %v817_v40  ;;  %946 = vst [vmem:[%s11845_s15 + $0xc8] sm:$0xff] %v818_v41  ;;  %v820_v43 = vld [vmem:[#allocation2 + $0xd8] sm:$0xff]  ;;  %v821_v44 = vld [vmem:[#allocation2 + $0xe0] sm:$0xff] }
 0x122   : > { %947 = vst [vmem:[%s11845_s15 + $0xd0] sm:$0xff] %v819_v42  ;;  %v822_v45 = vld [vmem:[#allocation2 + $0xe8] sm:$0xff]  ;;  %948 = vst [vmem:[%s11845_s15 + $0xd8] sm:$0xff] %v820_v43  ;;  %v823_v46 = vld [vmem:[#allocation2 + $0xf0] sm:$0xff] }
 0x123   : > { %949 = vst [vmem:[%s11845_s15 + $0xe0] sm:$0xff] %v821_v44  ;;  %950 = vst [vmem:[%s11845_s15 + $0xe8] sm:$0xff] %v822_v45  ;;  %v824_v47 = vld [vmem:[#allocation2 + $0xf8] sm:$0xff]  ;;  %v825_v48 = vld [vmem:[#allocation2 + $0x100] sm:$0xff] }
 0x124   : > { %951 = vst [vmem:[%s11845_s15 + $0xf0] sm:$0xff] %v823_v46  ;;  %952 = vst [vmem:[%s11845_s15 + $0xf8] sm:$0xff] %v824_v47  ;;  %v826_v49 = vld [vmem:[#allocation2 + $0x108] sm:$0xff]  ;;  %v827_v50 = vld [vmem:[#allocation2 + $0x110] sm:$0xff] }
 0x125   : > { %953 = vst [vmem:[%s11845_s15 + $0x100] sm:$0xff] %v825_v48  ;;  %v828_v51 = vld [vmem:[#allocation2 + $0x118] sm:$0xff]  ;;  %954 = vst [vmem:[%s11845_s15 + $0x108] sm:$0xff] %v826_v49  ;;  %v829_v52 = vld [vmem:[#allocation2 + $0x120] sm:$0xff] }
 0x126   : > { %955 = vst [vmem:[%s11845_s15 + $0x110] sm:$0xff] %v827_v50  ;;  %956 = vst [vmem:[%s11845_s15 + $0x118] sm:$0xff] %v828_v51  ;;  %v830_v53 = vld [vmem:[#allocation2 + $0x128] sm:$0xff]  ;;  %v831_v54 = vld [vmem:[#allocation2 + $0x130] sm:$0xff] }
 0x127   : > { %957 = vst [vmem:[%s11845_s15 + $0x120] sm:$0xff] %v829_v52  ;;  %958 = vst [vmem:[%s11845_s15 + $0x128] sm:$0xff] %v830_v53  ;;  %v832_v55 = vld [vmem:[#allocation2 + $0x138] sm:$0xff]  ;;  %v833_v56 = vld [vmem:[#allocation2 + $0x140] sm:$0xff] }
 0x128   : > { %959 = vst [vmem:[%s11845_s15 + $0x130] sm:$0xff] %v831_v54  ;;  %v834_v57 = vld [vmem:[#allocation2 + $0x148] sm:$0xff]  ;;  %960 = vst [vmem:[%s11845_s15 + $0x138] sm:$0xff] %v832_v55  ;;  %v835_v58 = vld [vmem:[#allocation2 + $0x150] sm:$0xff] }
 0x129   : > { %961 = vst [vmem:[%s11845_s15 + $0x140] sm:$0xff] %v833_v56  ;;  %962 = vst [vmem:[%s11845_s15 + $0x148] sm:$0xff] %v834_v57  ;;  %v836_v59 = vld [vmem:[#allocation2 + $0x158] sm:$0xff]  ;;  %v837_v60 = vld [vmem:[#allocation2 + $0x160] sm:$0xff] }
 0x12a   : > { %963 = vst [vmem:[%s11845_s15 + $0x150] sm:$0xff] %v835_v58  ;;  %964 = vst [vmem:[%s11845_s15 + $0x158] sm:$0xff] %v836_v59  ;;  %v838_v61 = vld [vmem:[#allocation2 + $0x168] sm:$0xff]  ;;  %v839_v62 = vld [vmem:[#allocation2 + $0x170] sm:$0xff] }
 0x12b   : > { %965 = vst [vmem:[%s11845_s15 + $0x160] sm:$0xff] %v837_v60  ;;  %v840_v63 = vld [vmem:[#allocation2 + $0x178] sm:$0xff]  ;;  %966 = vst [vmem:[%s11845_s15 + $0x168] sm:$0xff] %v838_v61  ;;  %v841_v0 = vld [vmem:[#allocation2 + $0x180] sm:$0xff] }
 0x12c   : > { %967 = vst [vmem:[%s11845_s15 + $0x170] sm:$0xff] %v839_v62  ;;  %968 = vst [vmem:[%s11845_s15 + $0x178] sm:$0xff] %v840_v63  ;;  %v842_v1 = vld [vmem:[#allocation2 + $0x188] sm:$0xff]  ;;  %v843_v2 = vld [vmem:[#allocation2 + $0x190] sm:$0xff] }
 0x12d   : > { %969 = vst [vmem:[%s11845_s15 + $0x180] sm:$0xff] %v841_v0  ;;  %970 = vst [vmem:[%s11845_s15 + $0x188] sm:$0xff] %v842_v1  ;;  %v844_v3 = vld [vmem:[#allocation2 + $0x198] sm:$0xff]  ;;  %v845_v4 = vld [vmem:[#allocation2 + $0x1a0] sm:$0xff] }
 0x12e   : > { %971 = vst [vmem:[%s11845_s15 + $0x190] sm:$0xff] %v843_v2  ;;  %v846_v5 = vld [vmem:[#allocation2 + $0x1a8] sm:$0xff]  ;;  %972 = vst [vmem:[%s11845_s15 + $0x198] sm:$0xff] %v844_v3  ;;  %v847_v6 = vld [vmem:[#allocation2 + $0x1b0] sm:$0xff] }
 0x12f   : > { %973 = vst [vmem:[%s11845_s15 + $0x1a0] sm:$0xff] %v845_v4  ;;  %974 = vst [vmem:[%s11845_s15 + $0x1a8] sm:$0xff] %v846_v5  ;;  %v848_v7 = vld [vmem:[#allocation2 + $0x1b8] sm:$0xff]  ;;  %v849_v8 = vld [vmem:[#allocation2 + $0x1c0] sm:$0xff] }
 0x130   : > { %975 = vst [vmem:[%s11845_s15 + $0x1b0] sm:$0xff] %v847_v6  ;;  %976 = vst [vmem:[%s11845_s15 + $0x1b8] sm:$0xff] %v848_v7  ;;  %v850_v9 = vld [vmem:[#allocation2 + $0x1c8] sm:$0xff]  ;;  %v851_v10 = vld [vmem:[#allocation2 + $0x1d0] sm:$0xff] }
 0x131   : > { %977 = vst [vmem:[%s11845_s15 + $0x1c0] sm:$0xff] %v849_v8  ;;  %v852_v11 = vld [vmem:[#allocation2 + $0x1d8] sm:$0xff]  ;;  %978 = vst [vmem:[%s11845_s15 + $0x1c8] sm:$0xff] %v850_v9  ;;  %v853_v12 = vld [vmem:[#allocation2 + $0x1e0] sm:$0xff] }
 0x132   : > { %979 = vst [vmem:[%s11845_s15 + $0x1d0] sm:$0xff] %v851_v10  ;;  %980 = vst [vmem:[%s11845_s15 + $0x1d8] sm:$0xff] %v852_v11  ;;  %v854_v13 = vld [vmem:[#allocation2 + $0x1e8] sm:$0xff]  ;;  %v855_v14 = vld [vmem:[#allocation2 + $0x1f0] sm:$0xff] }
 0x133   : > { %981 = vst [vmem:[%s11845_s15 + $0x1e0] sm:$0xff] %v853_v12  ;;  %982 = vst [vmem:[%s11845_s15 + $0x1e8] sm:$0xff] %v854_v13  ;;  %v856_v15 = vld [vmem:[#allocation2 + $0x1f8] sm:$0xff]  ;;  %v857_v16 = vld [vmem:[#allocation2 + $0x200] sm:$0xff] }
 0x134   : > { %983 = vst [vmem:[%s11845_s15 + $0x1f0] sm:$0xff] %v855_v14  ;;  %v858_v17 = vld [vmem:[#allocation2 + $0x208] sm:$0xff]  ;;  %984 = vst [vmem:[%s11845_s15 + $0x1f8] sm:$0xff] %v856_v15  ;;  %v859_v18 = vld [vmem:[#allocation2 + $0x210] sm:$0xff] }
 0x135   : > { %985 = vst [vmem:[%s11845_s15 + $0x200] sm:$0xff] %v857_v16  ;;  %986 = vst [vmem:[%s11845_s15 + $0x208] sm:$0xff] %v858_v17  ;;  %v860_v19 = vld [vmem:[#allocation2 + $0x218] sm:$0xff]  ;;  %v861_v20 = vld [vmem:[#allocation2 + $0x220] sm:$0xff] }
 0x136   : > { %987 = vst [vmem:[%s11845_s15 + $0x210] sm:$0xff] %v859_v18  ;;  %988 = vst [vmem:[%s11845_s15 + $0x218] sm:$0xff] %v860_v19  ;;  %v862_v21 = vld [vmem:[#allocation2 + $0x228] sm:$0xff]  ;;  %v863_v22 = vld [vmem:[#allocation2 + $0x230] sm:$0xff] }
 0x137   : > { %989 = vst [vmem:[%s11845_s15 + $0x220] sm:$0xff] %v861_v20  ;;  %v864_v23 = vld [vmem:[#allocation2 + $0x238] sm:$0xff]  ;;  %990 = vst [vmem:[%s11845_s15 + $0x228] sm:$0xff] %v862_v21  ;;  %v865_v24 = vld [vmem:[#allocation2 + $0x240] sm:$0xff] }
 0x138   : > { %991 = vst [vmem:[%s11845_s15 + $0x230] sm:$0xff] %v863_v22  ;;  %992 = vst [vmem:[%s11845_s15 + $0x238] sm:$0xff] %v864_v23  ;;  %v866_v25 = vld [vmem:[#allocation2 + $0x248] sm:$0xff]  ;;  %v867_v26 = vld [vmem:[#allocation2 + $0x250] sm:$0xff] }
 0x139   : > { %993 = vst [vmem:[%s11845_s15 + $0x240] sm:$0xff] %v865_v24  ;;  %994 = vst [vmem:[%s11845_s15 + $0x248] sm:$0xff] %v866_v25  ;;  %v868_v27 = vld [vmem:[#allocation2 + $0x258] sm:$0xff]  ;;  %v869_v28 = vld [vmem:[#allocation2 + $0x260] sm:$0xff] }
 0x13a   : > { %995 = vst [vmem:[%s11845_s15 + $0x250] sm:$0xff] %v867_v26  ;;  %v870_v29 = vld [vmem:[#allocation2 + $0x268] sm:$0xff]  ;;  %996 = vst [vmem:[%s11845_s15 + $0x258] sm:$0xff] %v868_v27  ;;  %v871_v30 = vld [vmem:[#allocation2 + $0x270] sm:$0xff] }
 0x13b   : > { %997 = vst [vmem:[%s11845_s15 + $0x260] sm:$0xff] %v869_v28  ;;  %998 = vst [vmem:[%s11845_s15 + $0x268] sm:$0xff] %v870_v29  ;;  %v872_v31 = vld [vmem:[#allocation2 + $0x278] sm:$0xff]  ;;  %v873_v32 = vld [vmem:[#allocation2 + $0x280] sm:$0xff] }
 0x13c   : > { %999 = vst [vmem:[%s11845_s15 + $0x270] sm:$0xff] %v871_v30  ;;  %1000 = vst [vmem:[%s11845_s15 + $0x278] sm:$0xff] %v872_v31  ;;  %v874_v33 = vld [vmem:[#allocation2 + $0x288] sm:$0xff]  ;;  %v875_v34 = vld [vmem:[#allocation2 + $0x290] sm:$0xff] }
 0x13d   : > { %1001 = vst [vmem:[%s11845_s15 + $0x280] sm:$0xff] %v873_v32  ;;  %v876_v35 = vld [vmem:[#allocation2 + $0x298] sm:$0xff]  ;;  %1002 = vst [vmem:[%s11845_s15 + $0x288] sm:$0xff] %v874_v33  ;;  %v877_v36 = vld [vmem:[#allocation2 + $0x2a0] sm:$0xff] }
 0x13e   : > { %1003 = vst [vmem:[%s11845_s15 + $0x290] sm:$0xff] %v875_v34  ;;  %1004 = vst [vmem:[%s11845_s15 + $0x298] sm:$0xff] %v876_v35  ;;  %v878_v37 = vld [vmem:[#allocation2 + $0x2a8] sm:$0xff]  ;;  %v879_v38 = vld [vmem:[#allocation2 + $0x2b0] sm:$0xff] }
 0x13f   : > { %1005 = vst [vmem:[%s11845_s15 + $0x2a0] sm:$0xff] %v877_v36  ;;  %1006 = vst [vmem:[%s11845_s15 + $0x2a8] sm:$0xff] %v878_v37  ;;  %v880_v39 = vld [vmem:[#allocation2 + $0x2b8] sm:$0xff]  ;;  %v881_v40 = vld [vmem:[#allocation2 + $0x2c0] sm:$0xff] }
 0x140   : > { %1007 = vst [vmem:[%s11845_s15 + $0x2b0] sm:$0xff] %v879_v38  ;;  %v882_v41 = vld [vmem:[#allocation2 + $0x2c8] sm:$0xff]  ;;  %1008 = vst [vmem:[%s11845_s15 + $0x2b8] sm:$0xff] %v880_v39  ;;  %v883_v42 = vld [vmem:[#allocation2 + $0x2d0] sm:$0xff] }
 0x141   : > { %1009 = vst [vmem:[%s11845_s15 + $0x2c0] sm:$0xff] %v881_v40  ;;  %1010 = vst [vmem:[%s11845_s15 + $0x2c8] sm:$0xff] %v882_v41  ;;  %v884_v43 = vld [vmem:[#allocation2 + $0x2d8] sm:$0xff]  ;;  %v885_v44 = vld [vmem:[#allocation2 + $0x2e0] sm:$0xff] }
 0x142   : > { %1011 = vst [vmem:[%s11845_s15 + $0x2d0] sm:$0xff] %v883_v42  ;;  %1012 = vst [vmem:[%s11845_s15 + $0x2d8] sm:$0xff] %v884_v43  ;;  %v886_v45 = vld [vmem:[#allocation2 + $0x2e8] sm:$0xff]  ;;  %v887_v46 = vld [vmem:[#allocation2 + $0x2f0] sm:$0xff] }
 0x143   : > { %1013 = vst [vmem:[%s11845_s15 + $0x2e0] sm:$0xff] %v885_v44  ;;  %v888_v47 = vld [vmem:[#allocation2 + $0x2f8] sm:$0xff]  ;;  %1014 = vst [vmem:[%s11845_s15 + $0x2e8] sm:$0xff] %v886_v45  ;;  %v889_v48 = vld [vmem:[#allocation2 + $0x300] sm:$0xff] }
 0x144   : > { %1015 = vst [vmem:[%s11845_s15 + $0x2f0] sm:$0xff] %v887_v46  ;;  %1016 = vst [vmem:[%s11845_s15 + $0x2f8] sm:$0xff] %v888_v47  ;;  %v890_v49 = vld [vmem:[#allocation2 + $0x308] sm:$0xff]  ;;  %v891_v50 = vld [vmem:[#allocation2 + $0x310] sm:$0xff] }
 0x145   : > { %1017 = vst [vmem:[%s11845_s15 + $0x300] sm:$0xff] %v889_v48  ;;  %1018 = vst [vmem:[%s11845_s15 + $0x308] sm:$0xff] %v890_v49  ;;  %v892_v51 = vld [vmem:[#allocation2 + $0x318] sm:$0xff]  ;;  %v893_v52 = vld [vmem:[#allocation2 + $0x320] sm:$0xff] }
 0x146   : > { %1019 = vst [vmem:[%s11845_s15 + $0x310] sm:$0xff] %v891_v50  ;;  %v894_v53 = vld [vmem:[#allocation2 + $0x328] sm:$0xff]  ;;  %1020 = vst [vmem:[%s11845_s15 + $0x318] sm:$0xff] %v892_v51  ;;  %v895_v54 = vld [vmem:[#allocation2 + $0x330] sm:$0xff] }
 0x147   : > { %1021 = vst [vmem:[%s11845_s15 + $0x320] sm:$0xff] %v893_v52  ;;  %1022 = vst [vmem:[%s11845_s15 + $0x328] sm:$0xff] %v894_v53  ;;  %v896_v55 = vld [vmem:[#allocation2 + $0x338] sm:$0xff]  ;;  %v897_v56 = vld [vmem:[#allocation2 + $0x340] sm:$0xff] }
 0x148   : > { %1023 = vst [vmem:[%s11845_s15 + $0x330] sm:$0xff] %v895_v54  ;;  %1024 = vst [vmem:[%s11845_s15 + $0x338] sm:$0xff] %v896_v55  ;;  %v898_v57 = vld [vmem:[#allocation2 + $0x348] sm:$0xff]  ;;  %v899_v58 = vld [vmem:[#allocation2 + $0x350] sm:$0xff] }
 0x149   : > { %1025 = vst [vmem:[%s11845_s15 + $0x340] sm:$0xff] %v897_v56  ;;  %v900_v59 = vld [vmem:[#allocation2 + $0x358] sm:$0xff]  ;;  %1026 = vst [vmem:[%s11845_s15 + $0x348] sm:$0xff] %v898_v57  ;;  %v901_v60 = vld [vmem:[#allocation2 + $0x360] sm:$0xff] }
 0x14a   : > { %1027 = vst [vmem:[%s11845_s15 + $0x350] sm:$0xff] %v899_v58  ;;  %1028 = vst [vmem:[%s11845_s15 + $0x358] sm:$0xff] %v900_v59  ;;  %v902_v61 = vld [vmem:[#allocation2 + $0x368] sm:$0xff]  ;;  %v903_v62 = vld [vmem:[#allocation2 + $0x370] sm:$0xff] }
 0x14b   : > { %1029 = vst [vmem:[%s11845_s15 + $0x360] sm:$0xff] %v901_v60  ;;  %1030 = vst [vmem:[%s11845_s15 + $0x368] sm:$0xff] %v902_v61  ;;  %v904_v63 = vld [vmem:[#allocation2 + $0x378] sm:$0xff]  ;;  %v905_v0 = vld [vmem:[#allocation2 + $0x380] sm:$0xff] }
 0x14c   : > { %1031 = vst [vmem:[%s11845_s15 + $0x370] sm:$0xff] %v903_v62  ;;  %v906_v1 = vld [vmem:[#allocation2 + $0x388] sm:$0xff]  ;;  %1032 = vst [vmem:[%s11845_s15 + $0x378] sm:$0xff] %v904_v63  ;;  %v907_v2 = vld [vmem:[#allocation2 + $0x390] sm:$0xff] }
 0x14d   : > { %1033 = vst [vmem:[%s11845_s15 + $0x380] sm:$0xff] %v905_v0  ;;  %1034 = vst [vmem:[%s11845_s15 + $0x388] sm:$0xff] %v906_v1  ;;  %v908_v3 = vld [vmem:[#allocation2 + $0x398] sm:$0xff]  ;;  %v909_v4 = vld [vmem:[#allocation2 + $0x3a0] sm:$0xff] }
 0x14e   : > { %1035 = vst [vmem:[%s11845_s15 + $0x390] sm:$0xff] %v907_v2  ;;  %1036 = vst [vmem:[%s11845_s15 + $0x398] sm:$0xff] %v908_v3  ;;  %v910_v5 = vld [vmem:[#allocation2 + $0x3a8] sm:$0xff]  ;;  %v911_v6 = vld [vmem:[#allocation2 + $0x3b0] sm:$0xff] }
 0x14f   : > { %1037 = vst [vmem:[%s11845_s15 + $0x3a0] sm:$0xff] %v909_v4  ;;  %v912_v7 = vld [vmem:[#allocation2 + $0x3b8] sm:$0xff]  ;;  %1038 = vst [vmem:[%s11845_s15 + $0x3a8] sm:$0xff] %v910_v5  ;;  %v913_v8 = vld [vmem:[#allocation2 + $0x3c0] sm:$0xff] }
 0x150   : > { %1039 = vst [vmem:[%s11845_s15 + $0x3b0] sm:$0xff] %v911_v6  ;;  %1040 = vst [vmem:[%s11845_s15 + $0x3b8] sm:$0xff] %v912_v7  ;;  %v914_v9 = vld [vmem:[#allocation2 + $0x3c8] sm:$0xff]  ;;  %v915_v10 = vld [vmem:[#allocation2 + $0x3d0] sm:$0xff] }
 0x151   : > { %1041 = vst [vmem:[%s11845_s15 + $0x3c0] sm:$0xff] %v913_v8  ;;  %1042 = vst [vmem:[%s11845_s15 + $0x3c8] sm:$0xff] %v914_v9  ;;  %v916_v11 = vld [vmem:[#allocation2 + $0x3d8] sm:$0xff]  ;;  %v917_v12 = vld [vmem:[#allocation2 + $0x3e0] sm:$0xff] }
 0x152   : > { %1043 = vst [vmem:[%s11845_s15 + $0x3d0] sm:$0xff] %v915_v10  ;;  %v918_v13 = vld [vmem:[#allocation2 + $0x3e8] sm:$0xff]  ;;  %1044 = vst [vmem:[%s11845_s15 + $0x3d8] sm:$0xff] %v916_v11  ;;  %v919_v14 = vld [vmem:[#allocation2 + $0x3f0] sm:$0xff] }
 0x153   : > { %1045 = vst [vmem:[%s11845_s15 + $0x3e0] sm:$0xff] %v917_v12  ;;  %1046 = vst [vmem:[%s11845_s15 + $0x3e8] sm:$0xff] %v918_v13  ;;  %v920_v15 = vld [vmem:[#allocation2 + $0x3f8] sm:$0xff] }
 0x154   : > { %1047 = vst [vmem:[%s11845_s15 + $0x3f0] sm:$0xff] %v919_v14  ;;  %1048 = vst [vmem:[%s11845_s15 + $0x3f8] sm:$0xff] %v920_v15 }
 0x155 PF: > { %s13767_s12 = sld [smem:[#allocation35_spill]] }
 0x15b   : > { %p1049_p6 = scmp.ge.s32.totalorder %s13767_s12, 1  ;;  %p1050_p1 = scmp.lt.s32.totalorder %s13767_s12, 3 }
 0x15d   : > { %p1051_p5 = pnand %p1050_p1, %p1049_p6 }
 0x15e   : > { %v1119_v16 = vld [vmem:[#allocation9] sm:$0xff] (!%p1051_p5)  ;;  %v1120_v17 = vld [vmem:[#allocation9 + $0x8] sm:$0xff] (!%p1051_p5)  ;;  %v1121_v18 = vld [vmem:[#allocation9 + $0x10] sm:$0xff] (!%p1051_p5)  ;;  %vm1135_vm0 = vcmask (!%p1051_p5), 523264   ;;  %s13768_s10 = sld [smem:[#allocation50_spill]] (!%p1051_p5)  ;;  %vm1713_vm1 = vcmask (!%p1051_p5), 261120  }
 0x15f   : > { %1054 = sbr.rel (%p1051_p5) target bundleno = 998 (0x3e6), region = 130  ;;  %v10697_v19 = vpack.c.bf16 (!%p1051_p5), %v1120_v17, %v1119_v16  ;;  %v1122_v20 = vld [vmem:[#allocation9 + $0x18] sm:$0xff] (!%p1051_p5)  ;;  %v1123_v22 = vld [vmem:[#allocation9 + $0x20] sm:$0xff] (!%p1051_p5)  ;;  %v1124_v23 = vld [vmem:[#allocation9 + $0x28] sm:$0xff] (!%p1051_p5) }
 0x160   : > { %v10701_v21 = vpack.c.bf16 (!%p1051_p5), %v1122_v20, %v1121_v18  ;;  %v1055_v24 = vld [vmem:[%s11816_s29] sm:$0xff] (!%p1051_p5)  ;;  %v10705_v25 = vpack.c.bf16 (!%p1051_p5), %v1124_v23, %v1123_v22  ;;  %v1125_v26 = vld [vmem:[#allocation9 + $0x30] sm:$0xff] (!%p1051_p5)  ;;  %v1126_v27 = vld [vmem:[#allocation9 + $0x38] sm:$0xff] (!%p1051_p5) }
 0x161   : > { %10698 = vmatprep.subr.bf16.mxu0 (!%p1051_p5), %v10697_v19  ;;  %9717 = vmatprep.mubr.msk.f32.mxu0 (!%p1051_p5), %vm1135_vm0, %v1055_v24  ;;  %v10709_v28 = vpack.c.bf16 (!%p1051_p5), %v1126_v27, %v1125_v26  ;;  %v1056_v29 = vld [vmem:[%s11816_s29 + $0x8] sm:$0xff] (!%p1051_p5)  ;;  %v1057_v30 = vld [vmem:[%s11816_s29 + $0x10] sm:$0xff] (!%p1051_p5)  ;;  %v1058_v31 = vld [vmem:[%s11816_s29 + $0x18] sm:$0xff] (!%p1051_p5) }
 0x162   : > { %10700 = vmatpush3.bf16.msra.mxu0 (!%p1051_p5), %v10697_v19  ;;  %v1059_v32 = vld [vmem:[%s11816_s29 + $0x20] sm:$0xff] (!%p1051_p5)  ;;  %v1060_v33 = vld [vmem:[%s11816_s29 + $0x28] sm:$0xff] (!%p1051_p5)  ;;  %v1061_v34 = vld [vmem:[%s11816_s29 + $0x30] sm:$0xff] (!%p1051_p5) }
 0x163   : > { %10702 = vmatprep.subr.bf16.mxu0 (!%p1051_p5), %v10701_v21  ;;  %v1062_v35 = vld [vmem:[%s11816_s29 + $0x38] sm:$0xff] (!%p1051_p5)  ;;  %v1063_v36 = vld [vmem:[%s11816_s29 + $0x40] sm:$0xff] (!%p1051_p5)  ;;  %v1064_v37 = vld [vmem:[%s11816_s29 + $0x48] sm:$0xff] (!%p1051_p5) }
 0x164   : > { %v1065_v38 = vld [vmem:[%s11816_s29 + $0x50] sm:$0xff] (!%p1051_p5)  ;;  %v1066_v39 = vld [vmem:[%s11816_s29 + $0x58] sm:$0xff] (!%p1051_p5)  ;;  %v1067_v40 = vld [vmem:[%s11816_s29 + $0x60] sm:$0xff] (!%p1051_p5) }
 0x165   : > { %v1068_v41 = vld [vmem:[%s11816_s29 + $0x68] sm:$0xff] (!%p1051_p5)  ;;  %v1069_v42 = vld [vmem:[%s11816_s29 + $0x70] sm:$0xff] (!%p1051_p5)  ;;  %v1070_v43 = vld [vmem:[%s11816_s29 + $0x78] sm:$0xff] (!%p1051_p5) }
 0x166   : > { %10704 = vmatpush3.bf16.msra.mxu0 %v10701_v21  ;;  %v1071_v44 = vld [vmem:[%s11816_s29 + $0x80] sm:$0xff]  ;;  %v1072_v45 = vld [vmem:[%s11816_s29 + $0x88] sm:$0xff]  ;;  %v1073_v46 = vld [vmem:[%s11816_s29 + $0x90] sm:$0xff] }
 0x167   : > { %10706 = vmatprep.subr.bf16.mxu0 %v10705_v25  ;;  %v1074_v47 = vld [vmem:[%s11816_s29 + $0x98] sm:$0xff]  ;;  %v1075_v48 = vld [vmem:[%s11816_s29 + $0xa0] sm:$0xff]  ;;  %v1076_v49 = vld [vmem:[%s11816_s29 + $0xa8] sm:$0xff] }
 0x168   : > { %v1077_v50 = vld [vmem:[%s11816_s29 + $0xb0] sm:$0xff]  ;;  %v1078_v51 = vld [vmem:[%s11816_s29 + $0xb8] sm:$0xff]  ;;  %v1079_v52 = vld [vmem:[%s11816_s29 + $0xc0] sm:$0xff] }
 0x169   : > { %v1080_v53 = vld [vmem:[%s11816_s29 + $0xc8] sm:$0xff]  ;;  %v1081_v54 = vld [vmem:[%s11816_s29 + $0xd0] sm:$0xff]  ;;  %v1082_v55 = vld [vmem:[%s11816_s29 + $0xd8] sm:$0xff] }
 0x16a   : > { %10708 = vmatpush3.bf16.msra.mxu0 %v10705_v25  ;;  %v1083_v56 = vld [vmem:[%s11816_s29 + $0xe0] sm:$0xff]  ;;  %v1084_v57 = vld [vmem:[%s11816_s29 + $0xe8] sm:$0xff]  ;;  %v1085_v58 = vld [vmem:[%s11816_s29 + $0xf0] sm:$0xff] }
 0x16b   : > { %10710 = vmatprep.subr.bf16.mxu0 %v10709_v28  ;;  %v1086_v59 = vld [vmem:[%s11816_s29 + $0xf8] sm:$0xff]  ;;  %v1087_v60 = vld [vmem:[%s11816_s29 + $0x100] sm:$0xff]  ;;  %v1088_v61 = vld [vmem:[%s11816_s29 + $0x108] sm:$0xff] }
 0x16c   : > { %v1089_v62 = vld [vmem:[%s11816_s29 + $0x110] sm:$0xff]  ;;  %v1090_v63 = vld [vmem:[%s11816_s29 + $0x118] sm:$0xff]  ;;  %v1091_v0 = vld [vmem:[%s11816_s29 + $0x120] sm:$0xff] }
 0x16d   : > { %v1092_v1 = vld [vmem:[%s11816_s29 + $0x128] sm:$0xff]  ;;  %v1093_v2 = vld [vmem:[%s11816_s29 + $0x130] sm:$0xff]  ;;  %v1094_v3 = vld [vmem:[%s11816_s29 + $0x138] sm:$0xff] }
 0x16e   : > { %10712 = vmatpush3.bf16.msra.mxu0 %v10709_v28  ;;  %v1095_v4 = vld [vmem:[%s11816_s29 + $0x140] sm:$0xff]  ;;  %v1096_v5 = vld [vmem:[%s11816_s29 + $0x148] sm:$0xff]  ;;  %v1097_v6 = vld [vmem:[%s11816_s29 + $0x150] sm:$0xff] }
 0x16f   : > { %v1098_v7 = vld [vmem:[%s11816_s29 + $0x158] sm:$0xff]  ;;  %v1099_v8 = vld [vmem:[%s11816_s29 + $0x160] sm:$0xff]  ;;  %v1100_v9 = vld [vmem:[%s11816_s29 + $0x168] sm:$0xff] }
 0x170   : > { %v1101_v10 = vld [vmem:[%s11816_s29 + $0x170] sm:$0xff]  ;;  %v1102_v11 = vld [vmem:[%s11816_s29 + $0x178] sm:$0xff]  ;;  %v1103_v12 = vld [vmem:[%s11816_s29 + $0x180] sm:$0xff] }
 0x171   : > { %9718 = vmatmul.mubr.msk.f32.vlgmr.msra.gmra.mrb[0].mxu0 %vm1135_vm0, %v1056_v29  ;;  %v1104_v13 = vld [vmem:[%s11816_s29 + $0x188] sm:$0xff]  ;;  %v12079_v14 = vld [vmem:[%s13768_s10] sm:$0xff]  ;;  %v1105_v15 = vld [vmem:[%s11816_s29 + $0x190] sm:$0xff] }
 0x172   : > { %9720 = vmatprep.mubr.msk.f32.mxu0 %vm1135_vm0, %v1057_v30  ;;  %9821 = vmatprep.mubr.msk.f32.mxu1 %vm1713_vm1, %v12079_v14  ;;  %v1106_v16 = vld [vmem:[%s11816_s29 + $0x198] sm:$0xff]  ;;  %v1107_v17 = vld [vmem:[%s11816_s29 + $0x1a0] sm:$0xff]  ;;  %v1108_v18 = vld [vmem:[%s11816_s29 + $0x1a8] sm:$0xff] }
 0x173   : > { %v1109_v19 = vld [vmem:[%s11816_s29 + $0x1b0] sm:$0xff]  ;;  %v1110_v20 = vld [vmem:[%s11816_s29 + $0x1b8] sm:$0xff]  ;;  %v1111_v21 = vld [vmem:[%s11816_s29 + $0x1c0] sm:$0xff] }
 0x174   : > { %v1112_v22 = vld [vmem:[%s11816_s29 + $0x1c8] sm:$0xff]  ;;  %v1113_v23 = vld [vmem:[%s11816_s29 + $0x1d0] sm:$0xff]  ;;  %v1114_v24 = vld [vmem:[%s11816_s29 + $0x1d8] sm:$0xff] }
 0x175   : > { %9721 = vmatmul.mubr.msk.f32.gmra.mrb[2].mxu0 %vm1135_vm0, %v1058_v31  ;;  %v1115_v25 = vld [vmem:[%s11816_s29 + $0x1e0] sm:$0xff]  ;;  %v1116_v26 = vld [vmem:[%s11816_s29 + $0x1e8] sm:$0xff]  ;;  %v1117_v27 = vld [vmem:[%s11816_s29 + $0x1f0] sm:$0xff] }
 0x176   : > { %9723 = vmatprep.mubr.msk.f32.mxu0 %vm1135_vm0, %v1059_v32  ;;  %v1118_v28 = vld [vmem:[%s11816_s29 + $0x1f8] sm:$0xff] }
 0x179   : > { %9724 = vmatmul.mubr.msk.f32.gmra.mrb[4].mxu0 %vm1135_vm0, %v1060_v33 }
 0x17a   : > { %9726 = vmatprep.mubr.msk.f32.mxu0 %vm1135_vm0, %v1061_v34 }
 0x17d   : > { %9727 = vmatmul.mubr.msk.f32.gmra.mrb[6].mxu0 %vm1135_vm0, %v1062_v35 }
 0x17e   : > { %9729 = vmatprep.mubr.msk.f32.mxu0 %vm1135_vm0, %v1063_v36 }
 0x181   : > { %9730 = vmatmul.mubr.msk.f32.gmra.mrb[8].mxu0 %vm1135_vm0, %v1064_v37  ;;  %v12117_v37 = vld [vmem:[%s13768_s10 + $0x8] sm:$0xff] }
 0x182   : > { %9732 = vmatprep.mubr.msk.f32.mxu0 %vm1135_vm0, %v1065_v38 }
 0x185   : > { %9733 = vmatmul.mubr.msk.f32.gmra.mrb[10].mxu0 %vm1135_vm0, %v1066_v39  ;;  %v12122_v39 = vld [vmem:[%s13768_s10 + $0x10] sm:$0xff] }
 0x186   : > { %9735 = vmatprep.mubr.msk.f32.mxu0 %vm1135_vm0, %v1067_v40 }
 0x189   : > { %9736 = vmatmul.mubr.msk.f32.gmra.mrb[12].mxu0 %vm1135_vm0, %v1068_v41 }
 0x18a   : > { %9738 = vmatprep.mubr.msk.f32.mxu0 %vm1135_vm0, %v1069_v42  ;;  %v12131_v42 = vld [vmem:[%s13768_s10 + $0x18] sm:$0xff] }
 0x18d   : > { %9739 = vmatmul.mubr.msk.f32.gmra.mrb[14].mxu0 %vm1135_vm0, %v1070_v43 }
 0x18e   : > { %9741 = vmatprep.mubr.msk.f32.mxu0 %vm1135_vm0, %v1071_v44  ;;  %v12136_v44 = vld [vmem:[%s13768_s10 + $0x20] sm:$0xff] }
 0x191   : > { %9742 = vmatmul.mubr.msk.f32.gmra.mrb[16].mxu0 %vm1135_vm0, %v1072_v45 }
 0x192   : > { %9744 = vmatprep.mubr.msk.f32.mxu0 %vm1135_vm0, %v1073_v46 }
 0x195   : > { %9745 = vmatmul.mubr.msk.f32.gmra.mrb[18].mxu0 %vm1135_vm0, %v1074_v47  ;;  %v12145_v47 = vld [vmem:[%s13768_s10 + $0x28] sm:$0xff] }
 0x196   : > { %9747 = vmatprep.mubr.msk.f32.mxu0 %vm1135_vm0, %v1075_v48 }
 0x199   : > { %9748 = vmatmul.mubr.msk.f32.gmra.mrb[20].mxu0 %vm1135_vm0, %v1076_v49  ;;  %v12150_v49 = vld [vmem:[%s13768_s10 + $0x30] sm:$0xff] }
 0x19a   : > { %9750 = vmatprep.mubr.msk.f32.mxu0 %vm1135_vm0, %v1077_v50 }
 0x19d   : > { %9751 = vmatmul.mubr.msk.f32.gmra.mrb[22].mxu0 %vm1135_vm0, %v1078_v51 }
 0x19e   : > { %9753 = vmatprep.mubr.msk.f32.mxu0 %vm1135_vm0, %v1079_v52  ;;  %v12159_v52 = vld [vmem:[%s13768_s10 + $0x38] sm:$0xff] }
 0x1a1   : > { %9754 = vmatmul.mubr.msk.f32.gmra.mrb[24].mxu0 %vm1135_vm0, %v1080_v53 }
 0x1a2   : > { %9756 = vmatprep.mubr.msk.f32.mxu0 %vm1135_vm0, %v1081_v54 }
 0x1a5   : > { %9757 = vmatmul.mubr.msk.f32.gmra.mrb[26].mxu0 %vm1135_vm0, %v1082_v55 }
 0x1a6   : > { %9759 = vmatprep.mubr.msk.f32.mxu0 %vm1135_vm0, %v1083_v56 }
 0x1a9   : > { %9760 = vmatmul.mubr.msk.f32.gmra.mrb[28].mxu0 %vm1135_vm0, %v1084_v57 }
 0x1aa   : > { %9762 = vmatprep.mubr.msk.f32.mxu0 %vm1135_vm0, %v1085_v58 }
 0x1ad   : > { %9763 = vmatmul.mubr.msk.f32.gmra.mrb[30].mxu0 %vm1135_vm0, %v1086_v59 }
 0x1ae   : > { %9765 = vmatprep.mubr.msk.f32.mxu0 %vm1135_vm0, %v1087_v60 }
 0x1b1   : > { %9766 = vmatmul.mubr.msk.f32.gmra.mrb[32].mxu0 %vm1135_vm0, %v1088_v61 }
 0x1b2   : > { %9768 = vmatprep.mubr.msk.f32.mxu0 %vm1135_vm0, %v1089_v62 }
 0x1b5   : > { %9769 = vmatmul.mubr.msk.f32.gmra.mrb[34].mxu0 %vm1135_vm0, %v1090_v63 }
 0x1b6   : > { %9771 = vmatprep.mubr.msk.f32.mxu0 %vm1135_vm0, %v1091_v0 }
 0x1b9   : > { %9772 = vmatmul.mubr.msk.f32.gmra.mrb[36].mxu0 %vm1135_vm0, %v1092_v1 }
 0x1ba   : > { %9774 = vmatprep.mubr.msk.f32.mxu0 %vm1135_vm0, %v1093_v2 }
 0x1bd   : > { %9775 = vmatmul.mubr.msk.f32.gmra.mrb[38].mxu0 %vm1135_vm0, %v1094_v3 }
 0x1be   : > { %9777 = vmatprep.mubr.msk.f32.mxu0 %vm1135_vm0, %v1095_v4 }
 0x1c1   : > { %9778 = vmatmul.mubr.msk.f32.gmra.mrb[40].mxu0 %vm1135_vm0, %v1096_v5 }
 0x1c2   : > { %9780 = vmatprep.mubr.msk.f32.mxu0 %vm1135_vm0, %v1097_v6 }
 0x1c5   : > { %9781 = vmatmul.mubr.msk.f32.gmra.mrb[42].mxu0 %vm1135_vm0, %v1098_v7 }
 0x1c6   : > { %9783 = vmatprep.mubr.msk.f32.mxu0 %vm1135_vm0, %v1099_v8 }
 0x1c9   : > { %9784 = vmatmul.mubr.msk.f32.gmra.mrb[44].mxu0 %vm1135_vm0, %v1100_v9 }
 0x1ca   : > { %9786 = vmatprep.mubr.msk.f32.mxu0 %vm1135_vm0, %v1101_v10 }
 0x1cd   : > { %9787 = vmatmul.mubr.msk.f32.gmra.mrb[46].mxu0 %vm1135_vm0, %v1102_v11 }
 0x1ce   : > { %9789 = vmatprep.mubr.msk.f32.mxu0 %vm1135_vm0, %v1103_v12 }
 0x1d1   : > { %9790 = vmatmul.mubr.msk.f32.gmra.mrb[48].mxu0 %vm1135_vm0, %v1104_v13 }
 0x1d2   : > { %9792 = vmatprep.mubr.msk.f32.mxu0 %vm1135_vm0, %v1105_v15 }
 0x1d5   : > { %9793 = vmatmul.mubr.msk.f32.gmra.mrb[50].mxu0 %vm1135_vm0, %v1106_v16 }
 0x1d6   : > { %9795 = vmatprep.mubr.msk.f32.mxu0 %vm1135_vm0, %v1107_v17 }
 0x1d9   : > { %9796 = vmatmul.mubr.msk.f32.gmra.mrb[52].mxu0 %vm1135_vm0, %v1108_v18 }
 0x1da   : > { %9798 = vmatprep.mubr.msk.f32.mxu0 %vm1135_vm0, %v1109_v19 }
 0x1dd   : > { %9799 = vmatmul.mubr.msk.f32.gmra.mrb[54].mxu0 %vm1135_vm0, %v1110_v20 }
 0x1de   : > { %9801 = vmatprep.mubr.msk.f32.mxu0 %vm1135_vm0, %v1111_v21 }
 0x1e1   : > { %9802 = vmatmul.mubr.msk.f32.gmra.mrb[56].mxu0 %vm1135_vm0, %v1112_v22 }
 0x1e2   : > { %9804 = vmatprep.mubr.msk.f32.mxu0 %vm1135_vm0, %v1113_v23 }
 0x1e5   : > { %9805 = vmatmul.mubr.msk.f32.gmra.mrb[58].mxu0 %vm1135_vm0, %v1114_v24 }
 0x1e6   : > { %9807 = vmatprep.mubr.msk.f32.mxu0 %vm1135_vm0, %v1115_v25 }
 0x1e9   : > { %9808 = vmatmul.mubr.msk.f32.gmra.mrb[60].mxu0 %vm1135_vm0, %v1116_v26 }
 0x1ea   : > { %9810 = vmatprep.mubr.msk.f32.mxu0 %vm1135_vm0, %v1117_v27 }
 0x1ed   : > { %9811 = vmatmul.mubr.msk.f32.gmra.mrb[62].mxu0 %vm1135_vm0, %v1118_v28 }
 0x1ee   : > { %10001 = vmatprep.mubr.msk.f32.mxu0 %vm1713_vm1, %v12079_v14 }
 0x244   : > { %v9719_v29 = vpop.f32.mrb[0].mxu0 }
 0x245   : > { %v1394_v30 = vpop.f32.mrb[1].mxu0 }
 0x246   : > { %v10713_v31 = vpack.c.bf16 %v9719_v29, %v1394_v30 }
 0x248   : > { %v9722_v32 = vpop.f32.mrb[2].mxu0  ;;  %10714 = vmatprep.subr.bf16.mxu1 %v10713_v31 }
 0x249   : > { %v1404_v33 = vpop.f32.mrb[3].mxu0  ;;  %10716 = vmatpush3.bf16.msra.mxu1 %v10713_v31 }
 0x24a   : > { %v10717_v34 = vpack.c.bf16 %v9722_v32, %v1404_v33 }
 0x24c   : > { %v9725_v35 = vpop.f32.mrb[4].mxu0  ;;  %10718 = vmatprep.subr.bf16.mxu1 %v10717_v34 }
 0x24d   : > { %v1414_v36 = vpop.f32.mrb[5].mxu0  ;;  %10720 = vmatpush3.bf16.msra.mxu1 %v10717_v34 }
 0x24e   : > { %v10721_v38 = vpack.c.bf16 %v9725_v35, %v1414_v36 }
 0x250   : > { %v9728_v40 = vpop.f32.mrb[6].mxu0  ;;  %9822 = vmatmul.mubr.msk.f32.vlgmr.msra.gmra.mrb[0].mxu1 %vm1713_vm1, %v12117_v37  ;;  %10722 = vmatprep.subr.bf16.mxu1 %v10721_v38 }
 0x251   : > { %v1424_v41 = vpop.f32.mrb[7].mxu0  ;;  %10724 = vmatpush3.bf16.msra.mxu1 %v10721_v38  ;;  %9824 = vmatprep.mubr.msk.f32.mxu1 %vm1713_vm1, %v12122_v39 }
 0x252   : > { %v10725_v43 = vpack.c.bf16 %v9728_v40, %v1424_v41 }
 0x254   : > { %v9731_v45 = vpop.f32.mrb[8].mxu0  ;;  %9825 = vmatmul.mubr.msk.f32.gmra.mrb[2].mxu1 %vm1713_vm1, %v12131_v42  ;;  %10726 = vmatprep.subr.bf16.mxu1 %v10725_v43 }
 0x255   : > { %v1434_v46 = vpop.f32.mrb[9].mxu0  ;;  %10728 = vmatpush3.bf16.msra.mxu1 %v10725_v43  ;;  %9827 = vmatprep.mubr.msk.f32.mxu1 %vm1713_vm1, %v12136_v44 }
 0x256   : > { %v10729_v48 = vpack.c.bf16 %v9731_v45, %v1434_v46 }
 0x258   : > { %v9734_v50 = vpop.f32.mrb[10].mxu0  ;;  %9828 = vmatmul.mubr.msk.f32.gmra.mrb[4].mxu1 %vm1713_vm1, %v12145_v47  ;;  %10730 = vmatprep.subr.bf16.mxu1 %v10729_v48 }
 0x259   : > { %v1444_v51 = vpop.f32.mrb[11].mxu0  ;;  %9830 = vmatprep.mubr.msk.f32.mxu1 %vm1713_vm1, %v12150_v49 }
 0x25a   : > { %v10733_v53 = vpack.c.bf16 %v9734_v50, %v1444_v51 }
 0x25c   : > { %v9737_v54 = vpop.f32.mrb[12].mxu0  ;;  %9831 = vmatmul.mubr.msk.f32.gmra.mrb[6].mxu1 %vm1713_vm1, %v12159_v52 }
 0x25d   : > { %v1454_v55 = vpop.f32.mrb[13].mxu0  ;;  %9841 = vmatprep.mubr.msk.f32.mxu1 %vm1713_vm1, %v12079_v14 }
 0x25e   : > { %v10737_v56 = vpack.c.bf16 %v9737_v54, %v1454_v55 }
 0x260   : > { %v9740_v57 = vpop.f32.mrb[14].mxu0  ;;  %9842 = vmatmul.mubr.msk.f32.vlgmr.msra.gmra.mrb[8].mxu1 %vm1713_vm1, %v12117_v37 }
 0x261   : > { %10732 = vmatpush3.bf16.msra.mxu1 %v10729_v48  ;;  %v1464_v58 = vpop.f32.mrb[15].mxu0  ;;  %9844 = vmatprep.mubr.msk.f32.mxu1 %vm1713_vm1, %v12122_v39 }
 0x262   : > { %v10741_v59 = vpack.c.bf16 %v9740_v57, %v1464_v58  ;;  %10734 = vmatprep.subr.bf16.mxu1 %v10733_v53 }
 0x264   : > { %v9743_v60 = vpop.f32.mrb[16].mxu0  ;;  %9845 = vmatmul.mubr.msk.f32.gmra.mrb[10].mxu1 %vm1713_vm1, %v12131_v42 }
 0x265   : > { %10736 = vmatpush3.bf16.msra.mxu1 %v10733_v53  ;;  %v1474_v61 = vpop.f32.mrb[17].mxu0  ;;  %9847 = vmatprep.mubr.msk.f32.mxu1 %vm1713_vm1, %v12136_v44 }
 0x266   : > { %v10745_v62 = vpack.c.bf16 %v9743_v60, %v1474_v61  ;;  %10738 = vmatprep.subr.bf16.mxu1 %v10737_v56 }
 0x268   : > { %v9746_v63 = vpop.f32.mrb[18].mxu0  ;;  %9848 = vmatmul.mubr.msk.f32.gmra.mrb[12].mxu1 %vm1713_vm1, %v12145_v47 }
 0x269   : > { %v1484_v0 = vpop.f32.mrb[19].mxu0  ;;  %9850 = vmatprep.mubr.msk.f32.mxu1 %vm1713_vm1, %v12150_v49 }
 0x26a   : > { %v10749_v1 = vpack.c.bf16 %v9746_v63, %v1484_v0 }
 0x26c   : > { %v9749_v2 = vpop.f32.mrb[20].mxu0  ;;  %9851 = vmatmul.mubr.msk.f32.gmra.mrb[14].mxu1 %vm1713_vm1, %v12159_v52 }
 0x26d   : > { %v1494_v3 = vpop.f32.mrb[21].mxu0  ;;  %9861 = vmatprep.mubr.msk.f32.mxu1 %vm1713_vm1, %v12079_v14 }
 0x26e   : > { %v10753_v4 = vpack.c.bf16 %v9749_v2, %v1494_v3 }
 0x270   : > { %v9752_v5 = vpop.f32.mrb[22].mxu0  ;;  %9862 = vmatmul.mubr.msk.f32.vlgmr.msra.gmra.mrb[16].mxu1 %vm1713_vm1, %v12117_v37 }
 0x271   : > { %10740 = vmatpush3.bf16.msra.mxu1 %v10737_v56  ;;  %v1504_v6 = vpop.f32.mrb[23].mxu0  ;;  %9864 = vmatprep.mubr.msk.f32.mxu1 %vm1713_vm1, %v12122_v39 }
 0x272   : > { %v10757_v7 = vpack.c.bf16 %v9752_v5, %v1504_v6  ;;  %10742 = vmatprep.subr.bf16.mxu1 %v10741_v59 }
 0x274   : > { %v9755_v8 = vpop.f32.mrb[24].mxu0  ;;  %9865 = vmatmul.mubr.msk.f32.gmra.mrb[18].mxu1 %vm1713_vm1, %v12131_v42 }
 0x275   : > { %10744 = vmatpush3.bf16.msra.mxu1 %v10741_v59  ;;  %v1514_v9 = vpop.f32.mrb[25].mxu0  ;;  %9867 = vmatprep.mubr.msk.f32.mxu1 %vm1713_vm1, %v12136_v44 }
 0x276   : > { %v12189_v10 = vpack.c.bf16 %v9755_v8, %v1514_v9  ;;  %10746 = vmatprep.subr.bf16.mxu1 %v10745_v62 }
 0x278   : > { %v9758_v11 = vpop.f32.mrb[26].mxu0  ;;  %9868 = vmatmul.mubr.msk.f32.gmra.mrb[20].mxu1 %vm1713_vm1, %v12145_v47 }
 0x279   : > { %v1524_v12 = vpop.f32.mrb[27].mxu0  ;;  %9870 = vmatprep.mubr.msk.f32.mxu1 %vm1713_vm1, %v12150_v49 }
 0x27a   : > { %v12195_v13 = vpack.c.bf16 %v9758_v11, %v1524_v12 }
 0x27c   : > { %v9761_v15 = vpop.f32.mrb[28].mxu0  ;;  %9871 = vmatmul.mubr.msk.f32.gmra.mrb[22].mxu1 %vm1713_vm1, %v12159_v52 }
 0x27d   : > { %v1534_v16 = vpop.f32.mrb[29].mxu0  ;;  %9881 = vmatprep.mubr.msk.f32.mxu1 %vm1713_vm1, %v12079_v14 }
 0x27e   : > { %v12201_v17 = vpack.c.bf16 %v9761_v15, %v1534_v16 }
 0x280   : > { %v9764_v18 = vpop.f32.mrb[30].mxu0  ;;  %9882 = vmatmul.mubr.msk.f32.vlgmr.msra.gmra.mrb[24].mxu1 %vm1713_vm1, %v12117_v37 }
 0x281   : > { %10748 = vmatpush3.bf16.msra.mxu1 %v10745_v62  ;;  %v1544_v19 = vpop.f32.mrb[31].mxu0  ;;  %9884 = vmatprep.mubr.msk.f32.mxu1 %vm1713_vm1, %v12122_v39 }
 0x282   : > { %v12207_v20 = vpack.c.bf16 %v9764_v18, %v1544_v19  ;;  %10750 = vmatprep.subr.bf16.mxu1 %v10749_v1 }
 0x284   : > { %v9767_v21 = vpop.f32.mrb[32].mxu0  ;;  %9885 = vmatmul.mubr.msk.f32.gmra.mrb[26].mxu1 %vm1713_vm1, %v12131_v42 }
 0x285   : > { %10752 = vmatpush3.bf16.msra.mxu1 %v10749_v1  ;;  %v1554_v22 = vpop.f32.mrb[33].mxu0  ;;  %9887 = vmatprep.mubr.msk.f32.mxu1 %vm1713_vm1, %v12136_v44 }
 0x286   : > { %v12213_v23 = vpack.c.bf16 %v9767_v21, %v1554_v22  ;;  %10754 = vmatprep.subr.bf16.mxu1 %v10753_v4 }
 0x288   : > { %v9770_v24 = vpop.f32.mrb[34].mxu0  ;;  %9888 = vmatmul.mubr.msk.f32.gmra.mrb[28].mxu1 %vm1713_vm1, %v12145_v47 }
 0x289   : > { %v1564_v25 = vpop.f32.mrb[35].mxu0  ;;  %9890 = vmatprep.mubr.msk.f32.mxu1 %vm1713_vm1, %v12150_v49 }
 0x28a   : > { %v12219_v26 = vpack.c.bf16 %v9770_v24, %v1564_v25 }
 0x28c   : > { %v9773_v27 = vpop.f32.mrb[36].mxu0  ;;  %9891 = vmatmul.mubr.msk.f32.gmra.mrb[30].mxu1 %vm1713_vm1, %v12159_v52 }
 0x28d   : > { %v1574_v28 = vpop.f32.mrb[37].mxu0  ;;  %9901 = vmatprep.mubr.msk.f32.mxu1 %vm1713_vm1, %v12079_v14 }
 0x28e   : > { %v10785_v29 = vpack.c.bf16 %v9773_v27, %v1574_v28 }
 0x290   : > { %9902 = vmatmul.mubr.msk.f32.vlgmr.msra.gmra.mrb[32].mxu1 %vm1713_vm1, %v12117_v37  ;;  %10786 = vmatprep.subr.bf16.mxu0 %v10785_v29  ;;  %v9776_v30 = vpop.f32.mrb[38].mxu0 }
 0x291   : > { %10756 = vmatpush3.bf16.msra.mxu1 %v10753_v4  ;;  %10788 = vmatpush3.bf16.msra.mxu0 %v10785_v29  ;;  %v1584_v31 = vpop.f32.mrb[39].mxu0 }
 0x292   : > { %10758 = vmatprep.subr.bf16.mxu1 %v10757_v7  ;;  %9904 = vmatprep.mubr.msk.f32.mxu1 %vm1713_vm1, %v12122_v39  ;;  %v10789_v32 = vpack.c.bf16 %v9776_v30, %v1584_v31 }
 0x294   : > { %9905 = vmatmul.mubr.msk.f32.gmra.mrb[34].mxu1 %vm1713_vm1, %v12131_v42  ;;  %10790 = vmatprep.subr.bf16.mxu0 %v10789_v32  ;;  %v9779_v33 = vpop.f32.mrb[40].mxu0 }
 0x295   : > { %10760 = vmatpush3.bf16.msra.mxu1 %v10757_v7  ;;  %9907 = vmatprep.mubr.msk.f32.mxu1 %vm1713_vm1, %v12136_v44  ;;  %v1594_v34 = vpop.f32.mrb[41].mxu0 }
 0x296   : > { %10762 = vmatprep.subr.bf16.mxu1 %v12189_v10  ;;  %10792 = vmatpush3.bf16.msra.mxu0 %v10789_v32  ;;  %v12234_v35 = vpack.c.bf16 %v9779_v33, %v1594_v34 }
 0x298   : > { %9908 = vmatmul.mubr.msk.f32.gmra.mrb[36].mxu1 %vm1713_vm1, %v12145_v47  ;;  %v9782_v36 = vpop.f32.mrb[42].mxu0 }
 0x299   : > { %9910 = vmatprep.mubr.msk.f32.mxu1 %vm1713_vm1, %v12150_v49  ;;  %v1604_v38 = vpop.f32.mrb[43].mxu0  ;;  %10002 = vmatmul.mubr.msk.f32.vlgmr.msra.gmra.mrb[64].mxu0 %vm1713_vm1, %v12117_v37 }
 0x29a   : > { %v12242_v40 = vpack.c.bf16 %v9782_v36, %v1604_v38  ;;  %10004 = vmatprep.mubr.msk.f32.mxu0 %vm1713_vm1, %v12122_v39 }
 0x29c   : > { %9911 = vmatmul.mubr.msk.f32.gmra.mrb[38].mxu1 %vm1713_vm1, %v12159_v52  ;;  %v9785_v41 = vpop.f32.mrb[44].mxu0 }
 0x29d   : > { %9921 = vmatprep.mubr.msk.f32.mxu1 %vm1713_vm1, %v12079_v14  ;;  %v1614_v43 = vpop.f32.mrb[45].mxu0  ;;  %10005 = vmatmul.mubr.msk.f32.gmra.mrb[66].mxu0 %vm1713_vm1, %v12131_v42 }
 0x29e   : > { %v10801_v45 = vpack.c.bf16 %v9785_v41, %v1614_v43  ;;  %10007 = vmatprep.mubr.msk.f32.mxu0 %vm1713_vm1, %v12136_v44 }
 0x2a0   : > { %9922 = vmatmul.mubr.msk.f32.vlgmr.msra.gmra.mrb[40].mxu1 %vm1713_vm1, %v12117_v37  ;;  %v9788_v46 = vpop.f32.mrb[46].mxu0  ;;  %10802 = vmatprep.subr.bf16.mxu0 %v10801_v45 }
 0x2a1   : > { %10764 = vmatpush3.bf16.msra.mxu1 %v12189_v10  ;;  %9924 = vmatprep.mubr.msk.f32.mxu1 %vm1713_vm1, %v12122_v39  ;;  %v1624_v48 = vpop.f32.mrb[47].mxu0 }
 0x2a2   : > { %10766 = vmatprep.subr.bf16.mxu1 %v12195_v13  ;;  %v10805_v50 = vpack.c.bf16 %v9788_v46, %v1624_v48  ;;  %10804 = vmatpush3.bf16.msra.mxu0 %v10801_v45 }
 0x2a3   : > { %10008 = vmatmul.mubr.msk.f32.gmra.mrb[68].mxu0 %vm1713_vm1, %v12145_v47 }
 0x2a4   : > { %9925 = vmatmul.mubr.msk.f32.gmra.mrb[42].mxu1 %vm1713_vm1, %v12131_v42  ;;  %v9791_v51 = vpop.f32.mrb[48].mxu0  ;;  %10806 = vmatprep.subr.bf16.mxu0 %v10805_v50 }
 0x2a5   : > { %10768 = vmatpush3.bf16.msra.mxu1 %v12195_v13  ;;  %9927 = vmatprep.mubr.msk.f32.mxu1 %vm1713_vm1, %v12136_v44  ;;  %v1634_v53 = vpop.f32.mrb[49].mxu0 }
 0x2a6   : > { %10770 = vmatprep.subr.bf16.mxu1 %v12201_v17  ;;  %v12268_v54 = vpack.c.bf16 %v9791_v51, %v1634_v53  ;;  %10808 = vmatpush3.bf16.msra.mxu0 %v10805_v50 }
 0x2a7   : > { %10010 = vmatprep.mubr.msk.f32.mxu0 %vm1713_vm1, %v12150_v49 }
 0x2a8   : > { %9928 = vmatmul.mubr.msk.f32.gmra.mrb[44].mxu1 %vm1713_vm1, %v12145_v47  ;;  %v9794_v55 = vpop.f32.mrb[50].mxu0  ;;  %10011 = vmatmul.mubr.msk.f32.gmra.mrb[70].mxu0 %vm1713_vm1, %v12159_v52 }
 0x2a9   : > { %9930 = vmatprep.mubr.msk.f32.mxu1 %vm1713_vm1, %v12150_v49  ;;  %v1644_v56 = vpop.f32.mrb[51].mxu0  ;;  %10041 = vmatprep.mubr.msk.f32.mxu0 %vm1713_vm1, %v12079_v14 }
 0x2aa   : > { %v12280_v57 = vpack.c.bf16 %v9794_v55, %v1644_v56 }
 0x2ac   : > { %9931 = vmatmul.mubr.msk.f32.gmra.mrb[46].mxu1 %vm1713_vm1, %v12159_v52  ;;  %v9797_v58 = vpop.f32.mrb[52].mxu0  ;;  %10042 = vmatmul.mubr.msk.f32.vlgmr.msra.gmra.mrb[72].mxu0 %vm1713_vm1, %v12117_v37 }
 0x2ad   : > { %9941 = vmatprep.mubr.msk.f32.mxu1 %vm1713_vm1, %v12079_v14  ;;  %v1654_v59 = vpop.f32.mrb[53].mxu0  ;;  %10044 = vmatprep.mubr.msk.f32.mxu0 %vm1713_vm1, %v12122_v39 }
 0x2ae   : > { %v10817_v60 = vpack.c.bf16 %v9797_v58, %v1654_v59 }
 0x2b0   : > { %9942 = vmatmul.mubr.msk.f32.vlgmr.msra.gmra.mrb[48].mxu1 %vm1713_vm1, %v12117_v37  ;;  %v9800_v61 = vpop.f32.mrb[54].mxu0  ;;  %10818 = vmatprep.subr.bf16.mxu0 %v10817_v60 }
 0x2b1   : > { %10772 = vmatpush3.bf16.msra.mxu1 %v12201_v17  ;;  %9944 = vmatprep.mubr.msk.f32.mxu1 %vm1713_vm1, %v12122_v39  ;;  %v1664_v62 = vpop.f32.mrb[55].mxu0 }
 0x2b2   : > { %10774 = vmatprep.subr.bf16.mxu1 %v12207_v20  ;;  %v10821_v63 = vpack.c.bf16 %v9800_v61, %v1664_v62  ;;  %10820 = vmatpush3.bf16.msra.mxu0 %v10817_v60 }
 0x2b3   : > { %10045 = vmatmul.mubr.msk.f32.gmra.mrb[74].mxu0 %vm1713_vm1, %v12131_v42 }
 0x2b4   : > { %9945 = vmatmul.mubr.msk.f32.gmra.mrb[50].mxu1 %vm1713_vm1, %v12131_v42  ;;  %v9803_v0 = vpop.f32.mrb[56].mxu0  ;;  %10822 = vmatprep.subr.bf16.mxu0 %v10821_v63 }
 0x2b5   : > { %10776 = vmatpush3.bf16.msra.mxu1 %v12207_v20  ;;  %9947 = vmatprep.mubr.msk.f32.mxu1 %vm1713_vm1, %v12136_v44  ;;  %v1674_v1 = vpop.f32.mrb[57].mxu0 }
 0x2b6   : > { %10778 = vmatprep.subr.bf16.mxu1 %v12213_v23  ;;  %v12304_v2 = vpack.c.bf16 %v9803_v0, %v1674_v1  ;;  %10824 = vmatpush3.bf16.msra.mxu0 %v10821_v63 }
 0x2b7   : > { %10047 = vmatprep.mubr.msk.f32.mxu0 %vm1713_vm1, %v12136_v44 }
 0x2b8   : > { %9948 = vmatmul.mubr.msk.f32.gmra.mrb[52].mxu1 %vm1713_vm1, %v12145_v47  ;;  %v9806_v3 = vpop.f32.mrb[58].mxu0  ;;  %10048 = vmatmul.mubr.msk.f32.gmra.mrb[76].mxu0 %vm1713_vm1, %v12145_v47 }
 0x2b9   : > { %9950 = vmatprep.mubr.msk.f32.mxu1 %vm1713_vm1, %v12150_v49  ;;  %v1684_v4 = vpop.f32.mrb[59].mxu0  ;;  %10050 = vmatprep.mubr.msk.f32.mxu0 %vm1713_vm1, %v12150_v49 }
 0x2ba   : > { %v12316_v5 = vpack.c.bf16 %v9806_v3, %v1684_v4 }
 0x2bc   : > { %9951 = vmatmul.mubr.msk.f32.gmra.mrb[54].mxu1 %vm1713_vm1, %v12159_v52  ;;  %v9809_v6 = vpop.f32.mrb[60].mxu0  ;;  %10051 = vmatmul.mubr.msk.f32.gmra.mrb[78].mxu0 %vm1713_vm1, %v12159_v52 }
 0x2bd   : > { %9961 = vmatprep.mubr.msk.f32.mxu1 %vm1713_vm1, %v12079_v14  ;;  %v1694_v7 = vpop.f32.mrb[61].mxu0  ;;  %10081 = vmatprep.mubr.msk.f32.mxu0 %vm1713_vm1, %v12079_v14 }
 0x2be   : > { %v12326_v8 = vpack.c.bf16 %v9809_v6, %v1694_v7 }
 0x2c0   : > { %9962 = vmatmul.mubr.msk.f32.vlgmr.msra.gmra.mrb[56].mxu1 %vm1713_vm1, %v12117_v37  ;;  %10834 = vmatprep.subr.bf16.mxu0 %v12326_v8  ;;  %v9812_v9 = vpop.f32.mrb[62].mxu0 }
 0x2c1   : > { %10780 = vmatpush3.bf16.msra.mxu1 %v12213_v23  ;;  %9964 = vmatprep.mubr.msk.f32.mxu1 %vm1713_vm1, %v12122_v39  ;;  %v1704_v10 = vpop.f32.mrb[63].mxu0 }
 0x2c2   : > { %10782 = vmatprep.subr.bf16.mxu1 %v12219_v26  ;;  %10082 = vmatmul.mubr.msk.f32.vlgmr.msra.gmra.mrb[80].mxu0 %vm1713_vm1, %v12117_v37  ;;  %v12337_v11 = vpack.c.bf16 %v9812_v9, %v1704_v10 }
 0x2c3   : > { %10836 = vmatpush3.bf16.msra.mxu0 %v12326_v8  ;;  %10084 = vmatprep.mubr.msk.f32.mxu0 %vm1713_vm1, %v12122_v39 }
 0x2c4   : > { %9965 = vmatmul.mubr.msk.f32.gmra.mrb[58].mxu1 %vm1713_vm1, %v12131_v42  ;;  %10838 = vmatprep.subr.bf16.mxu0 %v12337_v11 }
 0x2c5   : > { %10784 = vmatpush3.bf16.msra.mxu1 %v12219_v26  ;;  %9967 = vmatprep.mubr.msk.f32.mxu1 %vm1713_vm1, %v12136_v44 }
 0x2c6   : > { %10794 = vmatprep.subr.bf16.mxu1 %v12234_v35  ;;  %10085 = vmatmul.mubr.msk.f32.gmra.mrb[82].mxu0 %vm1713_vm1, %v12131_v42 }
 0x2c7   : > { %10087 = vmatprep.mubr.msk.f32.mxu0 %vm1713_vm1, %v12136_v44  ;;  %10840 = vmatpush3.bf16.msra.mxu0 %v12337_v11 }
 0x2c8   : > { %9968 = vmatmul.mubr.msk.f32.gmra.mrb[60].mxu1 %vm1713_vm1, %v12145_v47 }
 0x2c9   : > { %9970 = vmatprep.mubr.msk.f32.mxu1 %vm1713_vm1, %v12150_v49 }
 0x2ca   : > { %10088 = vmatmul.mubr.msk.f32.gmra.mrb[84].mxu0 %vm1713_vm1, %v12145_v47 }
 0x2cb   : > { %10090 = vmatprep.mubr.msk.f32.mxu0 %vm1713_vm1, %v12150_v49 }
 0x2cc   : > { %9971 = vmatmul.mubr.msk.f32.gmra.mrb[62].mxu1 %vm1713_vm1, %v12159_v52 }
 0x2cd   : > { %9981 = vmatprep.mubr.msk.f32.mxu1 %vm1713_vm1, %v12079_v14 }
 0x2ce   : > { %10091 = vmatmul.mubr.msk.f32.gmra.mrb[86].mxu0 %vm1713_vm1, %v12159_v52 }
 0x2cf   : > { %10121 = vmatprep.mubr.msk.f32.mxu0 %vm1713_vm1, %v12079_v14 }
 0x2d0   : > { %9982 = vmatmul.mubr.msk.f32.vlgmr.msra.gmra.mrb[64].mxu1 %vm1713_vm1, %v12117_v37 }
 0x2d1   : > { %9984 = vmatprep.mubr.msk.f32.mxu1 %vm1713_vm1, %v12122_v39  ;;  %10796 = vmatpush3.bf16.msra.mxu1 %v12234_v35 }
 0x2d2   : > { %10798 = vmatprep.subr.bf16.mxu1 %v12242_v40  ;;  %10122 = vmatmul.mubr.msk.f32.vlgmr.msra.gmra.mrb[88].mxu0 %vm1713_vm1, %v12117_v37 }
 0x2d3   : > { %10124 = vmatprep.mubr.msk.f32.mxu0 %vm1713_vm1, %v12122_v39 }
 0x2d4   : > { %9985 = vmatmul.mubr.msk.f32.gmra.mrb[66].mxu1 %vm1713_vm1, %v12131_v42 }
 0x2d5   : > { %9987 = vmatprep.mubr.msk.f32.mxu1 %vm1713_vm1, %v12136_v44  ;;  %10800 = vmatpush3.bf16.msra.mxu1 %v12242_v40 }
 0x2d6   : > { %10810 = vmatprep.subr.bf16.mxu1 %v12268_v54  ;;  %10125 = vmatmul.mubr.msk.f32.gmra.mrb[90].mxu0 %vm1713_vm1, %v12131_v42 }
 0x2d7   : > { %10127 = vmatprep.mubr.msk.f32.mxu0 %vm1713_vm1, %v12136_v44 }
 0x2d8   : > { %9988 = vmatmul.mubr.msk.f32.gmra.mrb[68].mxu1 %vm1713_vm1, %v12145_v47 }
 0x2d9   : > { %9990 = vmatprep.mubr.msk.f32.mxu1 %vm1713_vm1, %v12150_v49 }
 0x2da   : > { %10128 = vmatmul.mubr.msk.f32.gmra.mrb[92].mxu0 %vm1713_vm1, %v12145_v47 }
 0x2dc   : > { %9991 = vmatmul.mubr.msk.f32.gmra.mrb[70].mxu1 %vm1713_vm1, %v12159_v52 }
 0x2dd   : > { %10021 = vmatprep.mubr.msk.f32.mxu1 %vm1713_vm1, %v12079_v14 }
 0x2e0   : > { %10022 = vmatmul.mubr.msk.f32.vlgmr.msra.gmra.mrb[72].mxu1 %vm1713_vm1, %v12117_v37 }
 0x2e1   : > { %10024 = vmatprep.mubr.msk.f32.mxu1 %vm1713_vm1, %v12122_v39  ;;  %10812 = vmatpush3.bf16.msra.mxu1 %v12268_v54 }
 0x2e2   : > { %10814 = vmatprep.subr.bf16.mxu1 %v12280_v57 }
 0x2e4   : > { %10025 = vmatmul.mubr.msk.f32.gmra.mrb[74].mxu1 %vm1713_vm1, %v12131_v42 }
 0x2e5   : > { %10027 = vmatprep.mubr.msk.f32.mxu1 %vm1713_vm1, %v12136_v44  ;;  %10816 = vmatpush3.bf16.msra.mxu1 %v12280_v57 }
 0x2e6   : > { %10826 = vmatprep.subr.bf16.mxu1 %v12304_v2 }
 0x2e8   : > { %10028 = vmatmul.mubr.msk.f32.gmra.mrb[76].mxu1 %vm1713_vm1, %v12145_v47 }
 0x2e9   : > { %10030 = vmatprep.mubr.msk.f32.mxu1 %vm1713_vm1, %v12150_v49 }
 0x2ec   : > { %10031 = vmatmul.mubr.msk.f32.gmra.mrb[78].mxu1 %vm1713_vm1, %v12159_v52 }
 0x2ed   : > { %10061 = vmatprep.mubr.msk.f32.mxu1 %vm1713_vm1, %v12079_v14 }
 0x2f0   : > { %10062 = vmatmul.mubr.msk.f32.vlgmr.msra.gmra.mrb[80].mxu1 %vm1713_vm1, %v12117_v37 }
 0x2f1   : > { %10064 = vmatprep.mubr.msk.f32.mxu1 %vm1713_vm1, %v12122_v39  ;;  %10828 = vmatpush3.bf16.msra.mxu1 %v12304_v2 }
 0x2f2   : > { %10830 = vmatprep.subr.bf16.mxu1 %v12316_v5 }
 0x2f4   : > { %10065 = vmatmul.mubr.msk.f32.gmra.mrb[82].mxu1 %vm1713_vm1, %v12131_v42 }
 0x2f5   : > { %10067 = vmatprep.mubr.msk.f32.mxu1 %vm1713_vm1, %v12136_v44  ;;  %10832 = vmatpush3.bf16.msra.mxu1 %v12316_v5 }
 0x2f6   : > { %10917 = vmatprep.subr.bf16.mxu1 %v12326_v8 }
 0x2f8   : > { %10068 = vmatmul.mubr.msk.f32.gmra.mrb[84].mxu1 %vm1713_vm1, %v12145_v47 }
 0x2f9   : > { %10070 = vmatprep.mubr.msk.f32.mxu1 %vm1713_vm1, %v12150_v49 }
 0x2fc   : > { %10071 = vmatmul.mubr.msk.f32.gmra.mrb[86].mxu1 %vm1713_vm1, %v12159_v52 }
 0x2fd   : > { %10101 = vmatprep.mubr.msk.f32.mxu1 %vm1713_vm1, %v12079_v14 }
 0x300   : > { %10102 = vmatmul.mubr.msk.f32.vlgmr.msra.gmra.mrb[88].mxu1 %vm1713_vm1, %v12117_v37 }
 0x301   : > { %10919 = vmatpush3.bf16.msra.mxu1 %v12326_v8  ;;  %10104 = vmatprep.mubr.msk.f32.mxu1 %vm1713_vm1, %v12122_v39 }
 0x302   : > { %10918 = vmatprep.subr.bf16.mxu1 %v12337_v11 }
 0x304   : > { %10105 = vmatmul.mubr.msk.f32.gmra.mrb[90].mxu1 %vm1713_vm1, %v12131_v42 }
 0x305   : > { %10920 = vmatpush3.bf16.msra.mxu1 %v12337_v11  ;;  %10107 = vmatprep.mubr.msk.f32.mxu1 %vm1713_vm1, %v12136_v44 }
 0x308   : > { %10108 = vmatmul.mubr.msk.f32.gmra.mrb[92].mxu1 %vm1713_vm1, %v12145_v47 }
 0x309   : > { %10110 = vmatprep.mubr.msk.f32.mxu1 %vm1713_vm1, %v12150_v49 }
 0x30c   : > { %10111 = vmatmul.mubr.msk.f32.gmra.mrb[94].mxu1 %vm1713_vm1, %v12159_v52 }
 0x30d   : > { %10130 = vmatprep.mubr.msk.f32.mxu1 %vm1713_vm1, %v12150_v49 }
 0x310   : > { %10131 = vmatmul.mubr.msk.f32.vlgmr.msra.gmra.mrb[96].mxu1 %vm1713_vm1, %v12159_v52 }
 0x323   : > { %v9823_v14 = vpop.f32.mrb[0].mxu1 }
 0x324   : > { %1844 = vst [vmem:[%s11845_s15 + $0x8] sm:$0xff] %v9823_v14  ;;  %v1804_v37 = vpop.f32.mrb[1].mxu1 }
 0x325   : > { %1843 = vst [vmem:[%s11845_s15] sm:$0xff] %v1804_v37 }
 0x327   : > { %v9826_v39 = vpop.f32.mrb[2].mxu1 }
 0x328   : > { %1846 = vst [vmem:[%s11845_s15 + $0x18] sm:$0xff] %v9826_v39  ;;  %v1814_v42 = vpop.f32.mrb[3].mxu1 }
 0x329   : > { %1845 = vst [vmem:[%s11845_s15 + $0x10] sm:$0xff] %v1814_v42 }
 0x32b   : > { %v9829_v44 = vpop.f32.mrb[4].mxu1 }
 0x32c   : > { %1848 = vst [vmem:[%s11845_s15 + $0x28] sm:$0xff] %v9829_v44  ;;  %v1824_v47 = vpop.f32.mrb[5].mxu1 }
 0x32d   : > { %1847 = vst [vmem:[%s11845_s15 + $0x20] sm:$0xff] %v1824_v47 }
 0x32f   : > { %v9832_v49 = vpop.f32.mrb[6].mxu1 }
 0x330   : > { %1850 = vst [vmem:[%s11845_s15 + $0x38] sm:$0xff] %v9832_v49  ;;  %v1834_v52 = vpop.f32.mrb[7].mxu1 }
 0x331   : > { %1849 = vst [vmem:[%s11845_s15 + $0x30] sm:$0xff] %v1834_v52 }
 0x333   : > { %v9843_v12 = vpop.f32.mrb[8].mxu1 }
 0x334   : > { %8273 = vst [vmem:[%s11845_s15 + $0x48] sm:$0xff] %v9843_v12  ;;  %v1917_v13 = vpop.f32.mrb[9].mxu1 }
 0x335   : > { %8272 = vst [vmem:[%s11845_s15 + $0x40] sm:$0xff] %v1917_v13 }
 0x337   : > { %v9846_v15 = vpop.f32.mrb[10].mxu1 }
 0x338   : > { %8275 = vst [vmem:[%s11845_s15 + $0x58] sm:$0xff] %v9846_v15  ;;  %v1927_v16 = vpop.f32.mrb[11].mxu1 }
 0x339   : > { %8274 = vst [vmem:[%s11845_s15 + $0x50] sm:$0xff] %v1927_v16 }
 0x33b   : > { %v9849_v17 = vpop.f32.mrb[12].mxu1 }
 0x33c   : > { %8277 = vst [vmem:[%s11845_s15 + $0x68] sm:$0xff] %v9849_v17  ;;  %v1937_v18 = vpop.f32.mrb[13].mxu1 }
 0x33d   : > { %8276 = vst [vmem:[%s11845_s15 + $0x60] sm:$0xff] %v1937_v18 }
 0x33f   : > { %v9852_v19 = vpop.f32.mrb[14].mxu1 }
 0x340   : > { %8279 = vst [vmem:[%s11845_s15 + $0x78] sm:$0xff] %v9852_v19  ;;  %v1947_v20 = vpop.f32.mrb[15].mxu1 }
 0x341   : > { %8278 = vst [vmem:[%s11845_s15 + $0x70] sm:$0xff] %v1947_v20 }
 0x343   : > { %v9863_v21 = vpop.f32.mrb[16].mxu1 }
 0x344   : > { %8289 = vst [vmem:[%s11845_s15 + $0x88] sm:$0xff] %v9863_v21  ;;  %v2031_v22 = vpop.f32.mrb[17].mxu1 }
 0x345   : > { %8288 = vst [vmem:[%s11845_s15 + $0x80] sm:$0xff] %v2031_v22 }
 0x347   : > { %v9866_v23 = vpop.f32.mrb[18].mxu1 }
 0x348   : > { %8291 = vst [vmem:[%s11845_s15 + $0x98] sm:$0xff] %v9866_v23  ;;  %v2041_v24 = vpop.f32.mrb[19].mxu1 }
 0x349   : > { %8290 = vst [vmem:[%s11845_s15 + $0x90] sm:$0xff] %v2041_v24 }
 0x34b   : > { %v9869_v25 = vpop.f32.mrb[20].mxu1 }
 0x34c   : > { %8293 = vst [vmem:[%s11845_s15 + $0xa8] sm:$0xff] %v9869_v25  ;;  %v2051_v26 = vpop.f32.mrb[21].mxu1 }
 0x34d   : > { %8292 = vst [vmem:[%s11845_s15 + $0xa0] sm:$0xff] %v2051_v26 }
 0x34f   : > { %v9872_v27 = vpop.f32.mrb[22].mxu1 }
 0x350   : > { %8295 = vst [vmem:[%s11845_s15 + $0xb8] sm:$0xff] %v9872_v27  ;;  %v2061_v28 = vpop.f32.mrb[23].mxu1 }
 0x351   : > { %8294 = vst [vmem:[%s11845_s15 + $0xb0] sm:$0xff] %v2061_v28 }
 0x353   : > { %v9883_v29 = vpop.f32.mrb[24].mxu1 }
 0x354   : > { %8305 = vst [vmem:[%s11845_s15 + $0xc8] sm:$0xff] %v9883_v29  ;;  %v2145_v30 = vpop.f32.mrb[25].mxu1 }
 0x355   : > { %8304 = vst [vmem:[%s11845_s15 + $0xc0] sm:$0xff] %v2145_v30 }
 0x357   : > { %v9886_v31 = vpop.f32.mrb[26].mxu1 }
 0x358   : > { %8307 = vst [vmem:[%s11845_s15 + $0xd8] sm:$0xff] %v9886_v31  ;;  %v2155_v32 = vpop.f32.mrb[27].mxu1 }
 0x359   : > { %8306 = vst [vmem:[%s11845_s15 + $0xd0] sm:$0xff] %v2155_v32 }
 0x35b   : > { %v9889_v33 = vpop.f32.mrb[28].mxu1 }
 0x35c   : > { %8309 = vst [vmem:[%s11845_s15 + $0xe8] sm:$0xff] %v9889_v33  ;;  %v2165_v34 = vpop.f32.mrb[29].mxu1 }
 0x35d   : > { %8308 = vst [vmem:[%s11845_s15 + $0xe0] sm:$0xff] %v2165_v34 }
 0x35f   : > { %v9892_v35 = vpop.f32.mrb[30].mxu1 }
 0x360   : > { %8311 = vst [vmem:[%s11845_s15 + $0xf8] sm:$0xff] %v9892_v35  ;;  %v2175_v36 = vpop.f32.mrb[31].mxu1 }
 0x361   : > { %8310 = vst [vmem:[%s11845_s15 + $0xf0] sm:$0xff] %v2175_v36 }
 0x363   : > { %v9903_v38 = vpop.f32.mrb[32].mxu1 }
 0x364   : > { %8321 = vst [vmem:[%s11845_s15 + $0x108] sm:$0xff] %v9903_v38  ;;  %v2259_v40 = vpop.f32.mrb[33].mxu1 }
 0x365   : > { %8320 = vst [vmem:[%s11845_s15 + $0x100] sm:$0xff] %v2259_v40 }
 0x367   : > { %v9906_v41 = vpop.f32.mrb[34].mxu1 }
 0x368   : > { %8323 = vst [vmem:[%s11845_s15 + $0x118] sm:$0xff] %v9906_v41  ;;  %v2269_v43 = vpop.f32.mrb[35].mxu1 }
 0x369   : > { %8322 = vst [vmem:[%s11845_s15 + $0x110] sm:$0xff] %v2269_v43 }
 0x36b   : > { %v9909_v45 = vpop.f32.mrb[36].mxu1 }
 0x36c   : > { %8325 = vst [vmem:[%s11845_s15 + $0x128] sm:$0xff] %v9909_v45  ;;  %v2279_v46 = vpop.f32.mrb[37].mxu1  ;;  %v10003_v48 = vpop.f32.mrb[64].mxu0 }
 0x36d   : > { %8324 = vst [vmem:[%s11845_s15 + $0x120] sm:$0xff] %v2279_v46  ;;  %8401 = vst [vmem:[%s11845_s15 + $0x248] sm:$0xff] %v10003_v48  ;;  %v2829_v50 = vpop.f32.mrb[65].mxu0 }
 0x36e   : > { %8400 = vst [vmem:[%s11845_s15 + $0x240] sm:$0xff] %v2829_v50 }
 0x36f   : > { %v9912_v51 = vpop.f32.mrb[38].mxu1 }
 0x370   : > { %8327 = vst [vmem:[%s11845_s15 + $0x138] sm:$0xff] %v9912_v51  ;;  %v2289_v53 = vpop.f32.mrb[39].mxu1  ;;  %v10006_v54 = vpop.f32.mrb[66].mxu0 }
 0x371   : > { %8326 = vst [vmem:[%s11845_s15 + $0x130] sm:$0xff] %v2289_v53  ;;  %8403 = vst [vmem:[%s11845_s15 + $0x258] sm:$0xff] %v10006_v54  ;;  %v2839_v55 = vpop.f32.mrb[67].mxu0 }
 0x372   : > { %8402 = vst [vmem:[%s11845_s15 + $0x250] sm:$0xff] %v2839_v55 }
 0x373   : > { %v9923_v56 = vpop.f32.mrb[40].mxu1 }
 0x374   : > { %8337 = vst [vmem:[%s11845_s15 + $0x148] sm:$0xff] %v9923_v56  ;;  %v2373_v57 = vpop.f32.mrb[41].mxu1 }
 0x375   : > { %8336 = vst [vmem:[%s11845_s15 + $0x140] sm:$0xff] %v2373_v57 }
 0x376   : > { %v10009_v58 = vpop.f32.mrb[68].mxu0 }
 0x377   : > { %v9926_v59 = vpop.f32.mrb[42].mxu1  ;;  %8405 = vst [vmem:[%s11845_s15 + $0x268] sm:$0xff] %v10009_v58  ;;  %v2849_v60 = vpop.f32.mrb[69].mxu0 }
 0x378   : > { %8339 = vst [vmem:[%s11845_s15 + $0x158] sm:$0xff] %v9926_v59  ;;  %v2383_v61 = vpop.f32.mrb[43].mxu1  ;;  %8404 = vst [vmem:[%s11845_s15 + $0x260] sm:$0xff] %v2849_v60 }
 0x379   : > { %8338 = vst [vmem:[%s11845_s15 + $0x150] sm:$0xff] %v2383_v61 }
 0x37b   : > { %v9929_v62 = vpop.f32.mrb[44].mxu1  ;;  %v10012_v63 = vpop.f32.mrb[70].mxu0 }
 0x37c   : > { %8341 = vst [vmem:[%s11845_s15 + $0x168] sm:$0xff] %v9929_v62  ;;  %v2393_v0 = vpop.f32.mrb[45].mxu1  ;;  %8407 = vst [vmem:[%s11845_s15 + $0x278] sm:$0xff] %v10012_v63  ;;  %v2859_v1 = vpop.f32.mrb[71].mxu0 }
 0x37d   : > { %8340 = vst [vmem:[%s11845_s15 + $0x160] sm:$0xff] %v2393_v0  ;;  %8406 = vst [vmem:[%s11845_s15 + $0x270] sm:$0xff] %v2859_v1 }
 0x37f   : > { %v9932_v2 = vpop.f32.mrb[46].mxu1  ;;  %v10043_v3 = vpop.f32.mrb[72].mxu0 }
 0x380   : > { %8343 = vst [vmem:[%s11845_s15 + $0x178] sm:$0xff] %v9932_v2  ;;  %v2403_v4 = vpop.f32.mrb[47].mxu1  ;;  %8433 = vst [vmem:[%s11845_s15 + $0x2c8] sm:$0xff] %v10043_v3  ;;  %v3057_v5 = vpop.f32.mrb[73].mxu0 }
 0x381   : > { %8342 = vst [vmem:[%s11845_s15 + $0x170] sm:$0xff] %v2403_v4  ;;  %8432 = vst [vmem:[%s11845_s15 + $0x2c0] sm:$0xff] %v3057_v5 }
 0x383   : > { %v9943_v6 = vpop.f32.mrb[48].mxu1 }
 0x384   : > { %8353 = vst [vmem:[%s11845_s15 + $0x188] sm:$0xff] %v9943_v6  ;;  %v2487_v7 = vpop.f32.mrb[49].mxu1 }
 0x385   : > { %8352 = vst [vmem:[%s11845_s15 + $0x180] sm:$0xff] %v2487_v7 }
 0x386   : > { %v10046_v8 = vpop.f32.mrb[74].mxu0 }
 0x387   : > { %v9946_v9 = vpop.f32.mrb[50].mxu1  ;;  %8435 = vst [vmem:[%s11845_s15 + $0x2d8] sm:$0xff] %v10046_v8  ;;  %v3067_v10 = vpop.f32.mrb[75].mxu0 }
 0x388   : > { %8355 = vst [vmem:[%s11845_s15 + $0x198] sm:$0xff] %v9946_v9  ;;  %v2497_v11 = vpop.f32.mrb[51].mxu1  ;;  %8434 = vst [vmem:[%s11845_s15 + $0x2d0] sm:$0xff] %v3067_v10 }
 0x389   : > { %8354 = vst [vmem:[%s11845_s15 + $0x190] sm:$0xff] %v2497_v11 }
 0x38b   : > { %v9949_v14 = vpop.f32.mrb[52].mxu1  ;;  %v10049_v37 = vpop.f32.mrb[76].mxu0 }
 0x38c   : > { %8357 = vst [vmem:[%s11845_s15 + $0x1a8] sm:$0xff] %v9949_v14  ;;  %v2507_v39 = vpop.f32.mrb[53].mxu1  ;;  %8437 = vst [vmem:[%s11845_s15 + $0x2e8] sm:$0xff] %v10049_v37  ;;  %v3077_v42 = vpop.f32.mrb[77].mxu0 }
 0x38d   : > { %8356 = vst [vmem:[%s11845_s15 + $0x1a0] sm:$0xff] %v2507_v39  ;;  %8436 = vst [vmem:[%s11845_s15 + $0x2e0] sm:$0xff] %v3077_v42 }
 0x38f   : > { %v9952_v44 = vpop.f32.mrb[54].mxu1  ;;  %v10052_v47 = vpop.f32.mrb[78].mxu0 }
 0x390   : > { %8359 = vst [vmem:[%s11845_s15 + $0x1b8] sm:$0xff] %v9952_v44  ;;  %v2517_v49 = vpop.f32.mrb[55].mxu1  ;;  %8439 = vst [vmem:[%s11845_s15 + $0x2f8] sm:$0xff] %v10052_v47  ;;  %v3087_v52 = vpop.f32.mrb[79].mxu0 }
 0x391   : > { %8358 = vst [vmem:[%s11845_s15 + $0x1b0] sm:$0xff] %v2517_v49  ;;  %8438 = vst [vmem:[%s11845_s15 + $0x2f0] sm:$0xff] %v3087_v52 }
 0x393   : > { %v9963_v12 = vpop.f32.mrb[56].mxu1 }
 0x394   : > { %8369 = vst [vmem:[%s11845_s15 + $0x1c8] sm:$0xff] %v9963_v12  ;;  %v2601_v13 = vpop.f32.mrb[57].mxu1 }
 0x395   : > { %8368 = vst [vmem:[%s11845_s15 + $0x1c0] sm:$0xff] %v2601_v13  ;;  %v10083_v15 = vpop.f32.mrb[80].mxu0 }
 0x396   : > { %8465 = vst [vmem:[%s11845_s15 + $0x348] sm:$0xff] %v10083_v15  ;;  %v3285_v16 = vpop.f32.mrb[81].mxu0 }
 0x397   : > { %v9966_v17 = vpop.f32.mrb[58].mxu1  ;;  %8464 = vst [vmem:[%s11845_s15 + $0x340] sm:$0xff] %v3285_v16 }
 0x398   : > { %8371 = vst [vmem:[%s11845_s15 + $0x1d8] sm:$0xff] %v9966_v17  ;;  %v2611_v18 = vpop.f32.mrb[59].mxu1 }
 0x399   : > { %8370 = vst [vmem:[%s11845_s15 + $0x1d0] sm:$0xff] %v2611_v18  ;;  %v10086_v19 = vpop.f32.mrb[82].mxu0 }
 0x39a   : > { %8467 = vst [vmem:[%s11845_s15 + $0x358] sm:$0xff] %v10086_v19  ;;  %v3295_v20 = vpop.f32.mrb[83].mxu0 }
 0x39b   : > { %v9969_v21 = vpop.f32.mrb[60].mxu1  ;;  %8466 = vst [vmem:[%s11845_s15 + $0x350] sm:$0xff] %v3295_v20 }
 0x39c   : > { %8373 = vst [vmem:[%s11845_s15 + $0x1e8] sm:$0xff] %v9969_v21  ;;  %v2621_v22 = vpop.f32.mrb[61].mxu1 }
 0x39d   : > { %8372 = vst [vmem:[%s11845_s15 + $0x1e0] sm:$0xff] %v2621_v22  ;;  %v10089_v23 = vpop.f32.mrb[84].mxu0 }
 0x39e   : > { %8469 = vst [vmem:[%s11845_s15 + $0x368] sm:$0xff] %v10089_v23  ;;  %v3305_v24 = vpop.f32.mrb[85].mxu0 }
 0x39f   : > { %v9972_v25 = vpop.f32.mrb[62].mxu1  ;;  %8468 = vst [vmem:[%s11845_s15 + $0x360] sm:$0xff] %v3305_v24 }
 0x3a0   : > { %8375 = vst [vmem:[%s11845_s15 + $0x1f8] sm:$0xff] %v9972_v25  ;;  %v2631_v26 = vpop.f32.mrb[63].mxu1 }
 0x3a1   : > { %8374 = vst [vmem:[%s11845_s15 + $0x1f0] sm:$0xff] %v2631_v26  ;;  %v10092_v27 = vpop.f32.mrb[86].mxu0 }
 0x3a2   : > { %8471 = vst [vmem:[%s11845_s15 + $0x378] sm:$0xff] %v10092_v27  ;;  %v3315_v28 = vpop.f32.mrb[87].mxu0 }
 0x3a3   : > { %v9983_v29 = vpop.f32.mrb[64].mxu1  ;;  %8470 = vst [vmem:[%s11845_s15 + $0x370] sm:$0xff] %v3315_v28 }
 0x3a4   : > { %8385 = vst [vmem:[%s11845_s15 + $0x208] sm:$0xff] %v9983_v29  ;;  %v2715_v30 = vpop.f32.mrb[65].mxu1 }
 0x3a5   : > { %8384 = vst [vmem:[%s11845_s15 + $0x200] sm:$0xff] %v2715_v30  ;;  %v10123_v31 = vpop.f32.mrb[88].mxu0 }
 0x3a6   : > { %8497 = vst [vmem:[%s11845_s15 + $0x3c8] sm:$0xff] %v10123_v31  ;;  %v3513_v32 = vpop.f32.mrb[89].mxu0 }
 0x3a7   : > { %v9986_v33 = vpop.f32.mrb[66].mxu1  ;;  %8496 = vst [vmem:[%s11845_s15 + $0x3c0] sm:$0xff] %v3513_v32 }
 0x3a8   : > { %8387 = vst [vmem:[%s11845_s15 + $0x218] sm:$0xff] %v9986_v33  ;;  %v2725_v34 = vpop.f32.mrb[67].mxu1 }
 0x3a9   : > { %8386 = vst [vmem:[%s11845_s15 + $0x210] sm:$0xff] %v2725_v34  ;;  %v10126_v35 = vpop.f32.mrb[90].mxu0 }
 0x3aa   : > { %8499 = vst [vmem:[%s11845_s15 + $0x3d8] sm:$0xff] %v10126_v35  ;;  %v3523_v36 = vpop.f32.mrb[91].mxu0 }
 0x3ab   : > { %v9989_v38 = vpop.f32.mrb[68].mxu1  ;;  %8498 = vst [vmem:[%s11845_s15 + $0x3d0] sm:$0xff] %v3523_v36 }
 0x3ac   : > { %8389 = vst [vmem:[%s11845_s15 + $0x228] sm:$0xff] %v9989_v38  ;;  %v2735_v40 = vpop.f32.mrb[69].mxu1 }
 0x3ad   : > { %8388 = vst [vmem:[%s11845_s15 + $0x220] sm:$0xff] %v2735_v40  ;;  %v10129_v41 = vpop.f32.mrb[92].mxu0 }
 0x3ae   : > { %8501 = vst [vmem:[%s11845_s15 + $0x3e8] sm:$0xff] %v10129_v41  ;;  %v3533_v43 = vpop.f32.mrb[93].mxu0 }
 0x3af   : > { %v9992_v45 = vpop.f32.mrb[70].mxu1  ;;  %8500 = vst [vmem:[%s11845_s15 + $0x3e0] sm:$0xff] %v3533_v43 }
 0x3b0   : > { %8391 = vst [vmem:[%s11845_s15 + $0x238] sm:$0xff] %v9992_v45  ;;  %v2745_v46 = vpop.f32.mrb[71].mxu1 }
 0x3b1   : > { %8390 = vst [vmem:[%s11845_s15 + $0x230] sm:$0xff] %v2745_v46 }
 0x3b3   : > { %v10023_v48 = vpop.f32.mrb[72].mxu1 }
 0x3b4   : > { %8417 = vst [vmem:[%s11845_s15 + $0x288] sm:$0xff] %v10023_v48  ;;  %v2943_v50 = vpop.f32.mrb[73].mxu1 }
 0x3b5   : > { %8416 = vst [vmem:[%s11845_s15 + $0x280] sm:$0xff] %v2943_v50 }
 0x3b7   : > { %v10026_v51 = vpop.f32.mrb[74].mxu1 }
 0x3b8   : > { %8419 = vst [vmem:[%s11845_s15 + $0x298] sm:$0xff] %v10026_v51  ;;  %v2953_v53 = vpop.f32.mrb[75].mxu1 }
 0x3b9   : > { %8418 = vst [vmem:[%s11845_s15 + $0x290] sm:$0xff] %v2953_v53 }
 0x3bb   : > { %v10029_v54 = vpop.f32.mrb[76].mxu1 }
 0x3bc   : > { %8421 = vst [vmem:[%s11845_s15 + $0x2a8] sm:$0xff] %v10029_v54  ;;  %v2963_v55 = vpop.f32.mrb[77].mxu1 }
 0x3bd   : > { %8420 = vst [vmem:[%s11845_s15 + $0x2a0] sm:$0xff] %v2963_v55 }
 0x3bf   : > { %v10032_v56 = vpop.f32.mrb[78].mxu1 }
 0x3c0   : > { %8423 = vst [vmem:[%s11845_s15 + $0x2b8] sm:$0xff] %v10032_v56  ;;  %v2973_v57 = vpop.f32.mrb[79].mxu1 }
 0x3c1   : > { %8422 = vst [vmem:[%s11845_s15 + $0x2b0] sm:$0xff] %v2973_v57 }
 0x3c3   : > { %v10063_v58 = vpop.f32.mrb[80].mxu1 }
 0x3c4   : > { %8449 = vst [vmem:[%s11845_s15 + $0x308] sm:$0xff] %v10063_v58  ;;  %v3171_v59 = vpop.f32.mrb[81].mxu1 }
 0x3c5   : > { %8448 = vst [vmem:[%s11845_s15 + $0x300] sm:$0xff] %v3171_v59 }
 0x3c7   : > { %v10066_v60 = vpop.f32.mrb[82].mxu1 }
 0x3c8   : > { %8451 = vst [vmem:[%s11845_s15 + $0x318] sm:$0xff] %v10066_v60  ;;  %v3181_v61 = vpop.f32.mrb[83].mxu1 }
 0x3c9   : > { %8450 = vst [vmem:[%s11845_s15 + $0x310] sm:$0xff] %v3181_v61 }
 0x3cb   : > { %v10069_v62 = vpop.f32.mrb[84].mxu1 }
 0x3cc   : > { %8453 = vst [vmem:[%s11845_s15 + $0x328] sm:$0xff] %v10069_v62  ;;  %v3191_v63 = vpop.f32.mrb[85].mxu1 }
 0x3cd   : > { %8452 = vst [vmem:[%s11845_s15 + $0x320] sm:$0xff] %v3191_v63 }
 0x3cf   : > { %v10072_v0 = vpop.f32.mrb[86].mxu1 }
 0x3d0   : > { %8455 = vst [vmem:[%s11845_s15 + $0x338] sm:$0xff] %v10072_v0  ;;  %v3201_v1 = vpop.f32.mrb[87].mxu1 }
 0x3d1   : > { %8454 = vst [vmem:[%s11845_s15 + $0x330] sm:$0xff] %v3201_v1 }
 0x3d3   : > { %v10103_v2 = vpop.f32.mrb[88].mxu1 }
 0x3d4   : > { %8481 = vst [vmem:[%s11845_s15 + $0x388] sm:$0xff] %v10103_v2  ;;  %v3399_v3 = vpop.f32.mrb[89].mxu1 }
 0x3d5   : > { %8480 = vst [vmem:[%s11845_s15 + $0x380] sm:$0xff] %v3399_v3 }
 0x3d7   : > { %v10106_v4 = vpop.f32.mrb[90].mxu1 }
 0x3d8   : > { %8483 = vst [vmem:[%s11845_s15 + $0x398] sm:$0xff] %v10106_v4  ;;  %v3409_v5 = vpop.f32.mrb[91].mxu1 }
 0x3d9   : > { %8482 = vst [vmem:[%s11845_s15 + $0x390] sm:$0xff] %v3409_v5 }
 0x3db   : > { %v10109_v6 = vpop.f32.mrb[92].mxu1 }
 0x3dc   : > { %8485 = vst [vmem:[%s11845_s15 + $0x3a8] sm:$0xff] %v10109_v6  ;;  %v3419_v7 = vpop.f32.mrb[93].mxu1 }
 0x3dd   : > { %8484 = vst [vmem:[%s11845_s15 + $0x3a0] sm:$0xff] %v3419_v7 }
 0x3df   : > { %v10112_v8 = vpop.f32.mrb[94].mxu1 }
 0x3e0   : > { %8487 = vst [vmem:[%s11845_s15 + $0x3b8] sm:$0xff] %v10112_v8  ;;  %v3429_v9 = vpop.f32.mrb[95].mxu1 }
 0x3e1   : > { %8486 = vst [vmem:[%s11845_s15 + $0x3b0] sm:$0xff] %v3429_v9 }
 0x3e3   : > { %v10132_v10 = vpop.f32.mrb[96].mxu1 }
 0x3e4   : > { %8503 = vst [vmem:[%s11845_s15 + $0x3f8] sm:$0xff] %v10132_v10  ;;  %v3543_v11 = vpop.f32.mrb[97].mxu1 }
 0x3e5   : > { %8502 = vst [vmem:[%s11845_s15 + $0x3f0] sm:$0xff] %v3543_v11 }
 0x3e6 PF: > { %s13769_s19 = sld [smem:[#allocation35_spill]] }
 0x3ec   : > { %p3561_p9 = scmp.ge.s32.totalorder %s13769_s19, 3  ;;  %p3562_p11 = scmp.lt.s32.totalorder %s13769_s19, 7 }
 0x3ee   : > { %p3563_p0 = pnand %p3562_p11, %p3561_p9 }
 0x3ef   : > { %v3599_v14 = vld [vmem:[#allocation11] sm:$0xff] (!%p3563_p0)  ;;  %v3600_v37 = vld [vmem:[#allocation11 + $0x8] sm:$0xff] (!%p3563_p0)  ;;  %v3601_v39 = vld [vmem:[#allocation11 + $0x10] sm:$0xff] (!%p3563_p0)  ;;  %vm3611_vm2 = vcmask (!%p3563_p0), 261120   ;;  %s13770_s6 = sld [smem:[#allocation51_spill]] (!%p3563_p0)  ;;  %vm3933_vm3 = vcmask (!%p3563_p0), 130048  }
 0x3f0   : > { %3566 = sbr.rel (%p3563_p0) target bundleno = 1607 (0x647), region = 134  ;;  %v10841_v42 = vpack.c.bf16 (!%p3563_p0), %v3600_v37, %v3599_v14  ;;  %v3602_v44 = vld [vmem:[#allocation11 + $0x18] sm:$0xff] (!%p3563_p0)  ;;  %v3567_v47 = vld [vmem:[%s11823_s3] sm:$0xff] (!%p3563_p0)  ;;  %v3568_v52 = vld [vmem:[%s11823_s3 + $0x8] sm:$0xff] (!%p3563_p0) }
 0x3f1   : > { %v10845_v49 = vpack.c.bf16 (!%p3563_p0), %v3602_v44, %v3601_v39  ;;  %10141 = vmatprep.mubr.msk.f32.mxu0 (!%p3563_p0), %vm3611_vm2, %v3567_v47  ;;  %v3569_v12 = vld [vmem:[%s11823_s3 + $0x10] sm:$0xff] (!%p3563_p0)  ;;  %v3570_v13 = vld [vmem:[%s11823_s3 + $0x18] sm:$0xff] (!%p3563_p0)  ;;  %v3571_v15 = vld [vmem:[%s11823_s3 + $0x20] sm:$0xff] (!%p3563_p0) }
 0x3f2   : > { %10842 = vmatprep.subr.bf16.mxu0 (!%p3563_p0), %v10841_v42  ;;  %v3572_v16 = vld [vmem:[%s11823_s3 + $0x28] sm:$0xff] (!%p3563_p0)  ;;  %v3573_v17 = vld [vmem:[%s11823_s3 + $0x30] sm:$0xff] (!%p3563_p0)  ;;  %v3574_v18 = vld [vmem:[%s11823_s3 + $0x38] sm:$0xff] (!%p3563_p0) }
 0x3f3   : > { %10844 = vmatpush3.bf16.msra.mxu0 (!%p3563_p0), %v10841_v42  ;;  %v3575_v19 = vld [vmem:[%s11823_s3 + $0x40] sm:$0xff] (!%p3563_p0)  ;;  %v3576_v20 = vld [vmem:[%s11823_s3 + $0x48] sm:$0xff] (!%p3563_p0)  ;;  %v3577_v21 = vld [vmem:[%s11823_s3 + $0x50] sm:$0xff] (!%p3563_p0) }
 0x3f4   : > { %10846 = vmatprep.subr.bf16.mxu0 (!%p3563_p0), %v10845_v49  ;;  %v3578_v22 = vld [vmem:[%s11823_s3 + $0x58] sm:$0xff] (!%p3563_p0)  ;;  %v3579_v23 = vld [vmem:[%s11823_s3 + $0x60] sm:$0xff] (!%p3563_p0)  ;;  %v3580_v24 = vld [vmem:[%s11823_s3 + $0x68] sm:$0xff] (!%p3563_p0) }
 0x3f5   : > { %v3581_v25 = vld [vmem:[%s11823_s3 + $0x70] sm:$0xff] (!%p3563_p0)  ;;  %v3582_v26 = vld [vmem:[%s11823_s3 + $0x78] sm:$0xff] (!%p3563_p0)  ;;  %v3583_v27 = vld [vmem:[%s11823_s3 + $0x80] sm:$0xff] (!%p3563_p0) }
 0x3f6   : > { %v3584_v28 = vld [vmem:[%s11823_s3 + $0x88] sm:$0xff] (!%p3563_p0)  ;;  %v3585_v29 = vld [vmem:[%s11823_s3 + $0x90] sm:$0xff] (!%p3563_p0)  ;;  %v3586_v30 = vld [vmem:[%s11823_s3 + $0x98] sm:$0xff] (!%p3563_p0) }
 0x3f7   : > { %10848 = vmatpush3.bf16.msra.mxu0 %v10845_v49  ;;  %v3587_v31 = vld [vmem:[%s11823_s3 + $0xa0] sm:$0xff]  ;;  %v3588_v32 = vld [vmem:[%s11823_s3 + $0xa8] sm:$0xff]  ;;  %v3589_v33 = vld [vmem:[%s11823_s3 + $0xb0] sm:$0xff] }
 0x3f8   : > { %v3590_v34 = vld [vmem:[%s11823_s3 + $0xb8] sm:$0xff]  ;;  %v3591_v35 = vld [vmem:[%s11823_s3 + $0xc0] sm:$0xff]  ;;  %v3592_v36 = vld [vmem:[%s11823_s3 + $0xc8] sm:$0xff] }
 0x3f9   : > { %v3593_v38 = vld [vmem:[%s11823_s3 + $0xd0] sm:$0xff]  ;;  %v3594_v40 = vld [vmem:[%s11823_s3 + $0xd8] sm:$0xff]  ;;  %v3595_v41 = vld [vmem:[%s11823_s3 + $0xe0] sm:$0xff] }
 0x3fa   : > { %10142 = vmatmul.mubr.msk.f32.vlgmr.msra.gmra.mrb[0].mxu0 %vm3611_vm2, %v3568_v52  ;;  %v3596_v43 = vld [vmem:[%s11823_s3 + $0xe8] sm:$0xff]  ;;  %v3597_v45 = vld [vmem:[%s11823_s3 + $0xf0] sm:$0xff]  ;;  %v3598_v46 = vld [vmem:[%s11823_s3 + $0xf8] sm:$0xff] }
 0x3fb   : > { %10144 = vmatprep.mubr.msk.f32.mxu0 %vm3611_vm2, %v3569_v12  ;;  %v12658_v48 = vld [vmem:[%s13770_s6] sm:$0xff]  ;;  %v12667_v56 = vld [vmem:[%s13770_s6 + $0x8] sm:$0xff]  ;;  %v12672_v58 = vld [vmem:[%s13770_s6 + $0x10] sm:$0xff] }
 0x3fc   : > { %10193 = vmatprep.mubr.msk.f32.mxu1 %vm3933_vm3, %v12658_v48  ;;  %v12681_v61 = vld [vmem:[%s13770_s6 + $0x18] sm:$0xff]  ;;  %v12686_v63 = vld [vmem:[%s13770_s6 + $0x20] sm:$0xff]  ;;  %v12695_v2 = vld [vmem:[%s13770_s6 + $0x28] sm:$0xff] }
 0x3fd   : > { %v12700_v4 = vld [vmem:[%s13770_s6 + $0x30] sm:$0xff]  ;;  %v12709_v7 = vld [vmem:[%s13770_s6 + $0x38] sm:$0xff] }
 0x3fe   : > { %10145 = vmatmul.mubr.msk.f32.gmra.mrb[2].mxu0 %vm3611_vm2, %v3570_v13 }
 0x3ff   : > { %10147 = vmatprep.mubr.msk.f32.mxu0 %vm3611_vm2, %v3571_v15 }
 0x402   : > { %10148 = vmatmul.mubr.msk.f32.gmra.mrb[4].mxu0 %vm3611_vm2, %v3572_v16 }
 0x403   : > { %10150 = vmatprep.mubr.msk.f32.mxu0 %vm3611_vm2, %v3573_v17 }
 0x406   : > { %10151 = vmatmul.mubr.msk.f32.gmra.mrb[6].mxu0 %vm3611_vm2, %v3574_v18 }
 0x407   : > { %10153 = vmatprep.mubr.msk.f32.mxu0 %vm3611_vm2, %v3575_v19 }
 0x40a   : > { %10154 = vmatmul.mubr.msk.f32.gmra.mrb[8].mxu0 %vm3611_vm2, %v3576_v20 }
 0x40b   : > { %10156 = vmatprep.mubr.msk.f32.mxu0 %vm3611_vm2, %v3577_v21 }
 0x40e   : > { %10157 = vmatmul.mubr.msk.f32.gmra.mrb[10].mxu0 %vm3611_vm2, %v3578_v22 }
 0x40f   : > { %10159 = vmatprep.mubr.msk.f32.mxu0 %vm3611_vm2, %v3579_v23 }
 0x412   : > { %10160 = vmatmul.mubr.msk.f32.gmra.mrb[12].mxu0 %vm3611_vm2, %v3580_v24 }
 0x413   : > { %10162 = vmatprep.mubr.msk.f32.mxu0 %vm3611_vm2, %v3581_v25 }
 0x416   : > { %10163 = vmatmul.mubr.msk.f32.gmra.mrb[14].mxu0 %vm3611_vm2, %v3582_v26 }
 0x417   : > { %10165 = vmatprep.mubr.msk.f32.mxu0 %vm3611_vm2, %v3583_v27 }
 0x41a   : > { %10166 = vmatmul.mubr.msk.f32.gmra.mrb[16].mxu0 %vm3611_vm2, %v3584_v28 }
 0x41b   : > { %10168 = vmatprep.mubr.msk.f32.mxu0 %vm3611_vm2, %v3585_v29 }
 0x41e   : > { %10169 = vmatmul.mubr.msk.f32.gmra.mrb[18].mxu0 %vm3611_vm2, %v3586_v30 }
 0x41f   : > { %10171 = vmatprep.mubr.msk.f32.mxu0 %vm3611_vm2, %v3587_v31 }
 0x422   : > { %10172 = vmatmul.mubr.msk.f32.gmra.mrb[20].mxu0 %vm3611_vm2, %v3588_v32 }
 0x423   : > { %10174 = vmatprep.mubr.msk.f32.mxu0 %vm3611_vm2, %v3589_v33 }
 0x426   : > { %10175 = vmatmul.mubr.msk.f32.gmra.mrb[22].mxu0 %vm3611_vm2, %v3590_v34 }
 0x427   : > { %10177 = vmatprep.mubr.msk.f32.mxu0 %vm3611_vm2, %v3591_v35 }
 0x42a   : > { %10178 = vmatmul.mubr.msk.f32.gmra.mrb[24].mxu0 %vm3611_vm2, %v3592_v36 }
 0x42b   : > { %10180 = vmatprep.mubr.msk.f32.mxu0 %vm3611_vm2, %v3593_v38 }
 0x42e   : > { %10181 = vmatmul.mubr.msk.f32.gmra.mrb[26].mxu0 %vm3611_vm2, %v3594_v40 }
 0x42f   : > { %10183 = vmatprep.mubr.msk.f32.mxu0 %vm3611_vm2, %v3595_v41 }
 0x432   : > { %10184 = vmatmul.mubr.msk.f32.gmra.mrb[28].mxu0 %vm3611_vm2, %v3596_v43 }
 0x433   : > { %10186 = vmatprep.mubr.msk.f32.mxu0 %vm3611_vm2, %v3597_v45 }
 0x436   : > { %10187 = vmatmul.mubr.msk.f32.gmra.mrb[30].mxu0 %vm3611_vm2, %v3598_v46 }
 0x437   : > { %10273 = vmatprep.mubr.msk.f32.mxu0 %vm3933_vm3, %v12658_v48 }
 0x4cd   : > { %v10143_v50 = vpop.f32.mrb[0].mxu0 }
 0x4ce   : > { %v3774_v51 = vpop.f32.mrb[1].mxu0 }
 0x4cf   : > { %v10849_v53 = vpack.c.bf16 %v10143_v50, %v3774_v51 }
 0x4d1   : > { %v10146_v54 = vpop.f32.mrb[2].mxu0  ;;  %10850 = vmatprep.subr.bf16.mxu1 %v10849_v53 }
 0x4d2   : > { %v3784_v55 = vpop.f32.mrb[3].mxu0  ;;  %10852 = vmatpush3.bf16.msra.mxu1 %v10849_v53 }
 0x4d3   : > { %v10853_v57 = vpack.c.bf16 %v10146_v54, %v3784_v55 }
 0x4d5   : > { %v10149_v59 = vpop.f32.mrb[4].mxu0  ;;  %10194 = vmatmul.mubr.msk.f32.vlgmr.msra.gmra.mrb[0].mxu1 %vm3933_vm3, %v12667_v56  ;;  %10854 = vmatprep.subr.bf16.mxu1 %v10853_v57 }
 0x4d6   : > { %v3794_v60 = vpop.f32.mrb[5].mxu0  ;;  %10856 = vmatpush3.bf16.msra.mxu1 %v10853_v57  ;;  %10196 = vmatprep.mubr.msk.f32.mxu1 %vm3933_vm3, %v12672_v58 }
 0x4d7   : > { %v10857_v62 = vpack.c.bf16 %v10149_v59, %v3794_v60 }
 0x4d9   : > { %v10152_v0 = vpop.f32.mrb[6].mxu0  ;;  %10197 = vmatmul.mubr.msk.f32.gmra.mrb[2].mxu1 %vm3933_vm3, %v12681_v61  ;;  %10858 = vmatprep.subr.bf16.mxu1 %v10857_v62 }
 0x4da   : > { %v3804_v1 = vpop.f32.mrb[7].mxu0  ;;  %10199 = vmatprep.mubr.msk.f32.mxu1 %vm3933_vm3, %v12686_v63 }
 0x4db   : > { %v10861_v3 = vpack.c.bf16 %v10152_v0, %v3804_v1 }
 0x4dd   : > { %v10155_v5 = vpop.f32.mrb[8].mxu0  ;;  %10200 = vmatmul.mubr.msk.f32.gmra.mrb[4].mxu1 %vm3933_vm3, %v12695_v2 }
 0x4de   : > { %v3814_v6 = vpop.f32.mrb[9].mxu0  ;;  %10202 = vmatprep.mubr.msk.f32.mxu1 %vm3933_vm3, %v12700_v4 }
 0x4df   : > { %v12711_v8 = vpack.c.bf16 %v10155_v5, %v3814_v6 }
 0x4e1   : > { %v10158_v9 = vpop.f32.mrb[10].mxu0  ;;  %10203 = vmatmul.mubr.msk.f32.gmra.mrb[6].mxu1 %vm3933_vm3, %v12709_v7 }
 0x4e2   : > { %v3824_v10 = vpop.f32.mrb[11].mxu0  ;;  %10209 = vmatprep.mubr.msk.f32.mxu1 %vm3933_vm3, %v12658_v48 }
 0x4e3   : > { %v10869_v11 = vpack.c.bf16 %v10158_v9, %v3824_v10 }
 0x4e5   : > { %10210 = vmatmul.mubr.msk.f32.vlgmr.msra.gmra.mrb[8].mxu1 %vm3933_vm3, %v12667_v56  ;;  %10870 = vmatprep.subr.bf16.mxu0 %v10869_v11  ;;  %v10161_v14 = vpop.f32.mrb[12].mxu0 }
 0x4e6   : > { %10860 = vmatpush3.bf16.msra.mxu1 %v10857_v62  ;;  %10872 = vmatpush3.bf16.msra.mxu0 %v10869_v11  ;;  %v3834_v37 = vpop.f32.mrb[13].mxu0 }
 0x4e7   : > { %10862 = vmatprep.subr.bf16.mxu1 %v10861_v3  ;;  %10212 = vmatprep.mubr.msk.f32.mxu1 %vm3933_vm3, %v12672_v58  ;;  %v12721_v39 = vpack.c.bf16 %v10161_v14, %v3834_v37 }
 0x4e9   : > { %10213 = vmatmul.mubr.msk.f32.gmra.mrb[10].mxu1 %vm3933_vm3, %v12681_v61  ;;  %v10164_v42 = vpop.f32.mrb[14].mxu0  ;;  %10274 = vmatmul.mubr.msk.f32.vlgmr.msra.gmra.mrb[32].mxu0 %vm3933_vm3, %v12667_v56 }
 0x4ea   : > { %10215 = vmatprep.mubr.msk.f32.mxu1 %vm3933_vm3, %v12686_v63  ;;  %v3844_v44 = vpop.f32.mrb[15].mxu0  ;;  %10276 = vmatprep.mubr.msk.f32.mxu0 %vm3933_vm3, %v12672_v58 }
 0x4eb   : > { %v10877_v47 = vpack.c.bf16 %v10164_v42, %v3844_v44 }
 0x4ed   : > { %10216 = vmatmul.mubr.msk.f32.gmra.mrb[12].mxu1 %vm3933_vm3, %v12695_v2  ;;  %10878 = vmatprep.subr.bf16.mxu0 %v10877_v47  ;;  %v10167_v49 = vpop.f32.mrb[16].mxu0 }
 0x4ee   : > { %10218 = vmatprep.mubr.msk.f32.mxu1 %vm3933_vm3, %v12700_v4  ;;  %10880 = vmatpush3.bf16.msra.mxu0 %v10877_v47  ;;  %v3854_v52 = vpop.f32.mrb[17].mxu0 }
 0x4ef   : > { %10277 = vmatmul.mubr.msk.f32.gmra.mrb[34].mxu0 %vm3933_vm3, %v12681_v61  ;;  %v12737_v12 = vpack.c.bf16 %v10167_v49, %v3854_v52 }
 0x4f0   : > { %10279 = vmatprep.mubr.msk.f32.mxu0 %vm3933_vm3, %v12686_v63 }
 0x4f1   : > { %10219 = vmatmul.mubr.msk.f32.gmra.mrb[14].mxu1 %vm3933_vm3, %v12709_v7  ;;  %v10170_v13 = vpop.f32.mrb[18].mxu0 }
 0x4f2   : > { %10225 = vmatprep.mubr.msk.f32.mxu1 %vm3933_vm3, %v12658_v48  ;;  %v3864_v15 = vpop.f32.mrb[19].mxu0 }
 0x4f3   : > { %10280 = vmatmul.mubr.msk.f32.gmra.mrb[36].mxu0 %vm3933_vm3, %v12695_v2  ;;  %v10885_v16 = vpack.c.bf16 %v10170_v13, %v3864_v15 }
 0x4f4   : > { %10282 = vmatprep.mubr.msk.f32.mxu0 %vm3933_vm3, %v12700_v4 }
 0x4f5   : > { %10226 = vmatmul.mubr.msk.f32.vlgmr.msra.gmra.mrb[16].mxu1 %vm3933_vm3, %v12667_v56  ;;  %10886 = vmatprep.subr.bf16.mxu0 %v10885_v16  ;;  %v10173_v17 = vpop.f32.mrb[20].mxu0 }
 0x4f6   : > { %10864 = vmatpush3.bf16.msra.mxu1 %v10861_v3  ;;  %10228 = vmatprep.mubr.msk.f32.mxu1 %vm3933_vm3, %v12672_v58  ;;  %v3874_v18 = vpop.f32.mrb[21].mxu0 }
 0x4f7   : > { %10866 = vmatprep.subr.bf16.mxu1 %v12711_v8  ;;  %10283 = vmatmul.mubr.msk.f32.gmra.mrb[38].mxu0 %vm3933_vm3, %v12709_v7  ;;  %v12756_v19 = vpack.c.bf16 %v10173_v17, %v3874_v18 }
 0x4f8   : > { %10305 = vmatprep.mubr.msk.f32.mxu0 %vm3933_vm3, %v12658_v48 }
 0x4f9   : > { %10229 = vmatmul.mubr.msk.f32.gmra.mrb[18].mxu1 %vm3933_vm3, %v12681_v61  ;;  %v10176_v20 = vpop.f32.mrb[22].mxu0 }
 0x4fa   : > { %10231 = vmatprep.mubr.msk.f32.mxu1 %vm3933_vm3, %v12686_v63  ;;  %v3884_v21 = vpop.f32.mrb[23].mxu0 }
 0x4fb   : > { %10306 = vmatmul.mubr.msk.f32.vlgmr.msra.gmra.mrb[40].mxu0 %vm3933_vm3, %v12667_v56  ;;  %v10893_v22 = vpack.c.bf16 %v10176_v20, %v3884_v21 }
 0x4fc   : > { %10888 = vmatpush3.bf16.msra.mxu0 %v10885_v16  ;;  %10308 = vmatprep.mubr.msk.f32.mxu0 %vm3933_vm3, %v12672_v58 }
 0x4fd   : > { %10232 = vmatmul.mubr.msk.f32.gmra.mrb[20].mxu1 %vm3933_vm3, %v12695_v2  ;;  %10894 = vmatprep.subr.bf16.mxu0 %v10893_v22  ;;  %v10179_v23 = vpop.f32.mrb[24].mxu0 }
 0x4fe   : > { %10234 = vmatprep.mubr.msk.f32.mxu1 %vm3933_vm3, %v12700_v4  ;;  %v3894_v24 = vpop.f32.mrb[25].mxu0 }
 0x4ff   : > { %10309 = vmatmul.mubr.msk.f32.gmra.mrb[42].mxu0 %vm3933_vm3, %v12681_v61  ;;  %v12774_v25 = vpack.c.bf16 %v10179_v23, %v3894_v24 }
 0x500   : > { %10311 = vmatprep.mubr.msk.f32.mxu0 %vm3933_vm3, %v12686_v63 }
 0x501   : > { %10235 = vmatmul.mubr.msk.f32.gmra.mrb[22].mxu1 %vm3933_vm3, %v12709_v7  ;;  %v10182_v26 = vpop.f32.mrb[26].mxu0 }
 0x502   : > { %10241 = vmatprep.mubr.msk.f32.mxu1 %vm3933_vm3, %v12658_v48  ;;  %v3904_v27 = vpop.f32.mrb[27].mxu0 }
 0x503   : > { %10312 = vmatmul.mubr.msk.f32.gmra.mrb[44].mxu0 %vm3933_vm3, %v12695_v2  ;;  %v10901_v28 = vpack.c.bf16 %v10182_v26, %v3904_v27 }
 0x504   : > { %10314 = vmatprep.mubr.msk.f32.mxu0 %vm3933_vm3, %v12700_v4 }
 0x505   : > { %10242 = vmatmul.mubr.msk.f32.vlgmr.msra.gmra.mrb[24].mxu1 %vm3933_vm3, %v12667_v56  ;;  %v10185_v29 = vpop.f32.mrb[28].mxu0 }
 0x506   : > { %10868 = vmatpush3.bf16.msra.mxu1 %v12711_v8  ;;  %10244 = vmatprep.mubr.msk.f32.mxu1 %vm3933_vm3, %v12672_v58  ;;  %v3914_v30 = vpop.f32.mrb[29].mxu0 }
 0x507   : > { %10874 = vmatprep.subr.bf16.mxu1 %v12721_v39  ;;  %10315 = vmatmul.mubr.msk.f32.gmra.mrb[46].mxu0 %vm3933_vm3, %v12709_v7  ;;  %v12794_v31 = vpack.c.bf16 %v10185_v29, %v3914_v30 }
 0x508   : > { %10337 = vmatprep.mubr.msk.f32.mxu0 %vm3933_vm3, %v12658_v48 }
 0x509   : > { %10245 = vmatmul.mubr.msk.f32.gmra.mrb[26].mxu1 %vm3933_vm3, %v12681_v61  ;;  %v10188_v32 = vpop.f32.mrb[30].mxu0 }
 0x50a   : > { %10247 = vmatprep.mubr.msk.f32.mxu1 %vm3933_vm3, %v12686_v63  ;;  %v3924_v33 = vpop.f32.mrb[31].mxu0 }
 0x50b   : > { %10338 = vmatmul.mubr.msk.f32.vlgmr.msra.gmra.mrb[48].mxu0 %vm3933_vm3, %v12667_v56  ;;  %v10909_v34 = vpack.c.bf16 %v10188_v32, %v3924_v33 }
 0x50c   : > { %10896 = vmatpush3.bf16.msra.mxu0 %v10893_v22  ;;  %10340 = vmatprep.mubr.msk.f32.mxu0 %vm3933_vm3, %v12672_v58 }
 0x50d   : > { %10248 = vmatmul.mubr.msk.f32.gmra.mrb[28].mxu1 %vm3933_vm3, %v12695_v2  ;;  %10902 = vmatprep.subr.bf16.mxu0 %v10901_v28 }
 0x50e   : > { %10250 = vmatprep.mubr.msk.f32.mxu1 %vm3933_vm3, %v12700_v4 }
 0x50f   : > { %10341 = vmatmul.mubr.msk.f32.gmra.mrb[50].mxu0 %vm3933_vm3, %v12681_v61 }
 0x510   : > { %10343 = vmatprep.mubr.msk.f32.mxu0 %vm3933_vm3, %v12686_v63 }
 0x511   : > { %10251 = vmatmul.mubr.msk.f32.gmra.mrb[30].mxu1 %vm3933_vm3, %v12709_v7 }
 0x512   : > { %10257 = vmatprep.mubr.msk.f32.mxu1 %vm3933_vm3, %v12658_v48 }
 0x513   : > { %10344 = vmatmul.mubr.msk.f32.gmra.mrb[52].mxu0 %vm3933_vm3, %v12695_v2 }
 0x514   : > { %10346 = vmatprep.mubr.msk.f32.mxu0 %vm3933_vm3, %v12700_v4 }
 0x515   : > { %10258 = vmatmul.mubr.msk.f32.vlgmr.msra.gmra.mrb[32].mxu1 %vm3933_vm3, %v12667_v56 }
 0x516   : > { %10876 = vmatpush3.bf16.msra.mxu1 %v12721_v39  ;;  %10260 = vmatprep.mubr.msk.f32.mxu1 %vm3933_vm3, %v12672_v58 }
 0x517   : > { %10882 = vmatprep.subr.bf16.mxu1 %v12737_v12  ;;  %10347 = vmatmul.mubr.msk.f32.gmra.mrb[54].mxu0 %vm3933_vm3, %v12709_v7 }
 0x518   : > { %10369 = vmatprep.mubr.msk.f32.mxu0 %vm3933_vm3, %v12658_v48 }
 0x519   : > { %10261 = vmatmul.mubr.msk.f32.gmra.mrb[34].mxu1 %vm3933_vm3, %v12681_v61 }
 0x51a   : > { %10263 = vmatprep.mubr.msk.f32.mxu1 %vm3933_vm3, %v12686_v63 }
 0x51b   : > { %10370 = vmatmul.mubr.msk.f32.vlgmr.msra.gmra.mrb[56].mxu0 %vm3933_vm3, %v12667_v56 }
 0x51c   : > { %10904 = vmatpush3.bf16.msra.mxu0 %v10901_v28  ;;  %10372 = vmatprep.mubr.msk.f32.mxu0 %vm3933_vm3, %v12672_v58 }
 0x51d   : > { %10264 = vmatmul.mubr.msk.f32.gmra.mrb[36].mxu1 %vm3933_vm3, %v12695_v2  ;;  %10910 = vmatprep.subr.bf16.mxu0 %v10909_v34 }
 0x51e   : > { %10266 = vmatprep.mubr.msk.f32.mxu1 %vm3933_vm3, %v12700_v4 }
 0x51f   : > { %10373 = vmatmul.mubr.msk.f32.gmra.mrb[58].mxu0 %vm3933_vm3, %v12681_v61 }
 0x520   : > { %10375 = vmatprep.mubr.msk.f32.mxu0 %vm3933_vm3, %v12686_v63 }
 0x521   : > { %10267 = vmatmul.mubr.msk.f32.gmra.mrb[38].mxu1 %vm3933_vm3, %v12709_v7 }
 0x522   : > { %10289 = vmatprep.mubr.msk.f32.mxu1 %vm3933_vm3, %v12658_v48 }
 0x523   : > { %10376 = vmatmul.mubr.msk.f32.gmra.mrb[60].mxu0 %vm3933_vm3, %v12695_v2 }
 0x524   : > { %10378 = vmatprep.mubr.msk.f32.mxu0 %vm3933_vm3, %v12700_v4 }
 0x525   : > { %10290 = vmatmul.mubr.msk.f32.vlgmr.msra.gmra.mrb[40].mxu1 %vm3933_vm3, %v12667_v56 }
 0x526   : > { %10884 = vmatpush3.bf16.msra.mxu1 %v12737_v12  ;;  %10292 = vmatprep.mubr.msk.f32.mxu1 %vm3933_vm3, %v12672_v58 }
 0x527   : > { %10890 = vmatprep.subr.bf16.mxu1 %v12756_v19  ;;  %10379 = vmatmul.mubr.msk.f32.gmra.mrb[62].mxu0 %vm3933_vm3, %v12709_v7 }
 0x528   : > { %10401 = vmatprep.mubr.msk.f32.mxu0 %vm3933_vm3, %v12658_v48 }
 0x529   : > { %10293 = vmatmul.mubr.msk.f32.gmra.mrb[42].mxu1 %vm3933_vm3, %v12681_v61 }
 0x52a   : > { %10295 = vmatprep.mubr.msk.f32.mxu1 %vm3933_vm3, %v12686_v63 }
 0x52b   : > { %10402 = vmatmul.mubr.msk.f32.vlgmr.msra.gmra.mrb[64].mxu0 %vm3933_vm3, %v12667_v56 }
 0x52c   : > { %10912 = vmatpush3.bf16.msra.mxu0 %v10909_v34  ;;  %10404 = vmatprep.mubr.msk.f32.mxu0 %vm3933_vm3, %v12672_v58 }
 0x52d   : > { %10296 = vmatmul.mubr.msk.f32.gmra.mrb[44].mxu1 %vm3933_vm3, %v12695_v2 }
 0x52e   : > { %10298 = vmatprep.mubr.msk.f32.mxu1 %vm3933_vm3, %v12700_v4 }
 0x52f   : > { %10405 = vmatmul.mubr.msk.f32.gmra.mrb[66].mxu0 %vm3933_vm3, %v12681_v61 }
 0x530   : > { %10407 = vmatprep.mubr.msk.f32.mxu0 %vm3933_vm3, %v12686_v63 }
 0x531   : > { %10299 = vmatmul.mubr.msk.f32.gmra.mrb[46].mxu1 %vm3933_vm3, %v12709_v7 }
 0x532   : > { %10321 = vmatprep.mubr.msk.f32.mxu1 %vm3933_vm3, %v12658_v48 }
 0x533   : > { %10408 = vmatmul.mubr.msk.f32.gmra.mrb[68].mxu0 %vm3933_vm3, %v12695_v2 }
 0x534   : > { %10410 = vmatprep.mubr.msk.f32.mxu0 %vm3933_vm3, %v12700_v4 }
 0x535   : > { %10322 = vmatmul.mubr.msk.f32.vlgmr.msra.gmra.mrb[48].mxu1 %vm3933_vm3, %v12667_v56 }
 0x536   : > { %10892 = vmatpush3.bf16.msra.mxu1 %v12756_v19  ;;  %10324 = vmatprep.mubr.msk.f32.mxu1 %vm3933_vm3, %v12672_v58 }
 0x537   : > { %10898 = vmatprep.subr.bf16.mxu1 %v12774_v25  ;;  %10411 = vmatmul.mubr.msk.f32.gmra.mrb[70].mxu0 %vm3933_vm3, %v12709_v7 }
 0x538   : > { %10433 = vmatprep.mubr.msk.f32.mxu0 %vm3933_vm3, %v12658_v48 }
 0x539   : > { %10325 = vmatmul.mubr.msk.f32.gmra.mrb[50].mxu1 %vm3933_vm3, %v12681_v61 }
 0x53a   : > { %10327 = vmatprep.mubr.msk.f32.mxu1 %vm3933_vm3, %v12686_v63 }
 0x53b   : > { %10434 = vmatmul.mubr.msk.f32.vlgmr.msra.gmra.mrb[72].mxu0 %vm3933_vm3, %v12667_v56 }
 0x53c   : > { %10436 = vmatprep.mubr.msk.f32.mxu0 %vm3933_vm3, %v12672_v58 }
 0x53d   : > { %10328 = vmatmul.mubr.msk.f32.gmra.mrb[52].mxu1 %vm3933_vm3, %v12695_v2 }
 0x53e   : > { %10330 = vmatprep.mubr.msk.f32.mxu1 %vm3933_vm3, %v12700_v4 }
 0x53f   : > { %10437 = vmatmul.mubr.msk.f32.gmra.mrb[74].mxu0 %vm3933_vm3, %v12681_v61 }
 0x540   : > { %10439 = vmatprep.mubr.msk.f32.mxu0 %vm3933_vm3, %v12686_v63 }
 0x541   : > { %10331 = vmatmul.mubr.msk.f32.gmra.mrb[54].mxu1 %vm3933_vm3, %v12709_v7 }
 0x542   : > { %10353 = vmatprep.mubr.msk.f32.mxu1 %vm3933_vm3, %v12658_v48 }
 0x543   : > { %10440 = vmatmul.mubr.msk.f32.gmra.mrb[76].mxu0 %vm3933_vm3, %v12695_v2 }
 0x544   : > { %10442 = vmatprep.mubr.msk.f32.mxu0 %vm3933_vm3, %v12700_v4 }
 0x545   : > { %10354 = vmatmul.mubr.msk.f32.vlgmr.msra.gmra.mrb[56].mxu1 %vm3933_vm3, %v12667_v56 }
 0x546   : > { %10900 = vmatpush3.bf16.msra.mxu1 %v12774_v25  ;;  %10356 = vmatprep.mubr.msk.f32.mxu1 %vm3933_vm3, %v12672_v58 }
 0x547   : > { %10906 = vmatprep.subr.bf16.mxu1 %v12794_v31  ;;  %10443 = vmatmul.mubr.msk.f32.gmra.mrb[78].mxu0 %vm3933_vm3, %v12709_v7 }
 0x549   : > { %10357 = vmatmul.mubr.msk.f32.gmra.mrb[58].mxu1 %vm3933_vm3, %v12681_v61 }
 0x54a   : > { %10359 = vmatprep.mubr.msk.f32.mxu1 %vm3933_vm3, %v12686_v63 }
 0x54d   : > { %10360 = vmatmul.mubr.msk.f32.gmra.mrb[60].mxu1 %vm3933_vm3, %v12695_v2 }
 0x54e   : > { %10362 = vmatprep.mubr.msk.f32.mxu1 %vm3933_vm3, %v12700_v4 }
 0x551   : > { %10363 = vmatmul.mubr.msk.f32.gmra.mrb[62].mxu1 %vm3933_vm3, %v12709_v7 }
 0x552   : > { %10385 = vmatprep.mubr.msk.f32.mxu1 %vm3933_vm3, %v12658_v48 }
 0x555   : > { %10386 = vmatmul.mubr.msk.f32.vlgmr.msra.gmra.mrb[64].mxu1 %vm3933_vm3, %v12667_v56 }
 0x556   : > { %10908 = vmatpush3.bf16.msra.mxu1 %v12794_v31  ;;  %10388 = vmatprep.mubr.msk.f32.mxu1 %vm3933_vm3, %v12672_v58 }
 0x559   : > { %10389 = vmatmul.mubr.msk.f32.gmra.mrb[66].mxu1 %vm3933_vm3, %v12681_v61 }
 0x55a   : > { %10391 = vmatprep.mubr.msk.f32.mxu1 %vm3933_vm3, %v12686_v63 }
 0x55d   : > { %10392 = vmatmul.mubr.msk.f32.gmra.mrb[68].mxu1 %vm3933_vm3, %v12695_v2 }
 0x55e   : > { %10394 = vmatprep.mubr.msk.f32.mxu1 %vm3933_vm3, %v12700_v4 }
 0x561   : > { %10395 = vmatmul.mubr.msk.f32.gmra.mrb[70].mxu1 %vm3933_vm3, %v12709_v7 }
 0x562   : > { %10417 = vmatprep.mubr.msk.f32.mxu1 %vm3933_vm3, %v12658_v48 }
 0x565   : > { %10418 = vmatmul.mubr.msk.f32.vlgmr.msra.gmra.mrb[72].mxu1 %vm3933_vm3, %v12667_v56 }
 0x566   : > { %10420 = vmatprep.mubr.msk.f32.mxu1 %vm3933_vm3, %v12672_v58 }
 0x569   : > { %10421 = vmatmul.mubr.msk.f32.gmra.mrb[74].mxu1 %vm3933_vm3, %v12681_v61 }
 0x56a   : > { %10423 = vmatprep.mubr.msk.f32.mxu1 %vm3933_vm3, %v12686_v63 }
 0x56d   : > { %10424 = vmatmul.mubr.msk.f32.gmra.mrb[76].mxu1 %vm3933_vm3, %v12695_v2 }
 0x56e   : > { %10426 = vmatprep.mubr.msk.f32.mxu1 %vm3933_vm3, %v12700_v4 }
 0x571   : > { %10427 = vmatmul.mubr.msk.f32.gmra.mrb[78].mxu1 %vm3933_vm3, %v12709_v7 }
 0x5a8   : > { %v10195_v35 = vpop.f32.mrb[0].mxu1 }
 0x5a9   : > { %4064 = vst [vmem:[%s11845_s15 + $0x8] sm:$0xff] %v10195_v35  ;;  %v4024_v36 = vpop.f32.mrb[1].mxu1 }
 0x5aa   : > { %4063 = vst [vmem:[%s11845_s15] sm:$0xff] %v4024_v36 }
 0x5ac   : > { %v10198_v38 = vpop.f32.mrb[2].mxu1 }
 0x5ad   : > { %4066 = vst [vmem:[%s11845_s15 + $0x18] sm:$0xff] %v10198_v38  ;;  %v4034_v40 = vpop.f32.mrb[3].mxu1 }
 0x5ae   : > { %4065 = vst [vmem:[%s11845_s15 + $0x10] sm:$0xff] %v4034_v40 }
 0x5b0   : > { %v10201_v41 = vpop.f32.mrb[4].mxu1 }
 0x5b1   : > { %4068 = vst [vmem:[%s11845_s15 + $0x28] sm:$0xff] %v10201_v41  ;;  %v4044_v43 = vpop.f32.mrb[5].mxu1 }
 0x5b2   : > { %4067 = vst [vmem:[%s11845_s15 + $0x20] sm:$0xff] %v4044_v43 }
 0x5b4   : > { %v10204_v45 = vpop.f32.mrb[6].mxu1 }
 0x5b5   : > { %4070 = vst [vmem:[%s11845_s15 + $0x38] sm:$0xff] %v10204_v45  ;;  %v4054_v46 = vpop.f32.mrb[7].mxu1 }
 0x5b6   : > { %4069 = vst [vmem:[%s11845_s15 + $0x30] sm:$0xff] %v4054_v46 }
 0x5b8   : > { %v10211_v48 = vpop.f32.mrb[8].mxu1 }
 0x5b9   : > { %8553 = vst [vmem:[%s11845_s15 + $0x48] sm:$0xff] %v10211_v48  ;;  %v4137_v50 = vpop.f32.mrb[9].mxu1 }
 0x5ba   : > { %8552 = vst [vmem:[%s11845_s15 + $0x40] sm:$0xff] %v4137_v50 }
 0x5bc   : > { %v10214_v51 = vpop.f32.mrb[10].mxu1  ;;  %v10275_v53 = vpop.f32.mrb[32].mxu0 }
 0x5bd   : > { %8555 = vst [vmem:[%s11845_s15 + $0x58] sm:$0xff] %v10214_v51  ;;  %v4147_v54 = vpop.f32.mrb[11].mxu1  ;;  %8617 = vst [vmem:[%s11845_s15 + $0x148] sm:$0xff] %v10275_v53  ;;  %v4593_v55 = vpop.f32.mrb[33].mxu0 }
 0x5be   : > { %8554 = vst [vmem:[%s11845_s15 + $0x50] sm:$0xff] %v4147_v54  ;;  %8616 = vst [vmem:[%s11845_s15 + $0x140] sm:$0xff] %v4593_v55 }
 0x5c0   : > { %v10217_v56 = vpop.f32.mrb[12].mxu1 }
 0x5c1   : > { %8557 = vst [vmem:[%s11845_s15 + $0x68] sm:$0xff] %v10217_v56  ;;  %v4157_v57 = vpop.f32.mrb[13].mxu1 }
 0x5c2   : > { %8556 = vst [vmem:[%s11845_s15 + $0x60] sm:$0xff] %v4157_v57  ;;  %v10278_v58 = vpop.f32.mrb[34].mxu0 }
 0x5c3   : > { %8619 = vst [vmem:[%s11845_s15 + $0x158] sm:$0xff] %v10278_v58  ;;  %v4603_v59 = vpop.f32.mrb[35].mxu0 }
 0x5c4   : > { %v10220_v60 = vpop.f32.mrb[14].mxu1  ;;  %8618 = vst [vmem:[%s11845_s15 + $0x150] sm:$0xff] %v4603_v59 }
 0x5c5   : > { %8559 = vst [vmem:[%s11845_s15 + $0x78] sm:$0xff] %v10220_v60  ;;  %v4167_v61 = vpop.f32.mrb[15].mxu1 }
 0x5c6   : > { %8558 = vst [vmem:[%s11845_s15 + $0x70] sm:$0xff] %v4167_v61  ;;  %v10281_v62 = vpop.f32.mrb[36].mxu0 }
 0x5c7   : > { %8621 = vst [vmem:[%s11845_s15 + $0x168] sm:$0xff] %v10281_v62  ;;  %v4613_v63 = vpop.f32.mrb[37].mxu0 }
 0x5c8   : > { %v10227_v0 = vpop.f32.mrb[16].mxu1  ;;  %8620 = vst [vmem:[%s11845_s15 + $0x160] sm:$0xff] %v4613_v63 }
 0x5c9   : > { %8569 = vst [vmem:[%s11845_s15 + $0x88] sm:$0xff] %v10227_v0  ;;  %v4251_v1 = vpop.f32.mrb[17].mxu1 }
 0x5ca   : > { %8568 = vst [vmem:[%s11845_s15 + $0x80] sm:$0xff] %v4251_v1  ;;  %v10284_v2 = vpop.f32.mrb[38].mxu0 }
 0x5cb   : > { %8623 = vst [vmem:[%s11845_s15 + $0x178] sm:$0xff] %v10284_v2  ;;  %v4623_v3 = vpop.f32.mrb[39].mxu0 }
 0x5cc   : > { %v10230_v4 = vpop.f32.mrb[18].mxu1  ;;  %8622 = vst [vmem:[%s11845_s15 + $0x170] sm:$0xff] %v4623_v3 }
 0x5cd   : > { %8571 = vst [vmem:[%s11845_s15 + $0x98] sm:$0xff] %v10230_v4  ;;  %v4261_v5 = vpop.f32.mrb[19].mxu1 }
 0x5ce   : > { %8570 = vst [vmem:[%s11845_s15 + $0x90] sm:$0xff] %v4261_v5  ;;  %v10307_v6 = vpop.f32.mrb[40].mxu0 }
 0x5cf   : > { %8649 = vst [vmem:[%s11845_s15 + $0x1c8] sm:$0xff] %v10307_v6  ;;  %v4821_v7 = vpop.f32.mrb[41].mxu0 }
 0x5d0   : > { %v10233_v8 = vpop.f32.mrb[20].mxu1  ;;  %8648 = vst [vmem:[%s11845_s15 + $0x1c0] sm:$0xff] %v4821_v7 }
 0x5d1   : > { %8573 = vst [vmem:[%s11845_s15 + $0xa8] sm:$0xff] %v10233_v8  ;;  %v4271_v9 = vpop.f32.mrb[21].mxu1 }
 0x5d2   : > { %8572 = vst [vmem:[%s11845_s15 + $0xa0] sm:$0xff] %v4271_v9  ;;  %v10310_v10 = vpop.f32.mrb[42].mxu0 }
 0x5d3   : > { %8651 = vst [vmem:[%s11845_s15 + $0x1d8] sm:$0xff] %v10310_v10  ;;  %v4831_v11 = vpop.f32.mrb[43].mxu0 }
 0x5d4   : > { %v10236_v14 = vpop.f32.mrb[22].mxu1  ;;  %8650 = vst [vmem:[%s11845_s15 + $0x1d0] sm:$0xff] %v4831_v11 }
 0x5d5   : > { %8575 = vst [vmem:[%s11845_s15 + $0xb8] sm:$0xff] %v10236_v14  ;;  %v4281_v37 = vpop.f32.mrb[23].mxu1 }
 0x5d6   : > { %8574 = vst [vmem:[%s11845_s15 + $0xb0] sm:$0xff] %v4281_v37  ;;  %v10313_v39 = vpop.f32.mrb[44].mxu0 }
 0x5d7   : > { %8653 = vst [vmem:[%s11845_s15 + $0x1e8] sm:$0xff] %v10313_v39  ;;  %v4841_v42 = vpop.f32.mrb[45].mxu0 }
 0x5d8   : > { %v10243_v44 = vpop.f32.mrb[24].mxu1  ;;  %8652 = vst [vmem:[%s11845_s15 + $0x1e0] sm:$0xff] %v4841_v42 }
 0x5d9   : > { %8585 = vst [vmem:[%s11845_s15 + $0xc8] sm:$0xff] %v10243_v44  ;;  %v4365_v47 = vpop.f32.mrb[25].mxu1 }
 0x5da   : > { %8584 = vst [vmem:[%s11845_s15 + $0xc0] sm:$0xff] %v4365_v47  ;;  %v10316_v49 = vpop.f32.mrb[46].mxu0 }
 0x5db   : > { %8655 = vst [vmem:[%s11845_s15 + $0x1f8] sm:$0xff] %v10316_v49  ;;  %v4851_v52 = vpop.f32.mrb[47].mxu0 }
 0x5dc   : > { %v10246_v12 = vpop.f32.mrb[26].mxu1  ;;  %8654 = vst [vmem:[%s11845_s15 + $0x1f0] sm:$0xff] %v4851_v52 }
 0x5dd   : > { %8587 = vst [vmem:[%s11845_s15 + $0xd8] sm:$0xff] %v10246_v12  ;;  %v4375_v13 = vpop.f32.mrb[27].mxu1 }
 0x5de   : > { %8586 = vst [vmem:[%s11845_s15 + $0xd0] sm:$0xff] %v4375_v13  ;;  %v10339_v15 = vpop.f32.mrb[48].mxu0 }
 0x5df   : > { %8681 = vst [vmem:[%s11845_s15 + $0x248] sm:$0xff] %v10339_v15  ;;  %v5049_v16 = vpop.f32.mrb[49].mxu0 }
 0x5e0   : > { %v10249_v17 = vpop.f32.mrb[28].mxu1  ;;  %8680 = vst [vmem:[%s11845_s15 + $0x240] sm:$0xff] %v5049_v16 }
 0x5e1   : > { %8589 = vst [vmem:[%s11845_s15 + $0xe8] sm:$0xff] %v10249_v17  ;;  %v4385_v18 = vpop.f32.mrb[29].mxu1 }
 0x5e2   : > { %8588 = vst [vmem:[%s11845_s15 + $0xe0] sm:$0xff] %v4385_v18  ;;  %v10342_v19 = vpop.f32.mrb[50].mxu0 }
 0x5e3   : > { %8683 = vst [vmem:[%s11845_s15 + $0x258] sm:$0xff] %v10342_v19  ;;  %v5059_v20 = vpop.f32.mrb[51].mxu0 }
 0x5e4   : > { %v10252_v21 = vpop.f32.mrb[30].mxu1  ;;  %8682 = vst [vmem:[%s11845_s15 + $0x250] sm:$0xff] %v5059_v20 }
 0x5e5   : > { %8591 = vst [vmem:[%s11845_s15 + $0xf8] sm:$0xff] %v10252_v21  ;;  %v4395_v22 = vpop.f32.mrb[31].mxu1 }
 0x5e6   : > { %8590 = vst [vmem:[%s11845_s15 + $0xf0] sm:$0xff] %v4395_v22  ;;  %v10345_v23 = vpop.f32.mrb[52].mxu0 }
 0x5e7   : > { %8685 = vst [vmem:[%s11845_s15 + $0x268] sm:$0xff] %v10345_v23  ;;  %v5069_v24 = vpop.f32.mrb[53].mxu0 }
 0x5e8   : > { %v10259_v25 = vpop.f32.mrb[32].mxu1  ;;  %8684 = vst [vmem:[%s11845_s15 + $0x260] sm:$0xff] %v5069_v24 }
 0x5e9   : > { %8601 = vst [vmem:[%s11845_s15 + $0x108] sm:$0xff] %v10259_v25  ;;  %v4479_v26 = vpop.f32.mrb[33].mxu1 }
 0x5ea   : > { %8600 = vst [vmem:[%s11845_s15 + $0x100] sm:$0xff] %v4479_v26  ;;  %v10348_v27 = vpop.f32.mrb[54].mxu0 }
 0x5eb   : > { %8687 = vst [vmem:[%s11845_s15 + $0x278] sm:$0xff] %v10348_v27  ;;  %v5079_v28 = vpop.f32.mrb[55].mxu0 }
 0x5ec   : > { %v10262_v29 = vpop.f32.mrb[34].mxu1  ;;  %8686 = vst [vmem:[%s11845_s15 + $0x270] sm:$0xff] %v5079_v28 }
 0x5ed   : > { %8603 = vst [vmem:[%s11845_s15 + $0x118] sm:$0xff] %v10262_v29  ;;  %v4489_v30 = vpop.f32.mrb[35].mxu1 }
 0x5ee   : > { %8602 = vst [vmem:[%s11845_s15 + $0x110] sm:$0xff] %v4489_v30  ;;  %v10371_v31 = vpop.f32.mrb[56].mxu0 }
 0x5ef   : > { %8713 = vst [vmem:[%s11845_s15 + $0x2c8] sm:$0xff] %v10371_v31  ;;  %v5277_v32 = vpop.f32.mrb[57].mxu0 }
 0x5f0   : > { %v10265_v33 = vpop.f32.mrb[36].mxu1  ;;  %8712 = vst [vmem:[%s11845_s15 + $0x2c0] sm:$0xff] %v5277_v32 }
 0x5f1   : > { %8605 = vst [vmem:[%s11845_s15 + $0x128] sm:$0xff] %v10265_v33  ;;  %v4499_v34 = vpop.f32.mrb[37].mxu1 }
 0x5f2   : > { %8604 = vst [vmem:[%s11845_s15 + $0x120] sm:$0xff] %v4499_v34  ;;  %v10374_v35 = vpop.f32.mrb[58].mxu0 }
 0x5f3   : > { %8715 = vst [vmem:[%s11845_s15 + $0x2d8] sm:$0xff] %v10374_v35  ;;  %v5287_v36 = vpop.f32.mrb[59].mxu0 }
 0x5f4   : > { %v10268_v38 = vpop.f32.mrb[38].mxu1  ;;  %8714 = vst [vmem:[%s11845_s15 + $0x2d0] sm:$0xff] %v5287_v36 }
 0x5f5   : > { %8607 = vst [vmem:[%s11845_s15 + $0x138] sm:$0xff] %v10268_v38  ;;  %v4509_v40 = vpop.f32.mrb[39].mxu1 }
 0x5f6   : > { %8606 = vst [vmem:[%s11845_s15 + $0x130] sm:$0xff] %v4509_v40  ;;  %v10377_v41 = vpop.f32.mrb[60].mxu0 }
 0x5f7   : > { %8717 = vst [vmem:[%s11845_s15 + $0x2e8] sm:$0xff] %v10377_v41  ;;  %v5297_v43 = vpop.f32.mrb[61].mxu0 }
 0x5f8   : > { %v10291_v45 = vpop.f32.mrb[40].mxu1  ;;  %8716 = vst [vmem:[%s11845_s15 + $0x2e0] sm:$0xff] %v5297_v43 }
 0x5f9   : > { %8633 = vst [vmem:[%s11845_s15 + $0x188] sm:$0xff] %v10291_v45  ;;  %v4707_v46 = vpop.f32.mrb[41].mxu1 }
 0x5fa   : > { %8632 = vst [vmem:[%s11845_s15 + $0x180] sm:$0xff] %v4707_v46  ;;  %v10380_v48 = vpop.f32.mrb[62].mxu0 }
 0x5fb   : > { %8719 = vst [vmem:[%s11845_s15 + $0x2f8] sm:$0xff] %v10380_v48  ;;  %v5307_v50 = vpop.f32.mrb[63].mxu0 }
 0x5fc   : > { %v10294_v51 = vpop.f32.mrb[42].mxu1  ;;  %8718 = vst [vmem:[%s11845_s15 + $0x2f0] sm:$0xff] %v5307_v50 }
 0x5fd   : > { %8635 = vst [vmem:[%s11845_s15 + $0x198] sm:$0xff] %v10294_v51  ;;  %v4717_v53 = vpop.f32.mrb[43].mxu1 }
 0x5fe   : > { %8634 = vst [vmem:[%s11845_s15 + $0x190] sm:$0xff] %v4717_v53  ;;  %v10403_v54 = vpop.f32.mrb[64].mxu0 }
 0x5ff   : > { %8745 = vst [vmem:[%s11845_s15 + $0x348] sm:$0xff] %v10403_v54  ;;  %v5505_v55 = vpop.f32.mrb[65].mxu0 }
 0x600   : > { %v10297_v56 = vpop.f32.mrb[44].mxu1  ;;  %8744 = vst [vmem:[%s11845_s15 + $0x340] sm:$0xff] %v5505_v55 }
 0x601   : > { %8637 = vst [vmem:[%s11845_s15 + $0x1a8] sm:$0xff] %v10297_v56  ;;  %v4727_v57 = vpop.f32.mrb[45].mxu1 }
 0x602   : > { %8636 = vst [vmem:[%s11845_s15 + $0x1a0] sm:$0xff] %v4727_v57  ;;  %v10406_v58 = vpop.f32.mrb[66].mxu0 }
 0x603   : > { %8747 = vst [vmem:[%s11845_s15 + $0x358] sm:$0xff] %v10406_v58  ;;  %v5515_v59 = vpop.f32.mrb[67].mxu0 }
 0x604   : > { %v10300_v60 = vpop.f32.mrb[46].mxu1  ;;  %8746 = vst [vmem:[%s11845_s15 + $0x350] sm:$0xff] %v5515_v59 }
 0x605   : > { %8639 = vst [vmem:[%s11845_s15 + $0x1b8] sm:$0xff] %v10300_v60  ;;  %v4737_v61 = vpop.f32.mrb[47].mxu1 }
 0x606   : > { %8638 = vst [vmem:[%s11845_s15 + $0x1b0] sm:$0xff] %v4737_v61  ;;  %v10409_v62 = vpop.f32.mrb[68].mxu0 }
 0x607   : > { %8749 = vst [vmem:[%s11845_s15 + $0x368] sm:$0xff] %v10409_v62  ;;  %v5525_v63 = vpop.f32.mrb[69].mxu0 }
 0x608   : > { %v10323_v0 = vpop.f32.mrb[48].mxu1  ;;  %8748 = vst [vmem:[%s11845_s15 + $0x360] sm:$0xff] %v5525_v63 }
 0x609   : > { %8665 = vst [vmem:[%s11845_s15 + $0x208] sm:$0xff] %v10323_v0  ;;  %v4935_v1 = vpop.f32.mrb[49].mxu1 }
 0x60a   : > { %8664 = vst [vmem:[%s11845_s15 + $0x200] sm:$0xff] %v4935_v1  ;;  %v10412_v2 = vpop.f32.mrb[70].mxu0 }
 0x60b   : > { %8751 = vst [vmem:[%s11845_s15 + $0x378] sm:$0xff] %v10412_v2  ;;  %v5535_v3 = vpop.f32.mrb[71].mxu0 }
 0x60c   : > { %v10326_v4 = vpop.f32.mrb[50].mxu1  ;;  %8750 = vst [vmem:[%s11845_s15 + $0x370] sm:$0xff] %v5535_v3 }
 0x60d   : > { %8667 = vst [vmem:[%s11845_s15 + $0x218] sm:$0xff] %v10326_v4  ;;  %v4945_v5 = vpop.f32.mrb[51].mxu1 }
 0x60e   : > { %8666 = vst [vmem:[%s11845_s15 + $0x210] sm:$0xff] %v4945_v5  ;;  %v10435_v6 = vpop.f32.mrb[72].mxu0 }
 0x60f   : > { %8777 = vst [vmem:[%s11845_s15 + $0x3c8] sm:$0xff] %v10435_v6  ;;  %v5733_v7 = vpop.f32.mrb[73].mxu0 }
 0x610   : > { %v10329_v8 = vpop.f32.mrb[52].mxu1  ;;  %8776 = vst [vmem:[%s11845_s15 + $0x3c0] sm:$0xff] %v5733_v7 }
 0x611   : > { %8669 = vst [vmem:[%s11845_s15 + $0x228] sm:$0xff] %v10329_v8  ;;  %v4955_v9 = vpop.f32.mrb[53].mxu1 }
 0x612   : > { %8668 = vst [vmem:[%s11845_s15 + $0x220] sm:$0xff] %v4955_v9  ;;  %v10438_v10 = vpop.f32.mrb[74].mxu0 }
 0x613   : > { %8779 = vst [vmem:[%s11845_s15 + $0x3d8] sm:$0xff] %v10438_v10  ;;  %v5743_v11 = vpop.f32.mrb[75].mxu0 }
 0x614   : > { %v10332_v14 = vpop.f32.mrb[54].mxu1  ;;  %8778 = vst [vmem:[%s11845_s15 + $0x3d0] sm:$0xff] %v5743_v11 }
 0x615   : > { %8671 = vst [vmem:[%s11845_s15 + $0x238] sm:$0xff] %v10332_v14  ;;  %v4965_v37 = vpop.f32.mrb[55].mxu1 }
 0x616   : > { %8670 = vst [vmem:[%s11845_s15 + $0x230] sm:$0xff] %v4965_v37  ;;  %v10441_v39 = vpop.f32.mrb[76].mxu0 }
 0x617   : > { %8781 = vst [vmem:[%s11845_s15 + $0x3e8] sm:$0xff] %v10441_v39  ;;  %v5753_v42 = vpop.f32.mrb[77].mxu0 }
 0x618   : > { %v10355_v44 = vpop.f32.mrb[56].mxu1  ;;  %8780 = vst [vmem:[%s11845_s15 + $0x3e0] sm:$0xff] %v5753_v42 }
 0x619   : > { %8697 = vst [vmem:[%s11845_s15 + $0x288] sm:$0xff] %v10355_v44  ;;  %v5163_v47 = vpop.f32.mrb[57].mxu1 }
 0x61a   : > { %8696 = vst [vmem:[%s11845_s15 + $0x280] sm:$0xff] %v5163_v47  ;;  %v10444_v49 = vpop.f32.mrb[78].mxu0 }
 0x61b   : > { %8783 = vst [vmem:[%s11845_s15 + $0x3f8] sm:$0xff] %v10444_v49  ;;  %v5763_v52 = vpop.f32.mrb[79].mxu0 }
 0x61c   : > { %v10358_v12 = vpop.f32.mrb[58].mxu1  ;;  %8782 = vst [vmem:[%s11845_s15 + $0x3f0] sm:$0xff] %v5763_v52 }
 0x61d   : > { %8699 = vst [vmem:[%s11845_s15 + $0x298] sm:$0xff] %v10358_v12  ;;  %v5173_v13 = vpop.f32.mrb[59].mxu1 }
 0x61e   : > { %8698 = vst [vmem:[%s11845_s15 + $0x290] sm:$0xff] %v5173_v13 }
 0x620   : > { %v10361_v15 = vpop.f32.mrb[60].mxu1 }
 0x621   : > { %8701 = vst [vmem:[%s11845_s15 + $0x2a8] sm:$0xff] %v10361_v15  ;;  %v5183_v16 = vpop.f32.mrb[61].mxu1 }
 0x622   : > { %8700 = vst [vmem:[%s11845_s15 + $0x2a0] sm:$0xff] %v5183_v16 }
 0x624   : > { %v10364_v17 = vpop.f32.mrb[62].mxu1 }
 0x625   : > { %8703 = vst [vmem:[%s11845_s15 + $0x2b8] sm:$0xff] %v10364_v17  ;;  %v5193_v18 = vpop.f32.mrb[63].mxu1 }
 0x626   : > { %8702 = vst [vmem:[%s11845_s15 + $0x2b0] sm:$0xff] %v5193_v18 }
 0x628   : > { %v10387_v19 = vpop.f32.mrb[64].mxu1 }
 0x629   : > { %8729 = vst [vmem:[%s11845_s15 + $0x308] sm:$0xff] %v10387_v19  ;;  %v5391_v20 = vpop.f32.mrb[65].mxu1 }
 0x62a   : > { %8728 = vst [vmem:[%s11845_s15 + $0x300] sm:$0xff] %v5391_v20 }
 0x62c   : > { %v10390_v21 = vpop.f32.mrb[66].mxu1 }
 0x62d   : > { %8731 = vst [vmem:[%s11845_s15 + $0x318] sm:$0xff] %v10390_v21  ;;  %v5401_v22 = vpop.f32.mrb[67].mxu1 }
 0x62e   : > { %8730 = vst [vmem:[%s11845_s15 + $0x310] sm:$0xff] %v5401_v22 }
 0x630   : > { %v10393_v23 = vpop.f32.mrb[68].mxu1 }
 0x631   : > { %8733 = vst [vmem:[%s11845_s15 + $0x328] sm:$0xff] %v10393_v23  ;;  %v5411_v24 = vpop.f32.mrb[69].mxu1 }
 0x632   : > { %8732 = vst [vmem:[%s11845_s15 + $0x320] sm:$0xff] %v5411_v24 }
 0x634   : > { %v10396_v25 = vpop.f32.mrb[70].mxu1 }
 0x635   : > { %8735 = vst [vmem:[%s11845_s15 + $0x338] sm:$0xff] %v10396_v25  ;;  %v5421_v26 = vpop.f32.mrb[71].mxu1 }
 0x636   : > { %8734 = vst [vmem:[%s11845_s15 + $0x330] sm:$0xff] %v5421_v26 }
 0x638   : > { %v10419_v27 = vpop.f32.mrb[72].mxu1 }
 0x639   : > { %8761 = vst [vmem:[%s11845_s15 + $0x388] sm:$0xff] %v10419_v27  ;;  %v5619_v28 = vpop.f32.mrb[73].mxu1 }
 0x63a   : > { %8760 = vst [vmem:[%s11845_s15 + $0x380] sm:$0xff] %v5619_v28 }
 0x63c   : > { %v10422_v29 = vpop.f32.mrb[74].mxu1 }
 0x63d   : > { %8763 = vst [vmem:[%s11845_s15 + $0x398] sm:$0xff] %v10422_v29  ;;  %v5629_v30 = vpop.f32.mrb[75].mxu1 }
 0x63e   : > { %8762 = vst [vmem:[%s11845_s15 + $0x390] sm:$0xff] %v5629_v30 }
 0x640   : > { %v10425_v31 = vpop.f32.mrb[76].mxu1 }
 0x641   : > { %8765 = vst [vmem:[%s11845_s15 + $0x3a8] sm:$0xff] %v10425_v31  ;;  %v5639_v32 = vpop.f32.mrb[77].mxu1 }
 0x642   : > { %8764 = vst [vmem:[%s11845_s15 + $0x3a0] sm:$0xff] %v5639_v32 }
 0x644   : > { %v10428_v33 = vpop.f32.mrb[78].mxu1 }
 0x645   : > { %8767 = vst [vmem:[%s11845_s15 + $0x3b8] sm:$0xff] %v10428_v33  ;;  %v5649_v34 = vpop.f32.mrb[79].mxu1 }
 0x646   : > { %8766 = vst [vmem:[%s11845_s15 + $0x3b0] sm:$0xff] %v5649_v34 }
 0x647 PF: > { %s13771_s21 = sld [smem:[#allocation35_spill]] }
 0x64d   : > { %p5781_p12 = scmp.ge.s32.totalorder %s13771_s21, 7  ;;  %p5782_p10 = scmp.lt.s32.totalorder %s13771_s21, 15 }
 0x64f   : > { %p5783_p7 = pnand %p5782_p10, %p5781_p12 }
 0x650   : > { %v5803_v35 = vld [vmem:[#allocation12] sm:$0xff] (!%p5783_p7)  ;;  %v5804_v36 = vld [vmem:[#allocation12 + $0x8] sm:$0xff] (!%p5783_p7)  ;;  %vm5813_vm4 = vcmask (!%p5783_p7), 130048   ;;  %v5789_v43 = vld [vmem:[%s11830_s14 + $0x10] sm:$0xff] (!%p5783_p7)  ;;  %s13772_s29 = sld [smem:[#allocation52_spill]] (!%p5783_p7)  ;;  %vm6007_vm5 = vcmask (!%p5783_p7), 64512  }
 0x651   : > { %5786 = sbr.rel (%p5783_p7) target bundleno = 2192 (0x890), region = 138  ;;  %v5787_v38 = vld [vmem:[%s11830_s14] sm:$0xff] (!%p5783_p7)  ;;  %v10913_v40 = vpack.c.bf16 (!%p5783_p7), %v5804_v36, %v5803_v35  ;;  %v5788_v41 = vld [vmem:[%s11830_s14 + $0x8] sm:$0xff] (!%p5783_p7)  ;;  %v5790_v45 = vld [vmem:[%s11830_s14 + $0x18] sm:$0xff] (!%p5783_p7) }
 0x652   : > { %10449 = vmatprep.mubr.msk.f32.mxu0 (!%p5783_p7), %vm5813_vm4, %v5787_v38  ;;  %v5791_v46 = vld [vmem:[%s11830_s14 + $0x20] sm:$0xff] (!%p5783_p7)  ;;  %v5792_v48 = vld [vmem:[%s11830_s14 + $0x28] sm:$0xff] (!%p5783_p7)  ;;  %v5793_v50 = vld [vmem:[%s11830_s14 + $0x30] sm:$0xff] (!%p5783_p7) }
 0x653   : > { %10914 = vmatprep.subr.bf16.mxu0 (!%p5783_p7), %v10913_v40  ;;  %v5794_v51 = vld [vmem:[%s11830_s14 + $0x38] sm:$0xff] (!%p5783_p7)  ;;  %v5795_v53 = vld [vmem:[%s11830_s14 + $0x40] sm:$0xff] (!%p5783_p7)  ;;  %v5796_v54 = vld [vmem:[%s11830_s14 + $0x48] sm:$0xff] (!%p5783_p7) }
 0x654   : > { %10916 = vmatpush3.bf16.msra.mxu0 (!%p5783_p7), %v10913_v40  ;;  %v5797_v55 = vld [vmem:[%s11830_s14 + $0x50] sm:$0xff] (!%p5783_p7)  ;;  %v5798_v56 = vld [vmem:[%s11830_s14 + $0x58] sm:$0xff] (!%p5783_p7)  ;;  %v5799_v57 = vld [vmem:[%s11830_s14 + $0x60] sm:$0xff] (!%p5783_p7) }
 0x655   : > { %v5800_v58 = vld [vmem:[%s11830_s14 + $0x68] sm:$0xff] (!%p5783_p7)  ;;  %v5801_v59 = vld [vmem:[%s11830_s14 + $0x70] sm:$0xff] (!%p5783_p7)  ;;  %v5802_v60 = vld [vmem:[%s11830_s14 + $0x78] sm:$0xff] (!%p5783_p7) }
 0x656   : > { %v13140_v61 = vld [vmem:[%s13772_s29] sm:$0xff] (!%p5783_p7)  ;;  %v13149_v0 = vld [vmem:[%s13772_s29 + $0x8] sm:$0xff] (!%p5783_p7)  ;;  %v13156_v2 = vld [vmem:[%s13772_s29 + $0x10] sm:$0xff] (!%p5783_p7) }
 0x657   : > { %10450 = vmatmul.mubr.msk.f32.vlgmr.msra.gmra.mrb[0].mxu0 (!%p5783_p7), %vm5813_vm4, %v5788_v41  ;;  %10475 = vmatprep.mubr.msk.f32.mxu1 (!%p5783_p7), %vm6007_vm5, %v13140_v61  ;;  %v13161_v4 = vld [vmem:[%s13772_s29 + $0x18] sm:$0xff] (!%p5783_p7)  ;;  %v13166_v5 = vld [vmem:[%s13772_s29 + $0x20] sm:$0xff] (!%p5783_p7)  ;;  %v13181_v7 = vld [vmem:[%s13772_s29 + $0x28] sm:$0xff] (!%p5783_p7) }
 0x658   : > { %10452 = vmatprep.mubr.msk.f32.mxu0 %vm5813_vm4, %v5789_v43  ;;  %v13186_v9 = vld [vmem:[%s13772_s29 + $0x30] sm:$0xff]  ;;  %v13199_v11 = vld [vmem:[%s13772_s29 + $0x38] sm:$0xff] }
 0x65b   : > { %10453 = vmatmul.mubr.msk.f32.gmra.mrb[2].mxu0 %vm5813_vm4, %v5790_v45 }
 0x65c   : > { %10455 = vmatprep.mubr.msk.f32.mxu0 %vm5813_vm4, %v5791_v46 }
 0x65f   : > { %10456 = vmatmul.mubr.msk.f32.gmra.mrb[4].mxu0 %vm5813_vm4, %v5792_v48 }
 0x660   : > { %10458 = vmatprep.mubr.msk.f32.mxu0 %vm5813_vm4, %v5793_v50 }
 0x663   : > { %10459 = vmatmul.mubr.msk.f32.gmra.mrb[6].mxu0 %vm5813_vm4, %v5794_v51 }
 0x664   : > { %10461 = vmatprep.mubr.msk.f32.mxu0 %vm5813_vm4, %v5795_v53 }
 0x667   : > { %10462 = vmatmul.mubr.msk.f32.gmra.mrb[8].mxu0 %vm5813_vm4, %v5796_v54 }
 0x668   : > { %10464 = vmatprep.mubr.msk.f32.mxu0 %vm5813_vm4, %v5797_v55 }
 0x66b   : > { %10465 = vmatmul.mubr.msk.f32.gmra.mrb[10].mxu0 %vm5813_vm4, %v5798_v56 }
 0x66c   : > { %10467 = vmatprep.mubr.msk.f32.mxu0 %vm5813_vm4, %v5799_v57 }
 0x66f   : > { %10468 = vmatmul.mubr.msk.f32.gmra.mrb[12].mxu0 %vm5813_vm4, %v5800_v58 }
 0x670   : > { %10470 = vmatprep.mubr.msk.f32.mxu0 %vm5813_vm4, %v5801_v59 }
 0x673   : > { %10471 = vmatmul.mubr.msk.f32.gmra.mrb[14].mxu0 %vm5813_vm4, %v5802_v60 }
 0x674   : > { %10517 = vmatprep.mubr.msk.f32.mxu0 %vm6007_vm5, %v13140_v61 }
 0x72a   : > { %v10451_v62 = vpop.f32.mrb[0].mxu0 }
 0x72b   : > { %v5928_v63 = vpop.f32.mrb[1].mxu0 }
 0x72c   : > { %10473 = vmatprep.subr.mxu1 %v5928_v63 }
 0x72d   : > { %10474 = vmatpush3.msra.mxu1 %v5928_v63 }
 0x72e   : > { %v10454_v1 = vpop.f32.mrb[2].mxu0  ;;  %10476 = vmatmul.mubr.msk.f32.vlgmr.msra.gmra.mrb[0].mxu1 %vm6007_vm5, %v13149_v0  ;;  %10487 = vmatprep.subr.mxu1 %v10451_v62 }
 0x72f   : > { %v5938_v3 = vpop.f32.mrb[3].mxu0  ;;  %10488 = vmatpush3.msra.mxu1 %v10451_v62  ;;  %10515 = vmatprep.subr.mxu0 %v10454_v1 }
 0x730   : > { %10501 = vmatprep.subr.mxu1 %v5938_v3  ;;  %10516 = vmatpush3.msra.mxu0 %v10454_v1 }
 0x731   : > { %10478 = vmatprep.mubr.msk.f32.mxu1 %vm6007_vm5, %v13156_v2  ;;  %10518 = vmatmul.mubr.msk.f32.vlgmr.msra.gmra.mrb[16].mxu0 %vm6007_vm5, %v13149_v0 }
 0x732   : > { %10479 = vmatmul.mubr.msk.f32.gmra.mrb[2].mxu1 %vm6007_vm5, %v13161_v4  ;;  %v10457_v6 = vpop.f32.mrb[4].mxu0  ;;  %10520 = vmatprep.mubr.msk.f32.mxu0 %vm6007_vm5, %v13156_v2 }
 0x733   : > { %10481 = vmatprep.mubr.msk.f32.mxu1 %vm6007_vm5, %v13166_v5  ;;  %v5948_v8 = vpop.f32.mrb[5].mxu0  ;;  %10543 = vmatprep.subr.mxu0 %v10457_v6 }
 0x734   : > { %10544 = vmatpush3.msra.mxu0 %v10457_v6 }
 0x735   : > { %10521 = vmatmul.mubr.msk.f32.gmra.mrb[18].mxu0 %vm6007_vm5, %v13161_v4 }
 0x736   : > { %10482 = vmatmul.mubr.msk.f32.gmra.mrb[4].mxu1 %vm6007_vm5, %v13181_v7  ;;  %10523 = vmatprep.mubr.msk.f32.mxu0 %vm6007_vm5, %v13166_v5  ;;  %v10460_v10 = vpop.f32.mrb[6].mxu0 }
 0x737   : > { %10484 = vmatprep.mubr.msk.f32.mxu1 %vm6007_vm5, %v13186_v9  ;;  %v5958_v14 = vpop.f32.mrb[7].mxu0  ;;  %10571 = vmatprep.subr.mxu0 %v10460_v10 }
 0x739   : > { %10524 = vmatmul.mubr.msk.f32.gmra.mrb[20].mxu0 %vm6007_vm5, %v13181_v7 }
 0x73a   : > { %10485 = vmatmul.mubr.msk.f32.gmra.mrb[6].mxu1 %vm6007_vm5, %v13199_v11  ;;  %10526 = vmatprep.mubr.msk.f32.mxu0 %vm6007_vm5, %v13186_v9  ;;  %v10463_v37 = vpop.f32.mrb[8].mxu0 }
 0x73b   : > { %10489 = vmatprep.mubr.msk.f32.mxu1 %vm6007_vm5, %v13140_v61  ;;  %v13209_v39 = vpop.f32.mrb[9].mxu0 }
 0x73d   : > { %10527 = vmatmul.mubr.msk.f32.gmra.mrb[22].mxu0 %vm6007_vm5, %v13199_v11 }
 0x73e   : > { %10490 = vmatmul.mubr.msk.f32.vlgmr.msra.gmra.mrb[8].mxu1 %vm6007_vm5, %v13149_v0  ;;  %10545 = vmatprep.mubr.msk.f32.mxu0 %vm6007_vm5, %v13140_v61  ;;  %v10466_v42 = vpop.f32.mrb[10].mxu0 }
 0x73f   : > { %10502 = vmatpush3.msra.mxu1 %v5938_v3  ;;  %10492 = vmatprep.mubr.msk.f32.mxu1 %vm6007_vm5, %v13156_v2  ;;  %v13219_v44 = vpop.f32.mrb[11].mxu0 }
 0x740   : > { %10529 = vmatprep.subr.mxu1 %v5948_v8 }
 0x741   : > { %10546 = vmatmul.mubr.msk.f32.vlgmr.msra.gmra.mrb[24].mxu0 %vm6007_vm5, %v13149_v0 }
 0x742   : > { %10493 = vmatmul.mubr.msk.f32.gmra.mrb[10].mxu1 %vm6007_vm5, %v13161_v4  ;;  %10572 = vmatpush3.msra.mxu0 %v10460_v10  ;;  %v13225_v47 = vpop.f32.mrb[12].mxu0 }
 0x743   : > { %10495 = vmatprep.mubr.msk.f32.mxu1 %vm6007_vm5, %v13166_v5  ;;  %10548 = vmatprep.mubr.msk.f32.mxu0 %vm6007_vm5, %v13156_v2  ;;  %v13231_v49 = vpop.f32.mrb[13].mxu0 }
 0x744   : > { %10599 = vmatprep.subr.mxu0 %v10463_v37 }
 0x745   : > { %10549 = vmatmul.mubr.msk.f32.gmra.mrb[26].mxu0 %vm6007_vm5, %v13161_v4 }
 0x746   : > { %10496 = vmatmul.mubr.msk.f32.gmra.mrb[12].mxu1 %vm6007_vm5, %v13181_v7  ;;  %10551 = vmatprep.mubr.msk.f32.mxu0 %vm6007_vm5, %v13166_v5  ;;  %v13239_v52 = vpop.f32.mrb[14].mxu0 }
 0x747   : > { %10498 = vmatprep.mubr.msk.f32.mxu1 %vm6007_vm5, %v13186_v9  ;;  %v13243_v12 = vpop.f32.mrb[15].mxu0 }
 0x749   : > { %10552 = vmatmul.mubr.msk.f32.gmra.mrb[28].mxu0 %vm6007_vm5, %v13181_v7 }
 0x74a   : > { %10499 = vmatmul.mubr.msk.f32.gmra.mrb[14].mxu1 %vm6007_vm5, %v13199_v11  ;;  %10554 = vmatprep.mubr.msk.f32.mxu0 %vm6007_vm5, %v13186_v9 }
 0x74b   : > { %10503 = vmatprep.mubr.msk.f32.mxu1 %vm6007_vm5, %v13140_v61 }
 0x74d   : > { %10555 = vmatmul.mubr.msk.f32.gmra.mrb[30].mxu0 %vm6007_vm5, %v13199_v11 }
 0x74e   : > { %10504 = vmatmul.mubr.msk.f32.vlgmr.msra.gmra.mrb[16].mxu1 %vm6007_vm5, %v13149_v0  ;;  %10573 = vmatprep.mubr.msk.f32.mxu0 %vm6007_vm5, %v13140_v61 }
 0x74f   : > { %10530 = vmatpush3.msra.mxu1 %v5948_v8  ;;  %10506 = vmatprep.mubr.msk.f32.mxu1 %vm6007_vm5, %v13156_v2 }
 0x750   : > { %10557 = vmatprep.subr.mxu1 %v5958_v14 }
 0x751   : > { %10574 = vmatmul.mubr.msk.f32.vlgmr.msra.gmra.mrb[32].mxu0 %vm6007_vm5, %v13149_v0 }
 0x752   : > { %10507 = vmatmul.mubr.msk.f32.gmra.mrb[18].mxu1 %vm6007_vm5, %v13161_v4  ;;  %10600 = vmatpush3.msra.mxu0 %v10463_v37 }
 0x753   : > { %10509 = vmatprep.mubr.msk.f32.mxu1 %vm6007_vm5, %v13166_v5  ;;  %10576 = vmatprep.mubr.msk.f32.mxu0 %vm6007_vm5, %v13156_v2 }
 0x754   : > { %10627 = vmatprep.subr.mxu0 %v10466_v42 }
 0x755   : > { %10577 = vmatmul.mubr.msk.f32.gmra.mrb[34].mxu0 %vm6007_vm5, %v13161_v4 }
 0x756   : > { %10510 = vmatmul.mubr.msk.f32.gmra.mrb[20].mxu1 %vm6007_vm5, %v13181_v7  ;;  %10579 = vmatprep.mubr.msk.f32.mxu0 %vm6007_vm5, %v13166_v5 }
 0x757   : > { %10512 = vmatprep.mubr.msk.f32.mxu1 %vm6007_vm5, %v13186_v9 }
 0x759   : > { %10580 = vmatmul.mubr.msk.f32.gmra.mrb[36].mxu0 %vm6007_vm5, %v13181_v7 }
 0x75a   : > { %10513 = vmatmul.mubr.msk.f32.gmra.mrb[22].mxu1 %vm6007_vm5, %v13199_v11  ;;  %10582 = vmatprep.mubr.msk.f32.mxu0 %vm6007_vm5, %v13186_v9 }
 0x75b   : > { %10531 = vmatprep.mubr.msk.f32.mxu1 %vm6007_vm5, %v13140_v61 }
 0x75d   : > { %10583 = vmatmul.mubr.msk.f32.gmra.mrb[38].mxu0 %vm6007_vm5, %v13199_v11 }
 0x75e   : > { %10532 = vmatmul.mubr.msk.f32.vlgmr.msra.gmra.mrb[24].mxu1 %vm6007_vm5, %v13149_v0  ;;  %10601 = vmatprep.mubr.msk.f32.mxu0 %vm6007_vm5, %v13140_v61 }
 0x75f   : > { %10558 = vmatpush3.msra.mxu1 %v5958_v14  ;;  %10534 = vmatprep.mubr.msk.f32.mxu1 %vm6007_vm5, %v13156_v2 }
 0x760   : > { %10585 = vmatprep.subr.mxu1 %v13209_v39 }
 0x761   : > { %10602 = vmatmul.mubr.msk.f32.vlgmr.msra.gmra.mrb[40].mxu0 %vm6007_vm5, %v13149_v0 }
 0x762   : > { %10535 = vmatmul.mubr.msk.f32.gmra.mrb[26].mxu1 %vm6007_vm5, %v13161_v4  ;;  %10628 = vmatpush3.msra.mxu0 %v10466_v42 }
 0x763   : > { %10537 = vmatprep.mubr.msk.f32.mxu1 %vm6007_vm5, %v13166_v5  ;;  %10604 = vmatprep.mubr.msk.f32.mxu0 %vm6007_vm5, %v13156_v2 }
 0x764   : > { %10655 = vmatprep.subr.mxu0 %v13225_v47 }
 0x765   : > { %10605 = vmatmul.mubr.msk.f32.gmra.mrb[42].mxu0 %vm6007_vm5, %v13161_v4 }
 0x766   : > { %10538 = vmatmul.mubr.msk.f32.gmra.mrb[28].mxu1 %vm6007_vm5, %v13181_v7  ;;  %10607 = vmatprep.mubr.msk.f32.mxu0 %vm6007_vm5, %v13166_v5 }
 0x767   : > { %10540 = vmatprep.mubr.msk.f32.mxu1 %vm6007_vm5, %v13186_v9 }
 0x769   : > { %10608 = vmatmul.mubr.msk.f32.gmra.mrb[44].mxu0 %vm6007_vm5, %v13181_v7 }
 0x76a   : > { %10541 = vmatmul.mubr.msk.f32.gmra.mrb[30].mxu1 %vm6007_vm5, %v13199_v11  ;;  %10610 = vmatprep.mubr.msk.f32.mxu0 %vm6007_vm5, %v13186_v9 }
 0x76b   : > { %10559 = vmatprep.mubr.msk.f32.mxu1 %vm6007_vm5, %v13140_v61 }
 0x76d   : > { %10611 = vmatmul.mubr.msk.f32.gmra.mrb[46].mxu0 %vm6007_vm5, %v13199_v11 }
 0x76e   : > { %10560 = vmatmul.mubr.msk.f32.vlgmr.msra.gmra.mrb[32].mxu1 %vm6007_vm5, %v13149_v0  ;;  %10629 = vmatprep.mubr.msk.f32.mxu0 %vm6007_vm5, %v13140_v61 }
 0x76f   : > { %10586 = vmatpush3.msra.mxu1 %v13209_v39  ;;  %10562 = vmatprep.mubr.msk.f32.mxu1 %vm6007_vm5, %v13156_v2 }
 0x770   : > { %10613 = vmatprep.subr.mxu1 %v13219_v44 }
 0x771   : > { %10630 = vmatmul.mubr.msk.f32.vlgmr.msra.gmra.mrb[48].mxu0 %vm6007_vm5, %v13149_v0 }
 0x772   : > { %10563 = vmatmul.mubr.msk.f32.gmra.mrb[34].mxu1 %vm6007_vm5, %v13161_v4  ;;  %10656 = vmatpush3.msra.mxu0 %v13225_v47 }
 0x773   : > { %10565 = vmatprep.mubr.msk.f32.mxu1 %vm6007_vm5, %v13166_v5  ;;  %10632 = vmatprep.mubr.msk.f32.mxu0 %vm6007_vm5, %v13156_v2 }
 0x774   : > { %10683 = vmatprep.subr.mxu0 %v13239_v52 }
 0x775   : > { %10633 = vmatmul.mubr.msk.f32.gmra.mrb[50].mxu0 %vm6007_vm5, %v13161_v4 }
 0x776   : > { %10566 = vmatmul.mubr.msk.f32.gmra.mrb[36].mxu1 %vm6007_vm5, %v13181_v7  ;;  %10635 = vmatprep.mubr.msk.f32.mxu0 %vm6007_vm5, %v13166_v5 }
 0x777   : > { %10568 = vmatprep.mubr.msk.f32.mxu1 %vm6007_vm5, %v13186_v9 }
 0x779   : > { %10636 = vmatmul.mubr.msk.f32.gmra.mrb[52].mxu0 %vm6007_vm5, %v13181_v7 }
 0x77a   : > { %10569 = vmatmul.mubr.msk.f32.gmra.mrb[38].mxu1 %vm6007_vm5, %v13199_v11  ;;  %10638 = vmatprep.mubr.msk.f32.mxu0 %vm6007_vm5, %v13186_v9 }
 0x77b   : > { %10587 = vmatprep.mubr.msk.f32.mxu1 %vm6007_vm5, %v13140_v61 }
 0x77d   : > { %10639 = vmatmul.mubr.msk.f32.gmra.mrb[54].mxu0 %vm6007_vm5, %v13199_v11 }
 0x77e   : > { %10588 = vmatmul.mubr.msk.f32.vlgmr.msra.gmra.mrb[40].mxu1 %vm6007_vm5, %v13149_v0  ;;  %10657 = vmatprep.mubr.msk.f32.mxu0 %vm6007_vm5, %v13140_v61 }
 0x77f   : > { %10614 = vmatpush3.msra.mxu1 %v13219_v44  ;;  %10590 = vmatprep.mubr.msk.f32.mxu1 %vm6007_vm5, %v13156_v2 }
 0x780   : > { %10641 = vmatprep.subr.mxu1 %v13231_v49 }
 0x781   : > { %10658 = vmatmul.mubr.msk.f32.vlgmr.msra.gmra.mrb[56].mxu0 %vm6007_vm5, %v13149_v0 }
 0x782   : > { %10591 = vmatmul.mubr.msk.f32.gmra.mrb[42].mxu1 %vm6007_vm5, %v13161_v4  ;;  %10684 = vmatpush3.msra.mxu0 %v13239_v52 }
 0x783   : > { %10593 = vmatprep.mubr.msk.f32.mxu1 %vm6007_vm5, %v13166_v5  ;;  %10660 = vmatprep.mubr.msk.f32.mxu0 %vm6007_vm5, %v13156_v2 }
 0x785   : > { %10661 = vmatmul.mubr.msk.f32.gmra.mrb[58].mxu0 %vm6007_vm5, %v13161_v4 }
 0x786   : > { %10594 = vmatmul.mubr.msk.f32.gmra.mrb[44].mxu1 %vm6007_vm5, %v13181_v7  ;;  %10663 = vmatprep.mubr.msk.f32.mxu0 %vm6007_vm5, %v13166_v5 }
 0x787   : > { %10596 = vmatprep.mubr.msk.f32.mxu1 %vm6007_vm5, %v13186_v9 }
 0x789   : > { %10664 = vmatmul.mubr.msk.f32.gmra.mrb[60].mxu0 %vm6007_vm5, %v13181_v7 }
 0x78a   : > { %10597 = vmatmul.mubr.msk.f32.gmra.mrb[46].mxu1 %vm6007_vm5, %v13199_v11  ;;  %10666 = vmatprep.mubr.msk.f32.mxu0 %vm6007_vm5, %v13186_v9 }
 0x78b   : > { %10615 = vmatprep.mubr.msk.f32.mxu1 %vm6007_vm5, %v13140_v61 }
 0x78d   : > { %10667 = vmatmul.mubr.msk.f32.gmra.mrb[62].mxu0 %vm6007_vm5, %v13199_v11 }
 0x78e   : > { %10616 = vmatmul.mubr.msk.f32.vlgmr.msra.gmra.mrb[48].mxu1 %vm6007_vm5, %v13149_v0  ;;  %10685 = vmatprep.mubr.msk.f32.mxu0 %vm6007_vm5, %v13140_v61 }
 0x78f   : > { %10642 = vmatpush3.msra.mxu1 %v13231_v49  ;;  %10618 = vmatprep.mubr.msk.f32.mxu1 %vm6007_vm5, %v13156_v2 }
 0x790   : > { %10669 = vmatprep.subr.mxu1 %v13243_v12 }
 0x791   : > { %10686 = vmatmul.mubr.msk.f32.vlgmr.msra.gmra.mrb[64].mxu0 %vm6007_vm5, %v13149_v0 }
 0x792   : > { %10619 = vmatmul.mubr.msk.f32.gmra.mrb[50].mxu1 %vm6007_vm5, %v13161_v4  ;;  %10688 = vmatprep.mubr.msk.f32.mxu0 %vm6007_vm5, %v13156_v2 }
 0x793   : > { %10621 = vmatprep.mubr.msk.f32.mxu1 %vm6007_vm5, %v13166_v5 }
 0x795   : > { %10689 = vmatmul.mubr.msk.f32.gmra.mrb[66].mxu0 %vm6007_vm5, %v13161_v4 }
 0x796   : > { %10622 = vmatmul.mubr.msk.f32.gmra.mrb[52].mxu1 %vm6007_vm5, %v13181_v7  ;;  %10691 = vmatprep.mubr.msk.f32.mxu0 %vm6007_vm5, %v13166_v5 }
 0x797   : > { %10624 = vmatprep.mubr.msk.f32.mxu1 %vm6007_vm5, %v13186_v9 }
 0x799   : > { %10692 = vmatmul.mubr.msk.f32.gmra.mrb[68].mxu0 %vm6007_vm5, %v13181_v7 }
 0x79a   : > { %10625 = vmatmul.mubr.msk.f32.gmra.mrb[54].mxu1 %vm6007_vm5, %v13199_v11  ;;  %10694 = vmatprep.mubr.msk.f32.mxu0 %vm6007_vm5, %v13186_v9 }
 0x79b   : > { %10643 = vmatprep.mubr.msk.f32.mxu1 %vm6007_vm5, %v13140_v61 }
 0x79d   : > { %10695 = vmatmul.mubr.msk.f32.gmra.mrb[70].mxu0 %vm6007_vm5, %v13199_v11 }
 0x79e   : > { %10644 = vmatmul.mubr.msk.f32.vlgmr.msra.gmra.mrb[56].mxu1 %vm6007_vm5, %v13149_v0 }
 0x79f   : > { %10670 = vmatpush3.msra.mxu1 %v13243_v12  ;;  %10646 = vmatprep.mubr.msk.f32.mxu1 %vm6007_vm5, %v13156_v2 }
 0x7a2   : > { %10647 = vmatmul.mubr.msk.f32.gmra.mrb[58].mxu1 %vm6007_vm5, %v13161_v4 }
 0x7a3   : > { %10649 = vmatprep.mubr.msk.f32.mxu1 %vm6007_vm5, %v13166_v5 }
 0x7a6   : > { %10650 = vmatmul.mubr.msk.f32.gmra.mrb[60].mxu1 %vm6007_vm5, %v13181_v7 }
 0x7a7   : > { %10652 = vmatprep.mubr.msk.f32.mxu1 %vm6007_vm5, %v13186_v9 }
 0x7aa   : > { %10653 = vmatmul.mubr.msk.f32.gmra.mrb[62].mxu1 %vm6007_vm5, %v13199_v11 }
 0x7ab   : > { %10671 = vmatprep.mubr.msk.f32.mxu1 %vm6007_vm5, %v13140_v61 }
 0x7ae   : > { %10672 = vmatmul.mubr.msk.f32.vlgmr.msra.gmra.mrb[64].mxu1 %vm6007_vm5, %v13149_v0 }
 0x7af   : > { %10674 = vmatprep.mubr.msk.f32.mxu1 %vm6007_vm5, %v13156_v2 }
 0x7b2   : > { %10675 = vmatmul.mubr.msk.f32.gmra.mrb[66].mxu1 %vm6007_vm5, %v13161_v4 }
 0x7b3   : > { %10677 = vmatprep.mubr.msk.f32.mxu1 %vm6007_vm5, %v13166_v5 }
 0x7b6   : > { %10678 = vmatmul.mubr.msk.f32.gmra.mrb[68].mxu1 %vm6007_vm5, %v13181_v7 }
 0x7b7   : > { %10680 = vmatprep.mubr.msk.f32.mxu1 %vm6007_vm5, %v13186_v9 }
 0x7ba   : > { %10681 = vmatmul.mubr.msk.f32.gmra.mrb[70].mxu1 %vm6007_vm5, %v13199_v11 }
 0x801   : > { %v10477_v13 = vpop.f32.mrb[0].mxu1 }
 0x802   : > { %6138 = vst [vmem:[%s11845_s15 + $0x8] sm:$0xff] %v10477_v13  ;;  %v6098_v15 = vpop.f32.mrb[1].mxu1 }
 0x803   : > { %6137 = vst [vmem:[%s11845_s15] sm:$0xff] %v6098_v15 }
 0x804   : > { %v10519_v16 = vpop.f32.mrb[16].mxu0 }
 0x805   : > { %v10480_v17 = vpop.f32.mrb[2].mxu1  ;;  %8849 = vst [vmem:[%s11845_s15 + $0xc8] sm:$0xff] %v10519_v16  ;;  %v6439_v18 = vpop.f32.mrb[17].mxu0 }
 0x806   : > { %6140 = vst [vmem:[%s11845_s15 + $0x18] sm:$0xff] %v10480_v17  ;;  %v6108_v19 = vpop.f32.mrb[3].mxu1  ;;  %8848 = vst [vmem:[%s11845_s15 + $0xc0] sm:$0xff] %v6439_v18 }
 0x807   : > { %6139 = vst [vmem:[%s11845_s15 + $0x10] sm:$0xff] %v6108_v19 }
 0x808   : > { %v10522_v20 = vpop.f32.mrb[18].mxu0 }
 0x809   : > { %v10483_v21 = vpop.f32.mrb[4].mxu1  ;;  %8851 = vst [vmem:[%s11845_s15 + $0xd8] sm:$0xff] %v10522_v20  ;;  %v6449_v22 = vpop.f32.mrb[19].mxu0 }
 0x80a   : > { %6142 = vst [vmem:[%s11845_s15 + $0x28] sm:$0xff] %v10483_v21  ;;  %v6118_v23 = vpop.f32.mrb[5].mxu1  ;;  %8850 = vst [vmem:[%s11845_s15 + $0xd0] sm:$0xff] %v6449_v22 }
 0x80b   : > { %6141 = vst [vmem:[%s11845_s15 + $0x20] sm:$0xff] %v6118_v23 }
 0x80c   : > { %v10525_v24 = vpop.f32.mrb[20].mxu0 }
 0x80d   : > { %v10486_v25 = vpop.f32.mrb[6].mxu1  ;;  %8853 = vst [vmem:[%s11845_s15 + $0xe8] sm:$0xff] %v10525_v24  ;;  %v6459_v26 = vpop.f32.mrb[21].mxu0 }
 0x80e   : > { %6144 = vst [vmem:[%s11845_s15 + $0x38] sm:$0xff] %v10486_v25  ;;  %v6128_v27 = vpop.f32.mrb[7].mxu1  ;;  %8852 = vst [vmem:[%s11845_s15 + $0xe0] sm:$0xff] %v6459_v26 }
 0x80f   : > { %6143 = vst [vmem:[%s11845_s15 + $0x30] sm:$0xff] %v6128_v27 }
 0x810   : > { %v10528_v28 = vpop.f32.mrb[22].mxu0 }
 0x811   : > { %v10491_v29 = vpop.f32.mrb[8].mxu1  ;;  %8855 = vst [vmem:[%s11845_s15 + $0xf8] sm:$0xff] %v10528_v28  ;;  %v6469_v30 = vpop.f32.mrb[23].mxu0 }
 0x812   : > { %8817 = vst [vmem:[%s11845_s15 + $0x48] sm:$0xff] %v10491_v29  ;;  %v6211_v31 = vpop.f32.mrb[9].mxu1  ;;  %8854 = vst [vmem:[%s11845_s15 + $0xf0] sm:$0xff] %v6469_v30 }
 0x813   : > { %8816 = vst [vmem:[%s11845_s15 + $0x40] sm:$0xff] %v6211_v31 }
 0x814   : > { %v10547_v32 = vpop.f32.mrb[24].mxu0 }
 0x815   : > { %v10494_v33 = vpop.f32.mrb[10].mxu1  ;;  %8881 = vst [vmem:[%s11845_s15 + $0x148] sm:$0xff] %v10547_v32  ;;  %v6667_v34 = vpop.f32.mrb[25].mxu0 }
 0x816   : > { %8819 = vst [vmem:[%s11845_s15 + $0x58] sm:$0xff] %v10494_v33  ;;  %v6221_v35 = vpop.f32.mrb[11].mxu1  ;;  %8880 = vst [vmem:[%s11845_s15 + $0x140] sm:$0xff] %v6667_v34 }
 0x817   : > { %8818 = vst [vmem:[%s11845_s15 + $0x50] sm:$0xff] %v6221_v35 }
 0x818   : > { %v10550_v36 = vpop.f32.mrb[26].mxu0 }
 0x819   : > { %v10497_v38 = vpop.f32.mrb[12].mxu1  ;;  %8883 = vst [vmem:[%s11845_s15 + $0x158] sm:$0xff] %v10550_v36  ;;  %v6677_v40 = vpop.f32.mrb[27].mxu0 }
 0x81a   : > { %8821 = vst [vmem:[%s11845_s15 + $0x68] sm:$0xff] %v10497_v38  ;;  %v6231_v41 = vpop.f32.mrb[13].mxu1  ;;  %8882 = vst [vmem:[%s11845_s15 + $0x150] sm:$0xff] %v6677_v40 }
 0x81b   : > { %8820 = vst [vmem:[%s11845_s15 + $0x60] sm:$0xff] %v6231_v41 }
 0x81c   : > { %v10553_v43 = vpop.f32.mrb[28].mxu0 }
 0x81d   : > { %v10500_v45 = vpop.f32.mrb[14].mxu1  ;;  %8885 = vst [vmem:[%s11845_s15 + $0x168] sm:$0xff] %v10553_v43  ;;  %v6687_v46 = vpop.f32.mrb[29].mxu0 }
 0x81e   : > { %8823 = vst [vmem:[%s11845_s15 + $0x78] sm:$0xff] %v10500_v45  ;;  %v6241_v48 = vpop.f32.mrb[15].mxu1  ;;  %8884 = vst [vmem:[%s11845_s15 + $0x160] sm:$0xff] %v6687_v46 }
 0x81f   : > { %8822 = vst [vmem:[%s11845_s15 + $0x70] sm:$0xff] %v6241_v48 }
 0x820   : > { %v10556_v50 = vpop.f32.mrb[30].mxu0 }
 0x821   : > { %v10505_v51 = vpop.f32.mrb[16].mxu1  ;;  %8887 = vst [vmem:[%s11845_s15 + $0x178] sm:$0xff] %v10556_v50  ;;  %v6697_v53 = vpop.f32.mrb[31].mxu0 }
 0x822   : > { %8833 = vst [vmem:[%s11845_s15 + $0x88] sm:$0xff] %v10505_v51  ;;  %v6325_v54 = vpop.f32.mrb[17].mxu1  ;;  %8886 = vst [vmem:[%s11845_s15 + $0x170] sm:$0xff] %v6697_v53 }
 0x823   : > { %8832 = vst [vmem:[%s11845_s15 + $0x80] sm:$0xff] %v6325_v54 }
 0x824   : > { %v10575_v55 = vpop.f32.mrb[32].mxu0 }
 0x825   : > { %v10508_v56 = vpop.f32.mrb[18].mxu1  ;;  %8913 = vst [vmem:[%s11845_s15 + $0x1c8] sm:$0xff] %v10575_v55  ;;  %v6895_v57 = vpop.f32.mrb[33].mxu0 }
 0x826   : > { %8835 = vst [vmem:[%s11845_s15 + $0x98] sm:$0xff] %v10508_v56  ;;  %v6335_v58 = vpop.f32.mrb[19].mxu1  ;;  %8912 = vst [vmem:[%s11845_s15 + $0x1c0] sm:$0xff] %v6895_v57 }
 0x827   : > { %8834 = vst [vmem:[%s11845_s15 + $0x90] sm:$0xff] %v6335_v58 }
 0x828   : > { %v10578_v59 = vpop.f32.mrb[34].mxu0 }
 0x829   : > { %v10511_v60 = vpop.f32.mrb[20].mxu1  ;;  %8915 = vst [vmem:[%s11845_s15 + $0x1d8] sm:$0xff] %v10578_v59  ;;  %v6905_v61 = vpop.f32.mrb[35].mxu0 }
 0x82a   : > { %8837 = vst [vmem:[%s11845_s15 + $0xa8] sm:$0xff] %v10511_v60  ;;  %v6345_v62 = vpop.f32.mrb[21].mxu1  ;;  %8914 = vst [vmem:[%s11845_s15 + $0x1d0] sm:$0xff] %v6905_v61 }
 0x82b   : > { %8836 = vst [vmem:[%s11845_s15 + $0xa0] sm:$0xff] %v6345_v62 }
 0x82c   : > { %v10581_v63 = vpop.f32.mrb[36].mxu0 }
 0x82d   : > { %v10514_v0 = vpop.f32.mrb[22].mxu1  ;;  %8917 = vst [vmem:[%s11845_s15 + $0x1e8] sm:$0xff] %v10581_v63  ;;  %v6915_v1 = vpop.f32.mrb[37].mxu0 }
 0x82e   : > { %8839 = vst [vmem:[%s11845_s15 + $0xb8] sm:$0xff] %v10514_v0  ;;  %v6355_v2 = vpop.f32.mrb[23].mxu1  ;;  %8916 = vst [vmem:[%s11845_s15 + $0x1e0] sm:$0xff] %v6915_v1 }
 0x82f   : > { %8838 = vst [vmem:[%s11845_s15 + $0xb0] sm:$0xff] %v6355_v2 }
 0x830   : > { %v10584_v3 = vpop.f32.mrb[38].mxu0 }
 0x831   : > { %v10533_v4 = vpop.f32.mrb[24].mxu1  ;;  %8919 = vst [vmem:[%s11845_s15 + $0x1f8] sm:$0xff] %v10584_v3  ;;  %v6925_v5 = vpop.f32.mrb[39].mxu0 }
 0x832   : > { %8865 = vst [vmem:[%s11845_s15 + $0x108] sm:$0xff] %v10533_v4  ;;  %v6553_v6 = vpop.f32.mrb[25].mxu1  ;;  %8918 = vst [vmem:[%s11845_s15 + $0x1f0] sm:$0xff] %v6925_v5 }
 0x833   : > { %8864 = vst [vmem:[%s11845_s15 + $0x100] sm:$0xff] %v6553_v6 }
 0x834   : > { %v10603_v7 = vpop.f32.mrb[40].mxu0 }
 0x835   : > { %v10536_v8 = vpop.f32.mrb[26].mxu1  ;;  %8945 = vst [vmem:[%s11845_s15 + $0x248] sm:$0xff] %v10603_v7  ;;  %v7123_v9 = vpop.f32.mrb[41].mxu0 }
 0x836   : > { %8867 = vst [vmem:[%s11845_s15 + $0x118] sm:$0xff] %v10536_v8  ;;  %v6563_v10 = vpop.f32.mrb[27].mxu1  ;;  %8944 = vst [vmem:[%s11845_s15 + $0x240] sm:$0xff] %v7123_v9 }
 0x837   : > { %8866 = vst [vmem:[%s11845_s15 + $0x110] sm:$0xff] %v6563_v10 }
 0x838   : > { %v10606_v11 = vpop.f32.mrb[42].mxu0 }
 0x839   : > { %v10539_v14 = vpop.f32.mrb[28].mxu1  ;;  %8947 = vst [vmem:[%s11845_s15 + $0x258] sm:$0xff] %v10606_v11  ;;  %v7133_v37 = vpop.f32.mrb[43].mxu0 }
 0x83a   : > { %8869 = vst [vmem:[%s11845_s15 + $0x128] sm:$0xff] %v10539_v14  ;;  %v6573_v39 = vpop.f32.mrb[29].mxu1  ;;  %8946 = vst [vmem:[%s11845_s15 + $0x250] sm:$0xff] %v7133_v37 }
 0x83b   : > { %8868 = vst [vmem:[%s11845_s15 + $0x120] sm:$0xff] %v6573_v39 }
 0x83c   : > { %v10609_v42 = vpop.f32.mrb[44].mxu0 }
 0x83d   : > { %v10542_v44 = vpop.f32.mrb[30].mxu1  ;;  %8949 = vst [vmem:[%s11845_s15 + $0x268] sm:$0xff] %v10609_v42  ;;  %v7143_v47 = vpop.f32.mrb[45].mxu0 }
 0x83e   : > { %8871 = vst [vmem:[%s11845_s15 + $0x138] sm:$0xff] %v10542_v44  ;;  %v6583_v49 = vpop.f32.mrb[31].mxu1  ;;  %8948 = vst [vmem:[%s11845_s15 + $0x260] sm:$0xff] %v7143_v47 }
 0x83f   : > { %8870 = vst [vmem:[%s11845_s15 + $0x130] sm:$0xff] %v6583_v49 }
 0x840   : > { %v10612_v52 = vpop.f32.mrb[46].mxu0 }
 0x841   : > { %v10561_v12 = vpop.f32.mrb[32].mxu1  ;;  %8951 = vst [vmem:[%s11845_s15 + $0x278] sm:$0xff] %v10612_v52  ;;  %v7153_v13 = vpop.f32.mrb[47].mxu0 }
 0x842   : > { %8897 = vst [vmem:[%s11845_s15 + $0x188] sm:$0xff] %v10561_v12  ;;  %v6781_v15 = vpop.f32.mrb[33].mxu1  ;;  %8950 = vst [vmem:[%s11845_s15 + $0x270] sm:$0xff] %v7153_v13 }
 0x843   : > { %8896 = vst [vmem:[%s11845_s15 + $0x180] sm:$0xff] %v6781_v15 }
 0x844   : > { %v10631_v16 = vpop.f32.mrb[48].mxu0 }
 0x845   : > { %v10564_v17 = vpop.f32.mrb[34].mxu1  ;;  %8977 = vst [vmem:[%s11845_s15 + $0x2c8] sm:$0xff] %v10631_v16  ;;  %v7351_v18 = vpop.f32.mrb[49].mxu0 }
 0x846   : > { %8899 = vst [vmem:[%s11845_s15 + $0x198] sm:$0xff] %v10564_v17  ;;  %v6791_v19 = vpop.f32.mrb[35].mxu1  ;;  %8976 = vst [vmem:[%s11845_s15 + $0x2c0] sm:$0xff] %v7351_v18 }
 0x847   : > { %8898 = vst [vmem:[%s11845_s15 + $0x190] sm:$0xff] %v6791_v19 }
 0x848   : > { %v10634_v20 = vpop.f32.mrb[50].mxu0 }
 0x849   : > { %v10567_v21 = vpop.f32.mrb[36].mxu1  ;;  %8979 = vst [vmem:[%s11845_s15 + $0x2d8] sm:$0xff] %v10634_v20  ;;  %v7361_v22 = vpop.f32.mrb[51].mxu0 }
 0x84a   : > { %8901 = vst [vmem:[%s11845_s15 + $0x1a8] sm:$0xff] %v10567_v21  ;;  %v6801_v23 = vpop.f32.mrb[37].mxu1  ;;  %8978 = vst [vmem:[%s11845_s15 + $0x2d0] sm:$0xff] %v7361_v22 }
 0x84b   : > { %8900 = vst [vmem:[%s11845_s15 + $0x1a0] sm:$0xff] %v6801_v23 }
 0x84c   : > { %v10637_v24 = vpop.f32.mrb[52].mxu0 }
 0x84d   : > { %v10570_v25 = vpop.f32.mrb[38].mxu1  ;;  %8981 = vst [vmem:[%s11845_s15 + $0x2e8] sm:$0xff] %v10637_v24  ;;  %v7371_v26 = vpop.f32.mrb[53].mxu0 }
 0x84e   : > { %8903 = vst [vmem:[%s11845_s15 + $0x1b8] sm:$0xff] %v10570_v25  ;;  %v6811_v27 = vpop.f32.mrb[39].mxu1  ;;  %8980 = vst [vmem:[%s11845_s15 + $0x2e0] sm:$0xff] %v7371_v26 }
 0x84f   : > { %8902 = vst [vmem:[%s11845_s15 + $0x1b0] sm:$0xff] %v6811_v27 }
 0x850   : > { %v10640_v28 = vpop.f32.mrb[54].mxu0 }
 0x851   : > { %v10589_v29 = vpop.f32.mrb[40].mxu1  ;;  %8983 = vst [vmem:[%s11845_s15 + $0x2f8] sm:$0xff] %v10640_v28  ;;  %v7381_v30 = vpop.f32.mrb[55].mxu0 }
 0x852   : > { %8929 = vst [vmem:[%s11845_s15 + $0x208] sm:$0xff] %v10589_v29  ;;  %v7009_v31 = vpop.f32.mrb[41].mxu1  ;;  %8982 = vst [vmem:[%s11845_s15 + $0x2f0] sm:$0xff] %v7381_v30 }
 0x853   : > { %8928 = vst [vmem:[%s11845_s15 + $0x200] sm:$0xff] %v7009_v31 }
 0x854   : > { %v10659_v32 = vpop.f32.mrb[56].mxu0 }
 0x855   : > { %v10592_v33 = vpop.f32.mrb[42].mxu1  ;;  %9009 = vst [vmem:[%s11845_s15 + $0x348] sm:$0xff] %v10659_v32  ;;  %v7579_v34 = vpop.f32.mrb[57].mxu0 }
 0x856   : > { %8931 = vst [vmem:[%s11845_s15 + $0x218] sm:$0xff] %v10592_v33  ;;  %v7019_v35 = vpop.f32.mrb[43].mxu1  ;;  %9008 = vst [vmem:[%s11845_s15 + $0x340] sm:$0xff] %v7579_v34 }
 0x857   : > { %8930 = vst [vmem:[%s11845_s15 + $0x210] sm:$0xff] %v7019_v35 }
 0x858   : > { %v10662_v36 = vpop.f32.mrb[58].mxu0 }
 0x859   : > { %v10595_v38 = vpop.f32.mrb[44].mxu1  ;;  %9011 = vst [vmem:[%s11845_s15 + $0x358] sm:$0xff] %v10662_v36  ;;  %v7589_v40 = vpop.f32.mrb[59].mxu0 }
 0x85a   : > { %8933 = vst [vmem:[%s11845_s15 + $0x228] sm:$0xff] %v10595_v38  ;;  %v7029_v41 = vpop.f32.mrb[45].mxu1  ;;  %9010 = vst [vmem:[%s11845_s15 + $0x350] sm:$0xff] %v7589_v40 }
 0x85b   : > { %8932 = vst [vmem:[%s11845_s15 + $0x220] sm:$0xff] %v7029_v41 }
 0x85c   : > { %v10665_v43 = vpop.f32.mrb[60].mxu0 }
 0x85d   : > { %v10598_v45 = vpop.f32.mrb[46].mxu1  ;;  %9013 = vst [vmem:[%s11845_s15 + $0x368] sm:$0xff] %v10665_v43  ;;  %v7599_v46 = vpop.f32.mrb[61].mxu0 }
 0x85e   : > { %8935 = vst [vmem:[%s11845_s15 + $0x238] sm:$0xff] %v10598_v45  ;;  %v7039_v48 = vpop.f32.mrb[47].mxu1  ;;  %9012 = vst [vmem:[%s11845_s15 + $0x360] sm:$0xff] %v7599_v46 }
 0x85f   : > { %8934 = vst [vmem:[%s11845_s15 + $0x230] sm:$0xff] %v7039_v48 }
 0x860   : > { %v10668_v50 = vpop.f32.mrb[62].mxu0 }
 0x861   : > { %v10617_v51 = vpop.f32.mrb[48].mxu1  ;;  %9015 = vst [vmem:[%s11845_s15 + $0x378] sm:$0xff] %v10668_v50  ;;  %v7609_v53 = vpop.f32.mrb[63].mxu0 }
 0x862   : > { %8961 = vst [vmem:[%s11845_s15 + $0x288] sm:$0xff] %v10617_v51  ;;  %v7237_v54 = vpop.f32.mrb[49].mxu1  ;;  %9014 = vst [vmem:[%s11845_s15 + $0x370] sm:$0xff] %v7609_v53 }
 0x863   : > { %8960 = vst [vmem:[%s11845_s15 + $0x280] sm:$0xff] %v7237_v54 }
 0x864   : > { %v10687_v55 = vpop.f32.mrb[64].mxu0 }
 0x865   : > { %v10620_v56 = vpop.f32.mrb[50].mxu1  ;;  %9041 = vst [vmem:[%s11845_s15 + $0x3c8] sm:$0xff] %v10687_v55  ;;  %v7807_v57 = vpop.f32.mrb[65].mxu0 }
 0x866   : > { %8963 = vst [vmem:[%s11845_s15 + $0x298] sm:$0xff] %v10620_v56  ;;  %v7247_v58 = vpop.f32.mrb[51].mxu1  ;;  %9040 = vst [vmem:[%s11845_s15 + $0x3c0] sm:$0xff] %v7807_v57 }
 0x867   : > { %8962 = vst [vmem:[%s11845_s15 + $0x290] sm:$0xff] %v7247_v58 }
 0x868   : > { %v10690_v59 = vpop.f32.mrb[66].mxu0 }
 0x869   : > { %v10623_v60 = vpop.f32.mrb[52].mxu1  ;;  %9043 = vst [vmem:[%s11845_s15 + $0x3d8] sm:$0xff] %v10690_v59  ;;  %v7817_v61 = vpop.f32.mrb[67].mxu0 }
 0x86a   : > { %8965 = vst [vmem:[%s11845_s15 + $0x2a8] sm:$0xff] %v10623_v60  ;;  %v7257_v62 = vpop.f32.mrb[53].mxu1  ;;  %9042 = vst [vmem:[%s11845_s15 + $0x3d0] sm:$0xff] %v7817_v61 }
 0x86b   : > { %8964 = vst [vmem:[%s11845_s15 + $0x2a0] sm:$0xff] %v7257_v62 }
 0x86c   : > { %v10693_v63 = vpop.f32.mrb[68].mxu0 }
 0x86d   : > { %v10626_v0 = vpop.f32.mrb[54].mxu1  ;;  %9045 = vst [vmem:[%s11845_s15 + $0x3e8] sm:$0xff] %v10693_v63  ;;  %v7827_v1 = vpop.f32.mrb[69].mxu0 }
 0x86e   : > { %8967 = vst [vmem:[%s11845_s15 + $0x2b8] sm:$0xff] %v10626_v0  ;;  %v7267_v2 = vpop.f32.mrb[55].mxu1  ;;  %9044 = vst [vmem:[%s11845_s15 + $0x3e0] sm:$0xff] %v7827_v1 }
 0x86f   : > { %8966 = vst [vmem:[%s11845_s15 + $0x2b0] sm:$0xff] %v7267_v2 }
 0x870   : > { %v10696_v3 = vpop.f32.mrb[70].mxu0 }
 0x871   : > { %v10645_v4 = vpop.f32.mrb[56].mxu1  ;;  %9047 = vst [vmem:[%s11845_s15 + $0x3f8] sm:$0xff] %v10696_v3  ;;  %v7837_v5 = vpop.f32.mrb[71].mxu0 }
 0x872   : > { %8993 = vst [vmem:[%s11845_s15 + $0x308] sm:$0xff] %v10645_v4  ;;  %v7465_v6 = vpop.f32.mrb[57].mxu1  ;;  %9046 = vst [vmem:[%s11845_s15 + $0x3f0] sm:$0xff] %v7837_v5 }
 0x873   : > { %8992 = vst [vmem:[%s11845_s15 + $0x300] sm:$0xff] %v7465_v6 }
 0x875   : > { %v10648_v7 = vpop.f32.mrb[58].mxu1 }
 0x876   : > { %8995 = vst [vmem:[%s11845_s15 + $0x318] sm:$0xff] %v10648_v7  ;;  %v7475_v8 = vpop.f32.mrb[59].mxu1 }
 0x877   : > { %8994 = vst [vmem:[%s11845_s15 + $0x310] sm:$0xff] %v7475_v8 }
 0x879   : > { %v10651_v9 = vpop.f32.mrb[60].mxu1 }
 0x87a   : > { %8997 = vst [vmem:[%s11845_s15 + $0x328] sm:$0xff] %v10651_v9  ;;  %v7485_v10 = vpop.f32.mrb[61].mxu1 }
 0x87b   : > { %8996 = vst [vmem:[%s11845_s15 + $0x320] sm:$0xff] %v7485_v10 }
 0x87d   : > { %v10654_v11 = vpop.f32.mrb[62].mxu1 }
 0x87e   : > { %8999 = vst [vmem:[%s11845_s15 + $0x338] sm:$0xff] %v10654_v11  ;;  %v7495_v14 = vpop.f32.mrb[63].mxu1 }
 0x87f   : > { %8998 = vst [vmem:[%s11845_s15 + $0x330] sm:$0xff] %v7495_v14 }
 0x881   : > { %v10673_v37 = vpop.f32.mrb[64].mxu1 }
 0x882   : > { %9025 = vst [vmem:[%s11845_s15 + $0x388] sm:$0xff] %v10673_v37  ;;  %v7693_v39 = vpop.f32.mrb[65].mxu1 }
 0x883   : > { %9024 = vst [vmem:[%s11845_s15 + $0x380] sm:$0xff] %v7693_v39 }
 0x885   : > { %v10676_v42 = vpop.f32.mrb[66].mxu1 }
 0x886   : > { %9027 = vst [vmem:[%s11845_s15 + $0x398] sm:$0xff] %v10676_v42  ;;  %v7703_v44 = vpop.f32.mrb[67].mxu1 }
 0x887   : > { %9026 = vst [vmem:[%s11845_s15 + $0x390] sm:$0xff] %v7703_v44 }
 0x889   : > { %v10679_v47 = vpop.f32.mrb[68].mxu1 }
 0x88a   : > { %9029 = vst [vmem:[%s11845_s15 + $0x3a8] sm:$0xff] %v10679_v47  ;;  %v7713_v49 = vpop.f32.mrb[69].mxu1 }
 0x88b   : > { %9028 = vst [vmem:[%s11845_s15 + $0x3a0] sm:$0xff] %v7713_v49 }
 0x88d   : > { %v10682_v52 = vpop.f32.mrb[70].mxu1 }
 0x88e   : > { %9031 = vst [vmem:[%s11845_s15 + $0x3b8] sm:$0xff] %v10682_v52  ;;  %v7723_v12 = vpop.f32.mrb[71].mxu1 }
 0x88f   : > { %9030 = vst [vmem:[%s11845_s15 + $0x3b0] sm:$0xff] %v7723_v12 }
 0x890 PF: > { %s7856_s3 = scalar_lea.sflag [#allocation4], %s755_s5 }
 0x891   : > { %s13774_s18 = sld [smem:[#allocation35_spill]]  ;;  %s13775_s22 = sld [smem:[#allocation46_spill]] }
 0x892   : > { %s7889_s11 = sshll.u32 %s11845_s15, 4  ;;  %s13776_s27 = sld [smem:[#allocation53_spill]]  ;;  %s7890_s11 = int_to_ptr.vmem [resolvable:$true] %s7889_s11 }
 0x893   : > { %s11387_s28 = smov 8192   ;;  %s11388_s5 = smov 122880  }
 0x894   : > { %s11389_s16 = smov 64   ;;  %s11390_s4 = smov 128  }
 0x895   : > { %s11391_s15 = smov 8   ;;  %s11392_s12 = smov [#allocation19]  }
 0x896   : > { %s11393_s19 = smov 0  }
 0x897   : > { %s9078_s14 = sshll.u32 %s13774_s18, 13  ;;  %p13777_p4 = scmp.ne.s32.totalorder %s13775_s22, 0 }
 0x898   : > { %s7872_s13 = scalar_lea.hbm %s13776_s27, %s9078_s14 }
 0x899   : > { %10953 = sst [smem:[#allocation20]] (%p13777_p4), %s11387_s28 }
 0x89a   : > { %10954 = sst [smem:[#allocation20 + $0x1]] (%p13777_p4), %s11388_s5 }
 0x89b   : > { %10955 = sst [smem:[#allocation20 + $0x2]] (%p13777_p4), %s11389_s16 }
 0x89c   : > { %10956 = sst [smem:[#allocation20 + $0x3]] (%p13777_p4), %s11390_s4 }
 0x89d   : > { %10957 = sst [smem:[#allocation20 + $0x4]] (%p13777_p4), %s11390_s4 }
 0x89e   : > { %10958 = sst [smem:[#allocation20 + $0x5]] (%p13777_p4), %s11391_s15 }
 0x89f   : > { %10959 = dma.general (%p13777_p4), %s7890_s11, 16384, %s7872_s13, %s7856_s3, %s11392_s12, [#allocation20], %s11393_s19, 0  }
 0x8a0 PF: > { %s13778_s21 = sld [smem:[#allocation29_spill]]  ;;  %p10981_p13 = scmp.ge.s32.totalorder %s11365_s26, 2 }
 0x8a1   : > { %s13779_s30 = sld [smem:[#allocation47_spill]] }
 0x8a6   : > { %s7917_s18 = sand.u32 1, %s13778_s21  }
 0x8a7   : > { %p13780_p3 = scmp.ne.s32.totalorder %s13779_s30, 0  ;;  %s7918_s14 = scalar_lea.sflag [#allocation4], %s7917_s18 }
 0x8a9   : > { %p10972_p2 = pnand %p10981_p13, %p13780_p3 }
 0x8ab   : > { %11308 = dma.done.wait (!%p10972_p2), %s7918_s14, 16384  }
 0x8ac   : > { %11310 = vsyncadd (!%p10972_p2), %s7918_s14, 4294950912  ;;  %s31_s26 = sadd.s32 1, %s11365_s26   ;;  %s13782_s13 = sld [smem:[#allocation30_spill]] }
 0x8ad   : > { %p13611_p8 = scmp.ge.s32.totalorder %s31_s26, 17   ;;  %s13783_s14 = sld [smem:[#allocation31_spill]] }
 0x8ae   : > { %s13784_s15 = sld [smem:[#allocation44_spill]]  ;;  %s13785_s3 = sld [smem:[#allocation45_spill]] }
 0x8af   : > { %s13786_s18 = sld [smem:[#allocation33_spill]]  ;;  %s13787_s22 = sld [smem:[#allocation42_spill]] }
 0x8b0   : > { %s13788_s21 = sld [smem:[#allocation34_spill]]  ;;  %s13789_s11 = sld [smem:[#allocation40_spill]] }
 0x8b1   : > { %s13790_s25 = sld [smem:[#allocation36_spill]]  ;;  %s13791_s27 = sld [smem:[#allocation38_spill]] }
 0x8b2   : > { %s13793_s16 = smov %s11329_s17  ;;  %s13795_s19 = smov %s11341_s20 }
 0x8b3   :  { %30 = sbr.rel (!%p13611_p8) target bundleno = 20 (0x14), region = 263 }
 0x8b4   : > { %s13794_s17 = smov %s13785_s3 }
 0x8b5   : > { %s13796_s20 = smov %s13787_s22  ;;  %s13797_s22 = smov %s11353_s23 }
 0x8b6   : > { %s13798_s23 = smov %s13789_s11 }
 0x8b7   : > { %s13799_s24 = smov %s13790_s25  ;;  %s13800_s25 = smov %s13791_s27 }
 0x8ba   :  { %7923 = vsyncpa [#allocation3], 1 }
 0x8bb   :  { %7925 = vsyncpa [#allocation3 + $0x1], 1 }
 0x8bc   :  { %7926 = vsyncpa [#allocation6], 1 }
 0x8bd   :  { %7928 = vsyncpa [#allocation6 + $0x1], 1 }
 0x8be   :  { %7929 = vsyncpa [#allocation10], 1 }
 0x8bf   :  { %7930 = vsyncpa [#allocation13], 1 }
 0x8c0   :  { %7931 = vsyncpa [#allocation4], 1 }
 0x8c1   :  { %7933 = vsyncpa [#allocation4 + $0x1], 1 }

</bundles_post_ra>
